<compile_context>
chip_gen: v6e
topology: v6e:2x2x1
jax: 0.10.0
libtpu: 0.0.40
codegen_flags: <defaults>
</compile_context>

<pallas_src>
import jax
import jax.numpy as jnp
from jax.experimental import pallas as pl
from jax.experimental.pallas import tpu as pltpu

BN_EPS = 1e-5


def _full_spec(shape):
    n = len(shape)
    return pl.BlockSpec(shape, lambda *_: (0,) * n)


# ------------------------------ Pallas kernels ------------------------------

def _conv_bn_relu_t_kernel(p_ref, w_ref, g_ref, b_ref, o_ref):
    """relu(BN(conv)) as a transposed GEMM: (C_out, K) @ (K, M) -> (C_out, M).

    M = B*OH*OW is lane-dense.  Training-mode BatchNorm is folded into one per-channel
    scale/shift computed from a single pass of sum / sum-of-squares along M.  The conv
    bias is omitted: it is exactly cancelled by the BN mean subtraction.
    """
    y = jnp.dot(w_ref[...], p_ref[...], preferred_element_type=jnp.float32)   # (C, M)
    inv_m = 1.0 / y.shape[1]
    mean = jnp.sum(y, axis=1, keepdims=True) * inv_m
    var = jnp.sum(y * y, axis=1, keepdims=True) * inv_m - mean * mean
    scale = g_ref[...] * jax.lax.rsqrt(var + BN_EPS)
    shift = b_ref[...] - mean * scale
    o_ref[...] = jnp.maximum(y * scale + shift, 0.0)
    # TODO(synk): BatchNorm running-stat updates (a training-time side effect) are not modeled.


def _conv3_lstm_head_kernel(p3_ref, act_ref, h0_ref, c0_ref,
                            w3_ref, g3_ref, b3_ref,
                            wg_ref, bg_ref, wo_ref, bo_ref,
                            out_ref, h1_ref, c1_ref):
    """conv3+BN3+ReLU -> one LSTM step (PyTorch gate order i,f,g,o) -> Linear -> softmax ->
    the model's (B,1,A)*(B,A) broadcast and x / x.sum() normalization, fully fused."""
    B, A = act_ref.shape
    H = h0_ref.shape[-1]
    C3 = w3_ref.shape[-1]
    M3 = p3_ref.shape[0]          # = S * B, rows ordered (spatial s, batch b)
    S = M3 // B
    F = S * C3                    # flattened conv-feature width

    # --- conv3 as GEMM + BN3 + ReLU (bias cancelled by BN, one-pass stats) ----------
    y3 = jnp.dot(p3_ref[...], w3_ref[...], preferred_element_type=jnp.float32)   # (S*B, C3)
    inv_m = 1.0 / M3
    mean = jnp.sum(y3, axis=0, keepdims=True) * inv_m
    var = jnp.sum(y3 * y3, axis=0, keepdims=True) * inv_m - mean * mean
    scale = g3_ref[...] * jax.lax.rsqrt(var + BN_EPS)
    shift = b3_ref[...] - mean * scale
    a3 = jnp.maximum(y3 * scale + shift, 0.0)                                     # (S*B, C3)

    # --- LSTM gate pre-activations: [feat | actions | h0] @ [Wih; Whh] + (b_ih+b_hh) --
    # One pre-stacked/permuted weight matrix (built once at init); the conv-feature block
    # is consumed per spatial position so the (S*B, C3) tile needs no in-kernel reshape.
    gates = (jnp.dot(act_ref[...], wg_ref[F:F + A, :],
                     preferred_element_type=jnp.float32)
             + jnp.dot(h0_ref[...], wg_ref[F + A:F + A + H, :],
                       preferred_element_type=jnp.float32)
             + bg_ref[...])
    for s in range(S):            # static unroll (S == 4)
        gates = gates + jnp.dot(a3[s * B:(s + 1) * B, :],
                                wg_ref[s * C3:(s + 1) * C3, :],
                                preferred_element_type=jnp.float32)

    i = jax.nn.sigmoid(gates[:, 0 * H:1 * H])
    f = jax.nn.sigmoid(gates[:, 1 * H:2 * H])
    g = jnp.tanh(gates[:, 2 * H:3 * H])
    o = jax.nn.sigmoid(gates[:, 3 * H:4 * H])
    c1 = f * c0_ref[...] + i * g
    h1 = o * jnp.tanh(c1)

    # --- output Linear + softmax (approx reciprocal -> EUP slot) ----------------------
    logits = jnp.dot(h1, wo_ref[...], preferred_element_type=jnp.float32) + bo_ref[...]
    mx = jnp.max(logits, axis=-1, keepdims=True)
    e = jnp.exp(logits - mx)
    probs = e * pl.reciprocal(jnp.sum(e, axis=-1, keepdims=True), approx=True)     # (B, A)

    # --- torch: softmax(B,1,A) * actions(B,A) -> (B,B,A); then x / x.sum() -----------
    acts = act_ref[...]
    total = jnp.sum(jnp.sum(probs, axis=0, keepdims=True) *
                    jnp.sum(acts, axis=0, keepdims=True))        # == sum of the (B,B,A) product
    inv_total = 1.0 / total
    for r in range(B):            # static unroll (B == 2); keeps everything 2-D in-kernel
        out_ref[r, :, :] = probs[r:r + 1, :] * acts * inv_total
    h1_ref[...] = h1
    c1_ref[...] = c1


# ------------------------------ kernel wrappers ------------------------------

_ARB1 = pltpu.CompilerParams(dimension_semantics=("arbitrary",))


def conv_bn_relu_t(pT, w, g, b):
    K, M = pT.shape
    C = w.shape[0]
    return pl.pallas_call(
        _conv_bn_relu_t_kernel,
        out_shape=jax.ShapeDtypeStruct((C, M), jnp.float32),
        grid=(1,),
        in_specs=[_full_spec((K, M)), _full_spec((C, K)),
                  _full_spec((C, 1)), _full_spec((C, 1))],
        out_specs=_full_spec((C, M)),
        compiler_params=_ARB1,
    )(pT, w, g, b)


def conv3_lstm_head(p3, actions, h0, c0, w3, g3, b3, wg, bg, wo, bo):
    M3, K3 = p3.shape
    B, A = actions.shape
    H = h0.shape[-1]
    C3 = w3.shape[-1]
    return pl.pallas_call(
        _conv3_lstm_head_kernel,
        out_shape=(jax.ShapeDtypeStruct((B, B, A), jnp.float32),
                   jax.ShapeDtypeStruct((B, H), jnp.float32),
                   jax.ShapeDtypeStruct((B, H), jnp.float32)),
        grid=(1,),
        in_specs=[_full_spec((M3, K3)), _full_spec((B, A)),
                  _full_spec((B, H)), _full_spec((B, H)),
                  _full_spec((K3, C3)), _full_spec((1, C3)), _full_spec((1, C3)),
                  _full_spec(wg.shape), _full_spec(bg.shape),
                  _full_spec(wo.shape), _full_spec(bo.shape)],
        out_specs=(_full_spec((B, B, A)), _full_spec((B, H)), _full_spec((B, H))),
        compiler_params=_ARB1,
    )(p3, actions, h0, c0, w3, g3, b3, wg, bg, wo, bo)


# ------------------------- XLA glue: patch extraction -------------------------

def _patches_T(x_cbhw, k=5, s=2):
    """(C, B, H, W) -> (k*k*C, B*OH*OW): rows ordered (kh, kw, c), cols ordered (b, oh, ow)."""
    C, B, H, W = x_cbhw.shape
    OH = (H - k) // s + 1
    OW = (W - k) // s + 1
    cols = [x_cbhw[:, :, kh:kh + s * (OH - 1) + 1:s, kw:kw + s * (OW - 1) + 1:s]
            for kh in range(k) for kw in range(k)]
    p = jnp.stack(cols, axis=0).reshape(k * k * C, B * OH * OW)
    return p, OH, OW


def _patches_rows(x_cbhw, k=5, s=2):
    """(C, B, H, W) -> (OH*OW*B, k*k*C): rows ordered (oh, ow, b), cols ordered (kh, kw, c).
    Used for the fused conv3+head kernel so the GEMM output rows are (spatial, batch)."""
    C, B, H, W = x_cbhw.shape
    OH = (H - k) // s + 1
    OW = (W - k) // s + 1
    cols = [x_cbhw[:, :, kh:kh + s * (OH - 1) + 1:s, kw:kw + s * (OW - 1) + 1:s]
            for kh in range(k) for kw in range(k)]
    t = jnp.stack(cols, axis=0)                                  # (k*k, C, B, OH, OW)
    return jnp.transpose(t, (3, 4, 2, 0, 1)).reshape(OH * OW * B, k * k * C)


# --------------------------------- parameters ---------------------------------

def init_raw_params(key, obs_hw=(40, 40), n_actions=8, hidden=256):
    """PyTorch-shaped parameters (as nn.Module would hold them)."""
    def conv_out(sz):
        return (sz - (5 - 1) - 1) // 2 + 1
    convw = conv_out(conv_out(conv_out(obs_hw[1])))
    convh = conv_out(conv_out(conv_out(obs_hw[0])))
    lin_in = convw * convh * 32 + n_actions
    ks = jax.random.split(key, 12)

    def rnd(k, shape, scale=0.05):
        return (scale * jax.random.normal(k, shape)).astype(jnp.float32)

    return dict(
        conv1_w=rnd(ks[0], (16, 1, 5, 5)), conv1_b=rnd(ks[1], (16,)),
        bn1_g=jnp.ones((16,), jnp.float32), bn1_b=jnp.zeros((16,), jnp.float32),
        conv2_w=rnd(ks[2], (32, 16, 5, 5)), conv2_b=rnd(ks[3], (32,)),
        bn2_g=jnp.ones((32,), jnp.float32), bn2_b=jnp.zeros((32,), jnp.float32),
        conv3_w=rnd(ks[4], (32, 32, 5, 5)), conv3_b=rnd(ks[5], (32,)),
        bn3_g=jnp.ones((32,), jnp.float32), bn3_b=jnp.zeros((32,), jnp.float32),
        lstm_wih=rnd(ks[6], (4 * hidden, lin_in)),
        lstm_whh=rnd(ks[7], (4 * hidden, hidden)),
        lstm_bih=rnd(ks[8], (4 * hidden,)),
        lstm_bhh=rnd(ks[9], (4 * hidden,)),
        lin2_w=rnd(ks[10], (n_actions, hidden)),
        lin2_b=rnd(ks[11], (n_actions,)),
    )


def pack_params(raw):
    """One-time layout of weights into kernel-ready form (no per-forward transposes)."""
    p = {}

    def conv_pack(w):  # OIHW -> (C_out, k*k*C_in) with K ordered (kh, kw, c_in)
        o, i, kh, kw = w.shape
        return w.transpose(0, 2, 3, 1).reshape(o, kh * kw * i)

    p["w1r"] = conv_pack(raw["conv1_w"])                      # (16, 25)
    p["w2r"] = conv_pack(raw["conv2_w"])                      # (32, 400)
    o3, i3, kh3, kw3 = raw["conv3_w"].shape
    # conv3 kept in (K, C_out) orientation: the head kernel's GEMM rows are (spatial, batch).
    p["w3r"] = raw["conv3_w"].transpose(2, 3, 1, 0).reshape(kh3 * kw3 * i3, o3)   # (800, 32)

    # NOTE: conv biases exist in the torch module but are exactly cancelled by training-mode
    # BatchNorm mean subtraction, so they are not packed / not used by the kernels.
    p["g1"] = raw["bn1_g"].reshape(-1, 1)
    p["b1"] = raw["bn1_b"].reshape(-1, 1)
    p["g2"] = raw["bn2_g"].reshape(-1, 1)
    p["b2"] = raw["bn2_b"].reshape(-1, 1)
    p["g3"] = raw["bn3_g"].reshape(1, -1)
    p["b3"] = raw["bn3_b"].reshape(1, -1)

    fourH, lin_in = raw["lstm_wih"].shape
    H = fourH // 4
    A = raw["lin2_w"].shape[0]
    C3 = o3
    F = lin_in - A                 # conv-feature width (= C3 * spatial)
    S = F // C3                    # spatial positions of the conv3 output
    wih_t = raw["lstm_wih"].T      # (lin_in, 4H), gate columns in torch order (i,f,g,o)
    whh_t = raw["lstm_whh"].T      # (H, 4H)
    # Torch flattens conv3 output as (c, s); the kernel consumes (s, c) blocks -> permute once.
    feat = wih_t[:F].reshape(C3, S, fourH).transpose(1, 0, 2).reshape(F, fourH)
    p["w_gates"] = jnp.concatenate([feat, wih_t[F:], whh_t], axis=0)    # (F+A+H, 4H)
    p["b_gates"] = (raw["lstm_bih"] + raw["lstm_bhh"]).reshape(1, fourH)
    p["w_out"] = raw["lin2_w"].T                                        # (H, A)
    p["b_out"] = raw["lin2_b"].reshape(1, -1)
    return p


# ---------------------------------- forward -----------------------------------

def policy_forward(p, x, actions, hidden):
    """p: packed params.  x: (B, H, W) or (B, 1, H, W);  actions: (B, A);
    hidden: (h0, c0) each (1, B, 256).  Returns the PyTorch module's (x, [new_h, new_c])."""
    x = x[:, None, :, :] if x.ndim == 3 else x
    B = x.shape[0]

    # conv1 + BN1 + ReLU (lane-dense transposed GEMM)
    p1, oh1, ow1 = _patches_T(jnp.transpose(x, (1, 0, 2, 3)))            # (25, B*18*18)
    a1 = conv_bn_relu_t(p1, p["w1r"], p["g1"], p["b1"])                  # (16, B*18*18)

    # conv2 + BN2 + ReLU
    p2, oh2, ow2 = _patches_T(a1.reshape(a1.shape[0], B, oh1, ow1))      # (400, B*7*7)
    a2 = conv_bn_relu_t(p2, p["w2r"], p["g2"], p["b2"])                  # (32, B*7*7)

    # conv3 + BN3 + ReLU + LSTM + Linear + softmax + final broadcast-normalize (fused)
    p3 = _patches_rows(a2.reshape(a2.shape[0], B, oh2, ow2))             # (4*B, 800)
    out, h1, c1 = conv3_lstm_head(
        p3, actions, hidden[0][0], hidden[1][0],
        p["w3r"], p["g3"], p["b3"],
        p["w_gates"], p["b_gates"], p["w_out"], p["b_out"])
    return out, [h1[None, :, :], c1[None, :, :]]


if __name__ == "__main__":
    B, A, HID, OBS = 2, 8, 256, 40
    key = jax.random.PRNGKey(0)
    kp, kx, ka, kh, kc = jax.random.split(key, 5)

    raw = init_raw_params(kp, obs_hw=(OBS, OBS), n_actions=A, hidden=HID)
    params = pack_params(raw)

    x = jax.random.normal(kx, (B, OBS, OBS), dtype=jnp.float32)
    actions = jax.random.uniform(ka, (B, A), dtype=jnp.float32)
    h0 = 0.1 * jax.random.normal(kh, (1, B, HID), dtype=jnp.float32)
    c0 = 0.1 * jax.random.normal(kc, (1, B, HID), dtype=jnp.float32)

    fwd = jax.jit(policy_forward)
    out, (new_h, new_c) = fwd(params, x, actions, (h0, c0))
    jax.block_until_ready((out, new_h, new_c))

    assert out.shape == (B, B, A)                 # same broadcast shape PyTorch produces
    assert new_h.shape == (1, B, HID) and new_c.shape == (1, B, HID)
    assert bool(jnp.all(jnp.isfinite(out)))
    print("KERNEL_OK")
</pallas_src>

<mosaic_0001>
module attributes {stable_mosaic.version = 11 : i64} {
  func.func @_conv_bn_relu_t_kernel(%arg0: i32, %arg1: memref<25x648xf32, #tpu.memory_space<vmem>>, %arg2: memref<16x25xf32, #tpu.memory_space<vmem>>, %arg3: memref<16x1xf32, #tpu.memory_space<vmem>>, %arg4: memref<16x1xf32, #tpu.memory_space<vmem>>, %arg5: memref<16x648xf32, #tpu.memory_space<vmem>>) attributes {dimension_semantics = [#tpu.dimension_semantics<arbitrary>], iteration_bounds = array<i64: 1>, scalar_prefetch = 0 : i64, scratch_operands = 0 : i64, tpu.core_type = #tpu.core_type<tc>, window_params = [{pipeline_mode = #tpu.pipeline_mode<synchronous>, transform_indices = @transform_0, window_bounds = array<i64: 25, 648>}, {pipeline_mode = #tpu.pipeline_mode<synchronous>, transform_indices = @transform_1, window_bounds = array<i64: 16, 25>}, {pipeline_mode = #tpu.pipeline_mode<synchronous>, transform_indices = @transform_2, window_bounds = array<i64: 16, 1>}, {pipeline_mode = #tpu.pipeline_mode<synchronous>, transform_indices = @transform_3, window_bounds = array<i64: 16, 1>}, {pipeline_mode = #tpu.pipeline_mode<synchronous>, transform_indices = @transform_4, window_bounds = array<i64: 16, 648>}]} {
    %c0 = arith.constant 0 : index
    %c0_0 = arith.constant 0 : index
    %0 = vector.load %arg2[%c0, %c0_0] : memref<16x25xf32, #tpu.memory_space<vmem>>, vector<16x25xf32>
    %c0_1 = arith.constant 0 : index
    %c0_2 = arith.constant 0 : index
    %1 = vector.load %arg1[%c0_1, %c0_2] : memref<25x648xf32, #tpu.memory_space<vmem>>, vector<25x648xf32>
    %cst = arith.constant dense<0.000000e+00> : vector<16x648xf32>
    %2 = tpu.matmul %0, %1, %cst {dimension_numbers = #tpu.dot_dimension_numbers<[1], [0], [0], [1], [0, 0, 1, 1], [], []>} : vector<16x25xf32>, vector<25x648xf32>, vector<16x648xf32> -> vector<16x648xf32>
    %cst_3 = arith.constant dense<0.000000e+00> : vector<16xf32>
    %3 = vector.multi_reduction <add>, %2, %cst_3 [1] : vector<16x648xf32> to vector<16xf32>
    %4 = vector.shape_cast %3 : vector<16xf32> to vector<16x1xf32>
    %cst_4 = arith.constant 0.00154320989 : f32
    %5 = vector.broadcast %cst_4 : f32 to vector<16x1xf32>
    %6 = arith.mulf %4, %5 : vector<16x1xf32>
    %7 = arith.mulf %2, %2 : vector<16x648xf32>
    %cst_5 = arith.constant dense<0.000000e+00> : vector<16xf32>
    %8 = vector.multi_reduction <add>, %7, %cst_5 [1] : vector<16x648xf32> to vector<16xf32>
    %9 = vector.shape_cast %8 : vector<16xf32> to vector<16x1xf32>
    %cst_6 = arith.constant 0.00154320989 : f32
    %10 = vector.broadcast %cst_6 : f32 to vector<16x1xf32>
    %11 = arith.mulf %9, %10 : vector<16x1xf32>
    %12 = arith.mulf %6, %6 : vector<16x1xf32>
    %13 = arith.subf %11, %12 : vector<16x1xf32>
    %c0_7 = arith.constant 0 : index
    %c0_8 = arith.constant 0 : index
    %14 = vector.load %arg3[%c0_7, %c0_8] : memref<16x1xf32, #tpu.memory_space<vmem>>, vector<16x1xf32>
    %cst_9 = arith.constant 9.99999974E-6 : f32
    %15 = vector.broadcast %cst_9 : f32 to vector<16x1xf32>
    %16 = arith.addf %13, %15 : vector<16x1xf32>
    %17 = math.rsqrt %16 : vector<16x1xf32>
    %18 = arith.mulf %14, %17 : vector<16x1xf32>
    %c0_10 = arith.constant 0 : index
    %c0_11 = arith.constant 0 : index
    %19 = vector.load %arg4[%c0_10, %c0_11] : memref<16x1xf32, #tpu.memory_space<vmem>>, vector<16x1xf32>
    %20 = arith.mulf %6, %18 : vector<16x1xf32>
    %21 = arith.subf %19, %20 : vector<16x1xf32>
    %22 = vector.broadcast %18 : vector<16x1xf32> to vector<16x648xf32>
    %23 = arith.mulf %2, %22 : vector<16x648xf32>
    %24 = vector.broadcast %21 : vector<16x1xf32> to vector<16x648xf32>
    %25 = arith.addf %23, %24 : vector<16x648xf32>
    %cst_12 = arith.constant 0.000000e+00 : f32
    %26 = vector.broadcast %cst_12 : f32 to vector<16x648xf32>
    %27 = arith.maximumf %25, %26 : vector<16x648xf32>
    %c0_13 = arith.constant 0 : index
    %c0_14 = arith.constant 0 : index
    %28 = vector.load %arg5[%c0_13, %c0_14] : memref<16x648xf32, #tpu.memory_space<vmem>>, vector<16x648xf32>
    tpu.vector_store %arg5[%c0_13, %c0_14], %27 {strides = array<i32>} : memref<16x648xf32, #tpu.memory_space<vmem>>, vector<16x648xf32>,
    return
  }
  func.func @transform_0(%arg0: i32) -> (i32, i32) {
    %c0_i32 = arith.constant 0 : i32
    %c0_i32_0 = arith.constant 0 : i32
    %c0_i32_1 = arith.constant 0 : i32
    return %c0_i32, %c0_i32_0 : i32, i32
  }
  func.func @transform_1(%arg0: i32) -> (i32, i32) {
    %c0_i32 = arith.constant 0 : i32
    %c0_i32_0 = arith.constant 0 : i32
    %c0_i32_1 = arith.constant 0 : i32
    return %c0_i32, %c0_i32_0 : i32, i32
  }
  func.func @transform_2(%arg0: i32) -> (i32, i32) {
    %c0_i32 = arith.constant 0 : i32
    %c0_i32_0 = arith.constant 0 : i32
    %c0_i32_1 = arith.constant 0 : i32
    return %c0_i32, %c0_i32_0 : i32, i32
  }
  func.func @transform_3(%arg0: i32) -> (i32, i32) {
    %c0_i32 = arith.constant 0 : i32
    %c0_i32_0 = arith.constant 0 : i32
    %c0_i32_1 = arith.constant 0 : i32
    return %c0_i32, %c0_i32_0 : i32, i32
  }
  func.func @transform_4(%arg0: i32) -> (i32, i32) {
    %c0_i32 = arith.constant 0 : i32
    %c0_i32_0 = arith.constant 0 : i32
    %c0_i32_1 = arith.constant 0 : i32
    return %c0_i32, %c0_i32_0 : i32, i32
  }
}

module attributes {stable_mosaic.version = 11 : i64} {
  func.func @_conv_bn_relu_t_kernel(%arg0: i32, %arg1: memref<400x98xf32, #tpu.memory_space<vmem>>, %arg2: memref<32x400xf32, #tpu.memory_space<vmem>>, %arg3: memref<32x1xf32, #tpu.memory_space<vmem>>, %arg4: memref<32x1xf32, #tpu.memory_space<vmem>>, %arg5: memref<32x98xf32, #tpu.memory_space<vmem>>) attributes {dimension_semantics = [#tpu.dimension_semantics<arbitrary>], iteration_bounds = array<i64: 1>, scalar_prefetch = 0 : i64, scratch_operands = 0 : i64, tpu.core_type = #tpu.core_type<tc>, window_params = [{pipeline_mode = #tpu.pipeline_mode<synchronous>, transform_indices = @transform_0, window_bounds = array<i64: 400, 98>}, {pipeline_mode = #tpu.pipeline_mode<synchronous>, transform_indices = @transform_1, window_bounds = array<i64: 32, 400>}, {pipeline_mode = #tpu.pipeline_mode<synchronous>, transform_indices = @transform_2, window_bounds = array<i64: 32, 1>}, {pipeline_mode = #tpu.pipeline_mode<synchronous>, transform_indices = @transform_3, window_bounds = array<i64: 32, 1>}, {pipeline_mode = #tpu.pipeline_mode<synchronous>, transform_indices = @transform_4, window_bounds = array<i64: 32, 98>}]} {
    %c0 = arith.constant 0 : index
    %c0_0 = arith.constant 0 : index
    %0 = vector.load %arg2[%c0, %c0_0] : memref<32x400xf32, #tpu.memory_space<vmem>>, vector<32x400xf32>
    %c0_1 = arith.constant 0 : index
    %c0_2 = arith.constant 0 : index
    %1 = vector.load %arg1[%c0_1, %c0_2] : memref<400x98xf32, #tpu.memory_space<vmem>>, vector<400x98xf32>
    %cst = arith.constant dense<0.000000e+00> : vector<32x98xf32>
    %2 = tpu.matmul %0, %1, %cst {dimension_numbers = #tpu.dot_dimension_numbers<[1], [0], [0], [1], [0, 0, 1, 1], [], []>} : vector<32x400xf32>, vector<400x98xf32>, vector<32x98xf32> -> vector<32x98xf32>
    %cst_3 = arith.constant dense<0.000000e+00> : vector<32xf32>
    %3 = vector.multi_reduction <add>, %2, %cst_3 [1] : vector<32x98xf32> to vector<32xf32>
    %4 = vector.shape_cast %3 : vector<32xf32> to vector<32x1xf32>
    %cst_4 = arith.constant 0.0102040814 : f32
    %5 = vector.broadcast %cst_4 : f32 to vector<32x1xf32>
    %6 = arith.mulf %4, %5 : vector<32x1xf32>
    %7 = arith.mulf %2, %2 : vector<32x98xf32>
    %cst_5 = arith.constant dense<0.000000e+00> : vector<32xf32>
    %8 = vector.multi_reduction <add>, %7, %cst_5 [1] : vector<32x98xf32> to vector<32xf32>
    %9 = vector.shape_cast %8 : vector<32xf32> to vector<32x1xf32>
    %cst_6 = arith.constant 0.0102040814 : f32
    %10 = vector.broadcast %cst_6 : f32 to vector<32x1xf32>
    %11 = arith.mulf %9, %10 : vector<32x1xf32>
    %12 = arith.mulf %6, %6 : vector<32x1xf32>
    %13 = arith.subf %11, %12 : vector<32x1xf32>
    %c0_7 = arith.constant 0 : index
    %c0_8 = arith.constant 0 : index
    %14 = vector.load %arg3[%c0_7, %c0_8] : memref<32x1xf32, #tpu.memory_space<vmem>>, vector<32x1xf32>
    %cst_9 = arith.constant 9.99999974E-6 : f32
    %15 = vector.broadcast %cst_9 : f32 to vector<32x1xf32>
    %16 = arith.addf %13, %15 : vector<32x1xf32>
    %17 = math.rsqrt %16 : vector<32x1xf32>
    %18 = arith.mulf %14, %17 : vector<32x1xf32>
    %c0_10 = arith.constant 0 : index
    %c0_11 = arith.constant 0 : index
    %19 = vector.load %arg4[%c0_10, %c0_11] : memref<32x1xf32, #tpu.memory_space<vmem>>, vector<32x1xf32>
    %20 = arith.mulf %6, %18 : vector<32x1xf32>
    %21 = arith.subf %19, %20 : vector<32x1xf32>
    %22 = vector.broadcast %18 : vector<32x1xf32> to vector<32x98xf32>
    %23 = arith.mulf %2, %22 : vector<32x98xf32>
    %24 = vector.broadcast %21 : vector<32x1xf32> to vector<32x98xf32>
    %25 = arith.addf %23, %24 : vector<32x98xf32>
    %cst_12 = arith.constant 0.000000e+00 : f32
    %26 = vector.broadcast %cst_12 : f32 to vector<32x98xf32>
    %27 = arith.maximumf %25, %26 : vector<32x98xf32>
    %c0_13 = arith.constant 0 : index
    %c0_14 = arith.constant 0 : index
    %28 = vector.load %arg5[%c0_13, %c0_14] : memref<32x98xf32, #tpu.memory_space<vmem>>, vector<32x98xf32>
    tpu.vector_store %arg5[%c0_13, %c0_14], %27 {strides = array<i32>} : memref<32x98xf32, #tpu.memory_space<vmem>>, vector<32x98xf32>,
    return
  }
  func.func @transform_0(%arg0: i32) -> (i32, i32) {
    %c0_i32 = arith.constant 0 : i32
    %c0_i32_0 = arith.constant 0 : i32
    %c0_i32_1 = arith.constant 0 : i32
    return %c0_i32, %c0_i32_0 : i32, i32
  }
  func.func @transform_1(%arg0: i32) -> (i32, i32) {
    %c0_i32 = arith.constant 0 : i32
    %c0_i32_0 = arith.constant 0 : i32
    %c0_i32_1 = arith.constant 0 : i32
    return %c0_i32, %c0_i32_0 : i32, i32
  }
  func.func @transform_2(%arg0: i32) -> (i32, i32) {
    %c0_i32 = arith.constant 0 : i32
    %c0_i32_0 = arith.constant 0 : i32
    %c0_i32_1 = arith.constant 0 : i32
    return %c0_i32, %c0_i32_0 : i32, i32
  }
  func.func @transform_3(%arg0: i32) -> (i32, i32) {
    %c0_i32 = arith.constant 0 : i32
    %c0_i32_0 = arith.constant 0 : i32
    %c0_i32_1 = arith.constant 0 : i32
    return %c0_i32, %c0_i32_0 : i32, i32
  }
  func.func @transform_4(%arg0: i32) -> (i32, i32) {
    %c0_i32 = arith.constant 0 : i32
    %c0_i32_0 = arith.constant 0 : i32
    %c0_i32_1 = arith.constant 0 : i32
    return %c0_i32, %c0_i32_0 : i32, i32
  }
}

module attributes {stable_mosaic.version = 11 : i64} {
  func.func @_conv3_lstm_head_kernel(%arg0: i32, %arg1: memref<8x800xf32, #tpu.memory_space<vmem>>, %arg2: memref<2x8xf32, #tpu.memory_space<vmem>>, %arg3: memref<2x256xf32, #tpu.memory_space<vmem>>, %arg4: memref<2x256xf32, #tpu.memory_space<vmem>>, %arg5: memref<800x32xf32, #tpu.memory_space<vmem>>, %arg6: memref<1x32xf32, #tpu.memory_space<vmem>>, %arg7: memref<1x32xf32, #tpu.memory_space<vmem>>, %arg8: memref<392x1024xf32, #tpu.memory_space<vmem>>, %arg9: memref<1x1024xf32, #tpu.memory_space<vmem>>, %arg10: memref<256x8xf32, #tpu.memory_space<vmem>>, %arg11: memref<1x8xf32, #tpu.memory_space<vmem>>, %arg12: memref<2x2x8xf32, #tpu.memory_space<vmem>>, %arg13: memref<2x256xf32, #tpu.memory_space<vmem>>, %arg14: memref<2x256xf32, #tpu.memory_space<vmem>>) attributes {dimension_semantics = [#tpu.dimension_semantics<arbitrary>], iteration_bounds = array<i64: 1>, scalar_prefetch = 0 : i64, scratch_operands = 0 : i64, tpu.core_type = #tpu.core_type<tc>, window_params = [{pipeline_mode = #tpu.pipeline_mode<synchronous>, transform_indices = @transform_0, window_bounds = array<i64: 8, 800>}, {pipeline_mode = #tpu.pipeline_mode<synchronous>, transform_indices = @transform_1, window_bounds = array<i64: 2, 8>}, {pipeline_mode = #tpu.pipeline_mode<synchronous>, transform_indices = @transform_2, window_bounds = array<i64: 2, 256>}, {pipeline_mode = #tpu.pipeline_mode<synchronous>, transform_indices = @transform_3, window_bounds = array<i64: 2, 256>}, {pipeline_mode = #tpu.pipeline_mode<synchronous>, transform_indices = @transform_4, window_bounds = array<i64: 800, 32>}, {pipeline_mode = #tpu.pipeline_mode<synchronous>, transform_indices = @transform_5, window_bounds = array<i64: 1, 32>}, {pipeline_mode = #tpu.pipeline_mode<synchronous>, transform_indices = @transform_6, window_bounds = array<i64: 1, 32>}, {pipeline_mode = #tpu.pipeline_mode<synchronous>, transform_indices = @transform_7, window_bounds = array<i64: 392, 1024>}, {pipeline_mode = #tpu.pipeline_mode<synchronous>, transform_indices = @transform_8, window_bounds = array<i64: 1, 1024>}, {pipeline_mode = #tpu.pipeline_mode<synchronous>, transform_indices = @transform_9, window_bounds = array<i64: 256, 8>}, {pipeline_mode = #tpu.pipeline_mode<synchronous>, transform_indices = @transform_10, window_bounds = array<i64: 1, 8>}, {pipeline_mode = #tpu.pipeline_mode<synchronous>, transform_indices = @transform_11, window_bounds = array<i64: 2, 2, 8>}, {pipeline_mode = #tpu.pipeline_mode<synchronous>, transform_indices = @transform_12, window_bounds = array<i64: 2, 256>}, {pipeline_mode = #tpu.pipeline_mode<synchronous>, transform_indices = @transform_13, window_bounds = array<i64: 2, 256>}]} {
    %c0 = arith.constant 0 : index
    %c0_0 = arith.constant 0 : index
    %0 = vector.load %arg1[%c0, %c0_0] : memref<8x800xf32, #tpu.memory_space<vmem>>, vector<8x800xf32>
    %c0_1 = arith.constant 0 : index
    %c0_2 = arith.constant 0 : index
    %1 = vector.load %arg5[%c0_1, %c0_2] : memref<800x32xf32, #tpu.memory_space<vmem>>, vector<800x32xf32>
    %cst = arith.constant dense<0.000000e+00> : vector<8x32xf32>
    %2 = tpu.matmul %0, %1, %cst {dimension_numbers = #tpu.dot_dimension_numbers<[1], [0], [0], [1], [0, 0, 1, 1], [], []>} : vector<8x800xf32>, vector<800x32xf32>, vector<8x32xf32> -> vector<8x32xf32>
    %cst_3 = arith.constant dense<0.000000e+00> : vector<32xf32>
    %3 = vector.multi_reduction <add>, %2, %cst_3 [0] : vector<8x32xf32> to vector<32xf32>
    %4 = vector.shape_cast %3 : vector<32xf32> to vector<1x32xf32>
    %cst_4 = arith.constant 1.250000e-01 : f32
    %5 = vector.broadcast %cst_4 : f32 to vector<1x32xf32>
    %6 = arith.mulf %4, %5 : vector<1x32xf32>
    %7 = arith.mulf %2, %2 : vector<8x32xf32>
    %cst_5 = arith.constant dense<0.000000e+00> : vector<32xf32>
    %8 = vector.multi_reduction <add>, %7, %cst_5 [0] : vector<8x32xf32> to vector<32xf32>
    %9 = vector.shape_cast %8 : vector<32xf32> to vector<1x32xf32>
    %cst_6 = arith.constant 1.250000e-01 : f32
    %10 = vector.broadcast %cst_6 : f32 to vector<1x32xf32>
    %11 = arith.mulf %9, %10 : vector<1x32xf32>
    %12 = arith.mulf %6, %6 : vector<1x32xf32>
    %13 = arith.subf %11, %12 : vector<1x32xf32>
    %c0_7 = arith.constant 0 : index
    %c0_8 = arith.constant 0 : index
    %14 = vector.load %arg6[%c0_7, %c0_8] : memref<1x32xf32, #tpu.memory_space<vmem>>, vector<1x32xf32>
    %cst_9 = arith.constant 9.99999974E-6 : f32
    %15 = vector.broadcast %cst_9 : f32 to vector<1x32xf32>
    %16 = arith.addf %13, %15 : vector<1x32xf32>
    %17 = math.rsqrt %16 : vector<1x32xf32>
    %18 = arith.mulf %14, %17 : vector<1x32xf32>
    %c0_10 = arith.constant 0 : index
    %c0_11 = arith.constant 0 : index
    %19 = vector.load %arg7[%c0_10, %c0_11] : memref<1x32xf32, #tpu.memory_space<vmem>>, vector<1x32xf32>
    %20 = arith.mulf %6, %18 : vector<1x32xf32>
    %21 = arith.subf %19, %20 : vector<1x32xf32>
    %22 = vector.broadcast %18 : vector<1x32xf32> to vector<8x32xf32>
    %23 = arith.mulf %2, %22 : vector<8x32xf32>
    %24 = vector.broadcast %21 : vector<1x32xf32> to vector<8x32xf32>
    %25 = arith.addf %23, %24 : vector<8x32xf32>
    %cst_12 = arith.constant 0.000000e+00 : f32
    %26 = vector.broadcast %cst_12 : f32 to vector<8x32xf32>
    %27 = arith.maximumf %25, %26 : vector<8x32xf32>
    %c0_13 = arith.constant 0 : index
    %c0_14 = arith.constant 0 : index
    %28 = vector.load %arg2[%c0_13, %c0_14] : memref<2x8xf32, #tpu.memory_space<vmem>>, vector<2x8xf32>
    %c128 = arith.constant 128 : index
    %c0_15 = arith.constant 0 : index
    %29 = vector.load %arg8[%c128, %c0_15] : memref<392x1024xf32, #tpu.memory_space<vmem>>, vector<8x1024xf32>
    %cst_16 = arith.constant dense<0.000000e+00> : vector<2x1024xf32>
    %30 = tpu.matmul %28, %29, %cst_16 {dimension_numbers = #tpu.dot_dimension_numbers<[1], [0], [0], [1], [0, 0, 1, 1], [], []>} : vector<2x8xf32>, vector<8x1024xf32>, vector<2x1024xf32> -> vector<2x1024xf32>
    %c0_17 = arith.constant 0 : index
    %c0_18 = arith.constant 0 : index
    %31 = vector.load %arg3[%c0_17, %c0_18] : memref<2x256xf32, #tpu.memory_space<vmem>>, vector<2x256xf32>
    %c136 = arith.constant 136 : index
    %c0_19 = arith.constant 0 : index
    %32 = vector.load %arg8[%c136, %c0_19] : memref<392x1024xf32, #tpu.memory_space<vmem>>, vector<256x1024xf32>
    %cst_20 = arith.constant dense<0.000000e+00> : vector<2x1024xf32>
    %33 = tpu.matmul %31, %32, %cst_20 {dimension_numbers = #tpu.dot_dimension_numbers<[1], [0], [0], [1], [0, 0, 1, 1], [], []>} : vector<2x256xf32>, vector<256x1024xf32>, vector<2x1024xf32> -> vector<2x1024xf32>
    %34 = arith.addf %30, %33 : vector<2x1024xf32>
    %c0_21 = arith.constant 0 : index
    %c0_22 = arith.constant 0 : index
    %35 = vector.load %arg9[%c0_21, %c0_22] : memref<1x1024xf32, #tpu.memory_space<vmem>>, vector<1x1024xf32>
    %36 = vector.broadcast %35 : vector<1x1024xf32> to vector<2x1024xf32>
    %37 = arith.addf %34, %36 : vector<2x1024xf32>
    %38 = vector.extract_strided_slice %27 {offsets = [0, 0], sizes = [2, 32], strides = [1, 1]} : vector<8x32xf32> to vector<2x32xf32>
    %c0_23 = arith.constant 0 : index
    %c0_24 = arith.constant 0 : index
    %39 = vector.load %arg8[%c0_23, %c0_24] : memref<392x1024xf32, #tpu.memory_space<vmem>>, vector<32x1024xf32>
    %cst_25 = arith.constant dense<0.000000e+00> : vector<2x1024xf32>
    %40 = tpu.matmul %38, %39, %cst_25 {dimension_numbers = #tpu.dot_dimension_numbers<[1], [0], [0], [1], [0, 0, 1, 1], [], []>} : vector<2x32xf32>, vector<32x1024xf32>, vector<2x1024xf32> -> vector<2x1024xf32>
    %41 = arith.addf %37, %40 : vector<2x1024xf32>
    %42 = vector.extract_strided_slice %27 {offsets = [2, 0], sizes = [2, 32], strides = [1, 1]} : vector<8x32xf32> to vector<2x32xf32>
    %c32 = arith.constant 32 : index
    %c0_26 = arith.constant 0 : index
    %43 = vector.load %arg8[%c32, %c0_26] : memref<392x1024xf32, #tpu.memory_space<vmem>>, vector<32x1024xf32>
    %cst_27 = arith.constant dense<0.000000e+00> : vector<2x1024xf32>
    %44 = tpu.matmul %42, %43, %cst_27 {dimension_numbers = #tpu.dot_dimension_numbers<[1], [0], [0], [1], [0, 0, 1, 1], [], []>} : vector<2x32xf32>, vector<32x1024xf32>, vector<2x1024xf32> -> vector<2x1024xf32>
    %45 = arith.addf %41, %44 : vector<2x1024xf32>
    %46 = vector.extract_strided_slice %27 {offsets = [4, 0], sizes = [2, 32], strides = [1, 1]} : vector<8x32xf32> to vector<2x32xf32>
    %c64 = arith.constant 64 : index
    %c0_28 = arith.constant 0 : index
    %47 = vector.load %arg8[%c64, %c0_28] : memref<392x1024xf32, #tpu.memory_space<vmem>>, vector<32x1024xf32>
    %cst_29 = arith.constant dense<0.000000e+00> : vector<2x1024xf32>
    %48 = tpu.matmul %46, %47, %cst_29 {dimension_numbers = #tpu.dot_dimension_numbers<[1], [0], [0], [1], [0, 0, 1, 1], [], []>} : vector<2x32xf32>, vector<32x1024xf32>, vector<2x1024xf32> -> vector<2x1024xf32>
    %49 = arith.addf %45, %48 : vector<2x1024xf32>
    %50 = vector.extract_strided_slice %27 {offsets = [6, 0], sizes = [2, 32], strides = [1, 1]} : vector<8x32xf32> to vector<2x32xf32>
    %c96 = arith.constant 96 : index
    %c0_30 = arith.constant 0 : index
    %51 = vector.load %arg8[%c96, %c0_30] : memref<392x1024xf32, #tpu.memory_space<vmem>>, vector<32x1024xf32>
    %cst_31 = arith.constant dense<0.000000e+00> : vector<2x1024xf32>
    %52 = tpu.matmul %50, %51, %cst_31 {dimension_numbers = #tpu.dot_dimension_numbers<[1], [0], [0], [1], [0, 0, 1, 1], [], []>} : vector<2x32xf32>, vector<32x1024xf32>, vector<2x1024xf32> -> vector<2x1024xf32>
    %53 = arith.addf %49, %52 : vector<2x1024xf32>
    %54 = vector.extract_strided_slice %53 {offsets = [0, 0], sizes = [2, 256], strides = [1, 1]} : vector<2x1024xf32> to vector<2x256xf32>
    %55 = arith.negf %54 : vector<2x256xf32>
    %56 = math.exp %55 : vector<2x256xf32>
    %cst_32 = arith.constant 1.000000e+00 : f32
    %57 = vector.broadcast %cst_32 : f32 to vector<2x256xf32>
    %58 = arith.addf %57, %56 : vector<2x256xf32>
    %59 = arith.divf %57, %58 : vector<2x256xf32>
    %60 = vector.extract_strided_slice %53 {offsets = [0, 256], sizes = [2, 256], strides = [1, 1]} : vector<2x1024xf32> to vector<2x256xf32>
    %61 = arith.negf %60 : vector<2x256xf32>
    %62 = math.exp %61 : vector<2x256xf32>
    %cst_33 = arith.constant 1.000000e+00 : f32
    %63 = vector.broadcast %cst_33 : f32 to vector<2x256xf32>
    %64 = arith.addf %63, %62 : vector<2x256xf32>
    %65 = arith.divf %63, %64 : vector<2x256xf32>
    %66 = vector.extract_strided_slice %53 {offsets = [0, 512], sizes = [2, 256], strides = [1, 1]} : vector<2x1024xf32> to vector<2x256xf32>
    %67 = math.tanh %66 : vector<2x256xf32>
    %68 = vector.extract_strided_slice %53 {offsets = [0, 768], sizes = [2, 256], strides = [1, 1]} : vector<2x1024xf32> to vector<2x256xf32>
    %69 = arith.negf %68 : vector<2x256xf32>
    %70 = math.exp %69 : vector<2x256xf32>
    %cst_34 = arith.constant 1.000000e+00 : f32
    %71 = vector.broadcast %cst_34 : f32 to vector<2x256xf32>
    %72 = arith.addf %71, %70 : vector<2x256xf32>
    %73 = arith.divf %71, %72 : vector<2x256xf32>
    %c0_35 = arith.constant 0 : index
    %c0_36 = arith.constant 0 : index
    %74 = vector.load %arg4[%c0_35, %c0_36] : memref<2x256xf32, #tpu.memory_space<vmem>>, vector<2x256xf32>
    %75 = arith.mulf %65, %74 : vector<2x256xf32>
    %76 = arith.mulf %59, %67 : vector<2x256xf32>
    %77 = arith.addf %75, %76 : vector<2x256xf32>
    %78 = math.tanh %77 : vector<2x256xf32>
    %79 = arith.mulf %73, %78 : vector<2x256xf32>
    %c0_37 = arith.constant 0 : index
    %c0_38 = arith.constant 0 : index
    %80 = vector.load %arg10[%c0_37, %c0_38] : memref<256x8xf32, #tpu.memory_space<vmem>>, vector<256x8xf32>
    %cst_39 = arith.constant dense<0.000000e+00> : vector<2x8xf32>
    %81 = tpu.matmul %79, %80, %cst_39 {dimension_numbers = #tpu.dot_dimension_numbers<[1], [0], [0], [1], [0, 0, 1, 1], [], []>} : vector<2x256xf32>, vector<256x8xf32>, vector<2x8xf32> -> vector<2x8xf32>
    %c0_40 = arith.constant 0 : index
    %c0_41 = arith.constant 0 : index
    %82 = vector.load %arg11[%c0_40, %c0_41] : memref<1x8xf32, #tpu.memory_space<vmem>>, vector<1x8xf32>
    %83 = vector.broadcast %82 : vector<1x8xf32> to vector<2x8xf32>
    %84 = arith.addf %81, %83 : vector<2x8xf32>
    %cst_42 = arith.constant dense<0xFF800000> : vector<2xf32>
    %85 = vector.multi_reduction <maximumf>, %84, %cst_42 [1] : vector<2x8xf32> to vector<2xf32>
    %86 = vector.shape_cast %85 : vector<2xf32> to vector<2x1xf32>
    %87 = vector.broadcast %86 : vector<2x1xf32> to vector<2x8xf32>
    %88 = arith.subf %84, %87 : vector<2x8xf32>
    %89 = math.exp %88 : vector<2x8xf32>
    %cst_43 = arith.constant dense<0.000000e+00> : vector<2xf32>
    %90 = vector.multi_reduction <add>, %89, %cst_43 [1] : vector<2x8xf32> to vector<2xf32>
    %91 = vector.shape_cast %90 : vector<2xf32> to vector<2x1xf32>
    %92 = tpu.reciprocal %91 {approx = true} : vector<2x1xf32> -> vector<2x1xf32>
    %93 = vector.broadcast %92 : vector<2x1xf32> to vector<2x8xf32>
    %94 = arith.mulf %89, %93 : vector<2x8xf32>
    %c0_44 = arith.constant 0 : index
    %c0_45 = arith.constant 0 : index
    %95 = vector.load %arg2[%c0_44, %c0_45] : memref<2x8xf32, #tpu.memory_space<vmem>>, vector<2x8xf32>
    %cst_46 = arith.constant dense<0.000000e+00> : vector<8xf32>
    %96 = vector.multi_reduction <add>, %94, %cst_46 [0] : vector<2x8xf32> to vector<8xf32>
    %97 = vector.shape_cast %96 : vector<8xf32> to vector<1x8xf32>
    %cst_47 = arith.constant dense<0.000000e+00> : vector<8xf32>
    %98 = vector.multi_reduction <add>, %95, %cst_47 [0] : vector<2x8xf32> to vector<8xf32>
    %99 = vector.shape_cast %98 : vector<8xf32> to vector<1x8xf32>
    %100 = arith.mulf %97, %99 : vector<1x8xf32>
    %101 = vector.shape_cast %100 : vector<1x8xf32> to vector<1x1x8xf32>
    %cst_48 = arith.constant dense<0.000000e+00> : vector<1xf32>
    %102 = vector.multi_reduction <add>, %101, %cst_48 [1, 2] : vector<1x1x8xf32> to vector<1xf32>
    %103 = vector.shape_cast %102 : vector<1xf32> to vector<1x1x1xf32>
    %104 = vector.extract %103[0, 0, 0] : f32 from vector<1x1x1xf32>
    %cst_49 = arith.constant 1.000000e+00 : f32
    %105 = arith.divf %cst_49, %104 : f32
    %106 = vector.extract_strided_slice %94 {offsets = [0, 0], sizes = [1, 8], strides = [1, 1]} : vector<2x8xf32> to vector<1x8xf32>
    %107 = vector.broadcast %106 : vector<1x8xf32> to vector<2x8xf32>
    %108 = arith.mulf %107, %95 : vector<2x8xf32>
    %109 = vector.broadcast %105 : f32 to vector<2x8xf32>
    %110 = arith.mulf %108, %109 : vector<2x8xf32>
    %c0_50 = arith.constant 0 : index
    %c0_51 = arith.constant 0 : index
    %c0_52 = arith.constant 0 : index
    %111 = vector.load %arg12[%c0_50, %c0_51, %c0_52] : memref<2x2x8xf32, #tpu.memory_space<vmem>>, vector<1x2x8xf32>
    %112 = vector.shape_cast %111 : vector<1x2x8xf32> to vector<2x8xf32>
    %113 = vector.shape_cast %110 : vector<2x8xf32> to vector<1x2x8xf32>
    tpu.vector_store %arg12[%c0_50, %c0_51, %c0_52], %113 {strides = array<i32>} : memref<2x2x8xf32, #tpu.memory_space<vmem>>, vector<1x2x8xf32>,
    %114 = vector.extract_strided_slice %94 {offsets = [1, 0], sizes = [1, 8], strides = [1, 1]} : vector<2x8xf32> to vector<1x8xf32>
    %115 = vector.broadcast %114 : vector<1x8xf32> to vector<2x8xf32>
    %116 = arith.mulf %115, %95 : vector<2x8xf32>
    %117 = vector.broadcast %105 : f32 to vector<2x8xf32>
    %118 = arith.mulf %116, %117 : vector<2x8xf32>
    %c1 = arith.constant 1 : index
    %c0_53 = arith.constant 0 : index
    %c0_54 = arith.constant 0 : index
    %119 = vector.load %arg12[%c1, %c0_53, %c0_54] : memref<2x2x8xf32, #tpu.memory_space<vmem>>, vector<1x2x8xf32>
    %120 = vector.shape_cast %119 : vector<1x2x8xf32> to vector<2x8xf32>
    %121 = vector.shape_cast %118 : vector<2x8xf32> to vector<1x2x8xf32>
    tpu.vector_store %arg12[%c1, %c0_53, %c0_54], %121 {strides = array<i32>} : memref<2x2x8xf32, #tpu.memory_space<vmem>>, vector<1x2x8xf32>,
    %c0_55 = arith.constant 0 : index
    %c0_56 = arith.constant 0 : index
    %122 = vector.load %arg13[%c0_55, %c0_56] : memref<2x256xf32, #tpu.memory_space<vmem>>, vector<2x256xf32>
    tpu.vector_store %arg13[%c0_55, %c0_56], %79 {strides = array<i32>} : memref<2x256xf32, #tpu.memory_space<vmem>>, vector<2x256xf32>,
    %c0_57 = arith.constant 0 : index
    %c0_58 = arith.constant 0 : index
    %123 = vector.load %arg14[%c0_57, %c0_58] : memref<2x256xf32, #tpu.memory_space<vmem>>, vector<2x256xf32>
    tpu.vector_store %arg14[%c0_57, %c0_58], %77 {strides = array<i32>} : memref<2x256xf32, #tpu.memory_space<vmem>>, vector<2x256xf32>,
    return
  }
  func.func @transform_0(%arg0: i32) -> (i32, i32) {
    %c0_i32 = arith.constant 0 : i32
    %c0_i32_0 = arith.constant 0 : i32
    %c0_i32_1 = arith.constant 0 : i32
    return %c0_i32, %c0_i32_0 : i32, i32
  }
  func.func @transform_1(%arg0: i32) -> (i32, i32) {
    %c0_i32 = arith.constant 0 : i32
    %c0_i32_0 = arith.constant 0 : i32
    %c0_i32_1 = arith.constant 0 : i32
    return %c0_i32, %c0_i32_0 : i32, i32
  }
  func.func @transform_2(%arg0: i32) -> (i32, i32) {
    %c0_i32 = arith.constant 0 : i32
    %c0_i32_0 = arith.constant 0 : i32
    %c0_i32_1 = arith.constant 0 : i32
    return %c0_i32, %c0_i32_0 : i32, i32
  }
  func.func @transform_3(%arg0: i32) -> (i32, i32) {
    %c0_i32 = arith.constant 0 : i32
    %c0_i32_0 = arith.constant 0 : i32
    %c0_i32_1 = arith.constant 0 : i32
    return %c0_i32, %c0_i32_0 : i32, i32
  }
  func.func @transform_4(%arg0: i32) -> (i32, i32) {
    %c0_i32 = arith.constant 0 : i32
    %c0_i32_0 = arith.constant 0 : i32
    %c0_i32_1 = arith.constant 0 : i32
    return %c0_i32, %c0_i32_0 : i32, i32
  }
  func.func @transform_5(%arg0: i32) -> (i32, i32) {
    %c0_i32 = arith.constant 0 : i32
    %c0_i32_0 = arith.constant 0 : i32
    %c0_i32_1 = arith.constant 0 : i32
    return %c0_i32, %c0_i32_0 : i32, i32
  }
  func.func @transform_6(%arg0: i32) -> (i32, i32) {
    %c0_i32 = arith.constant 0 : i32
    %c0_i32_0 = arith.constant 0 : i32
    %c0_i32_1 = arith.constant 0 : i32
    return %c0_i32, %c0_i32_0 : i32, i32
  }
  func.func @transform_7(%arg0: i32) -> (i32, i32) {
    %c0_i32 = arith.constant 0 : i32
    %c0_i32_0 = arith.constant 0 : i32
    %c0_i32_1 = arith.constant 0 : i32
    return %c0_i32, %c0_i32_0 : i32, i32
  }
  func.func @transform_8(%arg0: i32) -> (i32, i32) {
    %c0_i32 = arith.constant 0 : i32
    %c0_i32_0 = arith.constant 0 : i32
    %c0_i32_1 = arith.constant 0 : i32
    return %c0_i32, %c0_i32_0 : i32, i32
  }
  func.func @transform_9(%arg0: i32) -> (i32, i32) {
    %c0_i32 = arith.constant 0 : i32
    %c0_i32_0 = arith.constant 0 : i32
    %c0_i32_1 = arith.constant 0 : i32
    return %c0_i32, %c0_i32_0 : i32, i32
  }
  func.func @transform_10(%arg0: i32) -> (i32, i32) {
    %c0_i32 = arith.constant 0 : i32
    %c0_i32_0 = arith.constant 0 : i32
    %c0_i32_1 = arith.constant 0 : i32
    return %c0_i32, %c0_i32_0 : i32, i32
  }
  func.func @transform_11(%arg0: i32) -> (i32, i32, i32) {
    %c0_i32 = arith.constant 0 : i32
    %c0_i32_0 = arith.constant 0 : i32
    %c0_i32_1 = arith.constant 0 : i32
    %c0_i32_2 = arith.constant 0 : i32
    return %c0_i32, %c0_i32_0, %c0_i32_1 : i32, i32, i32
  }
  func.func @transform_12(%arg0: i32) -> (i32, i32) {
    %c0_i32 = arith.constant 0 : i32
    %c0_i32_0 = arith.constant 0 : i32
    %c0_i32_1 = arith.constant 0 : i32
    return %c0_i32, %c0_i32_0 : i32, i32
  }
  func.func @transform_13(%arg0: i32) -> (i32, i32) {
    %c0_i32 = arith.constant 0 : i32
    %c0_i32_0 = arith.constant 0 : i32
    %c0_i32_1 = arith.constant 0 : i32
    return %c0_i32, %c0_i32_0 : i32, i32
  }
}

</mosaic_0001>

<bundles_post_ra>
// kernel: policy_forward.3
= control target key start
LH: loop header
LB: loop body
LE: loop exit
PB: predicated region body
PF: predicated region fallthrough
CT: control target
= control target key end

     0   :  { %9 = vsyncpa [#allocation3], 0  ;;  %s507_s15 = smov [#allocation2]   ;;  %s758_s0 = inlined_call_operand.vmem [shape: f32[25,648], index: 0, kind: input, shape index: {}]   ;;  %s759_s1 = inlined_call_operand.hbm [shape: f32[16,25], index: 1, kind: input, shape index: {}]   ;;  %s760_s2 = inlined_call_operand.vmem [shape: f32[16,1], index: 2, kind: input, shape index: {}]   ;;  %s761_s3 = inlined_call_operand.vmem [shape: f32[16,1], index: 3, kind: input, shape index: {}]   ;;  %s762_s4 = inlined_call_operand.vmem [shape: f32[16,648], index: 4, kind: output, shape index: {}]  }
   0x1   :  { %s17_s16 = sshll.u32 %s507_s15, 4  ;;  %s18_s16 = int_to_ptr.vmem [resolvable:$true] %s17_s16 }
   0x2   :  { %s493_s17 = scalar_lea.vmem %s18_s16, 256  ;;  %p498_p1 = scmp.lt.s32.totalorder %s18_s16, %s18_s16 }
   0x3   :  { %p494_p0 = scmp.ne.s32.totalorder %s18_s16, %s493_s17  ;;  %p499_p2 = scmp.lt.s32.totalorder %s493_s17, %s493_s17 }
   0x5   :  { %p500_p3 = por %p499_p2, %p498_p1 }
   0x7   :  { %p501_p4 = pnand %p500_p3, %p494_p0 }
   0x9   :  { %504 = shalt.err (!%p501_p4)
}
   0xa   :  { %s508_s18 = smov 128   ;;  %s509_s19 = smov 8  }
   0xb   :  { %23 = dma.hbm_to_vmem [thread:$0]  %s759_s1, 256, %s18_s16, [#allocation3], %s508_s18, %s508_s18, %s509_s19  }
   0xc   :  { %505 = dma.done.wait [#allocation3], 256  }
   0xd   :  { %506 = vsyncadd [#allocation3], 4294967040  ;;  %v510_v0 = vmov 0.0   ;;  %vm64_vm0 = vcmask 1040384   ;;  %v52_v1 = vld [vmem:[%s758_s0 + $0x98] sm:$0x1] }
   0xe   :  { %147 = vmatprep.mubr.f32.mxu0 %v510_v0  ;;  %224 = vmatprep.mubr.f32.mxu1 %v510_v0  ;;  %v51_v2 = vld [vmem:[%s758_s0 + $0x90] sm:$0x1]  ;;  %v46_v3 = vld [vmem:[%s758_s0 + $0x68] sm:$0xff]  ;;  %v45_v4 = vld [vmem:[%s758_s0 + $0x60] sm:$0xff]  ;;  %vm57_vm1 = vcmask 203776   ;;  %vm318_vm2 = vcmask 64512  }
   0xf   :  { %454 = vmatprep.subr.msk.mxu0 %vm64_vm0, %v52_v1  ;;  %v54_v5 = vld [vmem:[%s758_s0 + $0xa8] sm:$0x1]  ;;  %v40_v6 = vld [vmem:[%s758_s0 + $0x38] sm:$0xff]  ;;  %v53_v7 = vld [vmem:[%s758_s0 + $0xa0] sm:$0x1] }
  0x10   :  { %455 = vmatpush1.msk.msra.mxu0 %vm64_vm0, %v51_v2  ;;  %458 = vmatprep.subr.msk.mxu1 %vm64_vm0, %v54_v5  ;;  %v48_v8 = vld [vmem:[%s758_s0 + $0x78] sm:$0xff]  ;;  %v39_v9 = vld [vmem:[%s758_s0 + $0x30] sm:$0xff]  ;;  %v34_v11 = vld [vmem:[%s758_s0 + $0x8] sm:$0xff] }
  0x11   :  { %109 = vmatprep.subr.mxu0 %v46_v3  ;;  %459 = vmatpush1.msk.msra.mxu1 %vm64_vm0, %v53_v7  ;;  %v47_v10 = vld [vmem:[%s758_s0 + $0x70] sm:$0xff]  ;;  %v42_v12 = vld [vmem:[%s758_s0 + $0x48] sm:$0xff]  ;;  %v41_v13 = vld [vmem:[%s758_s0 + $0x40] sm:$0xff] }
  0x12   :  { %110 = vmatpush1.msra.mxu0 %v45_v4  ;;  %186 = vmatprep.subr.mxu1 %v48_v8  ;;  %v33_v14 = vld [vmem:[%s758_s0] sm:$0xff]  ;;  %v36_v15 = vld [vmem:[%s758_s0 + $0x18] sm:$0xff]  ;;  %v55_v18 = vld [vmem:[%s758_s0 + $0xb0] sm:$0x1] }
  0x13   :  { %111 = vmatprep.subr.mxu0 %v40_v6  ;;  %187 = vmatpush1.msra.mxu1 %v47_v10  ;;  %v31_v16 = vld [vmem:[#allocation2] sm:$0xff]  ;;  %v56_v17 = vld [vmem:[%s758_s0 + $0xb8] sm:$0x1]  ;;  %v35_v19 = vld [vmem:[%s758_s0 + $0x10] sm:$0xff] }
  0x14   :  { %112 = vmatpush1.msra.mxu0 %v39_v9  ;;  %188 = vmatprep.subr.mxu1 %v42_v12  ;;  %v50_v20 = vld [vmem:[%s758_s0 + $0x88] sm:$0xff]  ;;  %v49_v21 = vld [vmem:[%s758_s0 + $0x80] sm:$0xff]  ;;  %v44_v23 = vld [vmem:[%s758_s0 + $0x58] sm:$0xff] }
  0x15   :  { %113 = vmatprep.subr.mxu0 %v34_v11  ;;  %189 = vmatpush1.msra.mxu1 %v41_v13  ;;  %v32_v22 = vld [vmem:[#allocation2 + $0x8] sm:$0xff]  ;;  %v43_v24 = vld [vmem:[%s758_s0 + $0x50] sm:$0xff]  ;;  %v37_v26 = vld [vmem:[%s758_s0 + $0x20] sm:$0xff]  ;;  %v511_v11 = vmov 0  }
  0x16   :  { %114 = vmatpush1.msra.mxu0 %v33_v14  ;;  %190 = vmatprep.subr.mxu1 %v36_v15  ;;  %v38_v25 = vld [vmem:[%s758_s0 + $0x28] sm:$0xff] }
  0x17   :  { %456 = vmatmul.mubr.msk.f32.vlgmr.msra.gmra.mxu0 %vm57_vm1, %v31_v16  ;;  %462 = vmatprep.subr.msk.mxu0 %vm64_vm0, %v56_v17 }
  0x18   :  { %463 = vmatpush1.msk.msra.mxu0 %vm64_vm0, %v55_v18  ;;  %191 = vmatpush1.msra.mxu1 %v35_v19 }
  0x19   :  { %263 = vmatprep.subr.mxu0 %v50_v20  ;;  %153 = vmatprep.mubr.f32.mxu0 %v510_v0 }
  0x1a   :  { %460 = vmatmul.mubr.msk.f32.vlgmr.msra.gmra.mxu1 %vm57_vm1, %v31_v16  ;;  %466 = vmatprep.subr.msk.mxu1 %vm64_vm0, %v56_v17 }
  0x1b   :  { %264 = vmatpush1.msra.mxu0 %v49_v21  ;;  %470 = vmatpush1.msk.msra.mxu1 %vm64_vm0, %v55_v18 }
  0x1c   :  { %457 = vmatmul.mubr.msk.f32.gmra.mxu0 %vm57_vm1, %v32_v22  ;;  %265 = vmatprep.subr.mxu0 %v44_v23 }
  0x1d   :  { %467 = vmatprep.subr.mxu1 %v50_v20  ;;  %266 = vmatpush1.msra.mxu0 %v43_v24 }
  0x1e   :  { %230 = vmatprep.mubr.f32.mxu1 %v510_v0  ;;  %471 = vmatpush1.msra.mxu1 %v49_v21 }
  0x1f   :  { %267 = vmatprep.subr.mxu0 %v38_v25  ;;  %461 = vmatmul.mubr.msk.f32.gmra.mxu1 %vm57_vm1, %v32_v22 }
  0x20   :  { %468 = vmatprep.subr.mxu1 %v44_v23  ;;  %268 = vmatpush1.msra.mxu0 %v37_v26 }
  0x21   :  { %301 = vmatprep.mubr.f32.mxu0 %v510_v0  ;;  %472 = vmatpush1.msra.mxu1 %v43_v24 }
  0x22   :  { %464 = vmatmul.mubr.msk.f32.vlgmr.msra.gmra.mxu0 %vm57_vm1, %v31_v16  ;;  %469 = vmatprep.subr.mxu1 %v38_v25 }
  0x23   :  { %473 = vmatpush1.msra.mxu1 %v37_v26  ;;  %307 = vmatprep.mubr.f32.mxu1 %v510_v0  ;;  %v367_v26 = vld [vmem:[%s760_s2] sm:$0xff] }
  0x24   :  { %465 = vmatmul.mubr.msk.f32.vlgmr.msra.gmra.mxu1 %vm57_vm1, %v32_v22  ;;  %479 = vset.pattern.permute.xlu0 %v511_v11 }
  0x25   :  { %480 = vset.pattern.permute.xlu1 %v511_v11 }
  0xd7   :  { %v632_v27 = vpop.f32.mrf.mxu0 }
  0xd8   :  { %v333_v29 = vmul.f32 %v632_v27, %v632_v27 }
  0xd9   :  { %v634_v28 = vpop.f32.mrf.mxu0 }
  0xda   :  { %v314_v30 = vadd.f32 %v634_v28, %v632_v27  ;;  %v334_v31 = vmul.f32 %v634_v28, %v634_v28  ;;  %v642_v32 = vpop.f32.mrf.mxu1 }
  0xdb   :  { %v335_v33 = vmul.f32 %v642_v32, %v642_v32 }
  0xdc   :  { %v345_v34 = vadd.f32 %v334_v31, %v333_v29  ;;  %v315_v35 = vadd.f32 %v314_v30, %v642_v32  ;;  %v647_v36 = vpop.f32.mrf.mxu0  ;;  %v649_v37 = vpop.f32.mrf.mxu1  ;;  %v368_v31 = vld [vmem:[%s760_s2 + $0x8] sm:$0xff] }
  0xdd   :  { %v339_v39 = vmul.f32 %v647_v36, %v647_v36  ;;  %v336_v42 = vmul.f32 %v649_v37, %v649_v37 }
  0xde   :  { %v346_v38 = vadd.f32 %v345_v34, %v335_v33  ;;  %v653_v40 = vpop.f32.mrf.mxu0  ;;  %v316_v41 = vadd.f32 %v315_v35, %v649_v37 }
  0xdf   :  { %v323_v43 = vadd.f32 %v653_v40, %v647_v36  ;;  %v340_v44 = vmul.f32 %v653_v40, %v653_v40  ;;  %v662_v45 = vpop.f32.mrf.mxu1 }
  0xe0   :  { %v341_v46 = vmul.f32 %v662_v45, %v662_v45  ;;  %v347_v50 = vadd.f32 %v346_v38, %v336_v42  ;;  %v375_v38 = vld [vmem:[%s761_s3] sm:$0xff]  ;;  %v376_v42 = vld [vmem:[%s761_s3 + $0x8] sm:$0xff] }
  0xe1   :  { %v353_v47 = vadd.f32 %v340_v44, %v339_v39  ;;  %v324_v48 = vadd.f32 %v323_v43, %v662_v45  ;;  %v667_v49 = vpop.f32.mrf.mxu1 }
  0xe2   :  { %v669_v51 = vpop.f32.mrf.mxu0  ;;  %v342_v56 = vmul.f32 %v667_v49, %v667_v49 }
  0xe3   :  { %v354_v52 = vadd.f32 %v353_v47, %v341_v46  ;;  %v337_v53 = vmul.f32 %v669_v51, %v669_v51  ;;  %v325_v54 = vadd.f32 %v324_v48, %v667_v49  ;;  %v317_v55 = vadd.f32 %v316_v41, %v669_v51 }
  0xe4   :  { %v677_v57 = vpop.f32.mrf.mxu0  ;;  %v679_v58 = vpop.f32.mrf.mxu1 }
  0xe5   :  { %v338_v59 = vmul.f32 %v677_v57, %v677_v57  ;;  %v343_v60 = vmul.f32 %v679_v58, %v679_v58  ;;  %v319_v61 = vsel %vm318_vm2, %v677_v57, 0.0  ;;  %v348_v62 = vadd.f32 %v347_v50, %v337_v53 }
  0xe6   :  { %v687_v63 = vpop.f32.mrf.mxu1  ;;  %v320_v0 = vadd.f32 %v319_v61, %v317_v55  ;;  %v326_v1 = vadd.f32 %v325_v54, %v679_v58  ;;  %v355_v2 = vadd.f32 %v354_v52, %v342_v56 }
  0xe7   :  { %v327_v3 = vsel %vm318_vm2, %v687_v63, 0.0  ;;  %v344_v4 = vmul.f32 %v687_v63, %v687_v63  ;;  %v349_v5 = vsel %vm318_vm2, %v338_v59, 0.0 }
  0xe8   :  { %321 = vadd.xlane.f32.xlu0 %v320_v0  ;;  %v350_v6 = vadd.f32 %v349_v5, %v348_v62  ;;  %v328_v7 = vadd.f32 %v327_v3, %v326_v1  ;;  %v356_v8 = vadd.f32 %v355_v2, %v343_v60 }
  0xe9   :  { %v357_v9 = vsel %vm318_vm2, %v344_v4, 0.0 }
  0xea   :  { %351 = vadd.xlane.f32.xlu1 %v350_v6  ;;  %v358_v10 = vadd.f32 %v357_v9, %v356_v8 }
  0xec   :  { %329 = vadd.xlane.f32.xlu0 %v328_v7 }
  0xee   :  { %359 = vadd.xlane.f32.xlu1 %v358_v10 }
 0x171   :  { %v322_v12 = vpop.xlane.xlu0 %321 }
 0x172   :  { %v331_v13 = vmul.f32 0.0015432099, %v322_v12 }
 0x173   :  { %v352_v14 = vpop.xlane.xlu1 %351 }
 0x174   :  { %v363_v15 = vmul.f32 %v331_v13, %v331_v13  ;;  %v361_v16 = vmul.f32 0.0015432099, %v352_v14 }
 0x175   :  { %v330_v17 = vpop.xlane.xlu0 %329 }
 0x176   :  { %v365_v18 = vsub.f32 %v361_v16, %v363_v15  ;;  %v332_v19 = vmul.f32 0.0015432099, %v330_v17 }
 0x177   :  { %v360_v20 = vpop.xlane.xlu1 %359 }
 0x178   :  { %v369_v21 = vadd.f32 1e-05, %v365_v18  ;;  %v364_v22 = vmul.f32 %v332_v19, %v332_v19  ;;  %v362_v23 = vmul.f32 0.0015432099, %v360_v20 }
 0x17a   :  { %481 = vrsqrt.f32 %v369_v21  ;;  %v366_v24 = vsub.f32 %v362_v23, %v364_v22 }
 0x17c   :  { %v370_v25 = vadd.f32 1e-05, %v366_v24 }
 0x17e   :  { %483 = vrsqrt.f32 %v370_v25 }
 0x187   :  { %v482_v29 = vpop.eup %481 }
 0x188   :  { %v373_v30 = vmul.f32 %v482_v29, %v367_v26 }
 0x18a   :  { %383 = vperm.xlu0 %479, %v373_v30   ;;  %v377_v35 = vmul.f32 %v373_v30, %v331_v13 }
 0x18b   :  { %v484_v33 = vpop.eup %483 }
 0x18c   :  { %v374_v34 = vmul.f32 %v484_v33, %v368_v31  ;;  %v379_v39 = vsub.f32 %v375_v38, %v377_v35 }
 0x18e   :  { %388 = vperm.xlu1 %480, %v374_v34   ;;  %v378_v41 = vmul.f32 %v374_v34, %v332_v19 }
 0x190   :  { %v380_v43 = vsub.f32 %v376_v42, %v378_v41 }
 0x192   :  { %405 = vperm.xlu1 %480, %v379_v39  }
 0x196   :  { %410 = vperm.xlu1 %480, %v380_v43  }
 0x205   :  { %v384_v44 = vpop.permute.xlu0 %383 }
 0x206   :  { %v391_v47 = vmul.f32 %v384_v44, %v632_v27  ;;  %v392_v48 = vmul.f32 %v384_v44, %v634_v28  ;;  %v393_v50 = vmul.f32 %v384_v44, %v642_v32  ;;  %v394_v52 = vmul.f32 %v384_v44, %v649_v37 }
 0x207   :  { %v395_v53 = vmul.f32 %v384_v44, %v669_v51  ;;  %v396_v54 = vmul.f32 %v384_v44, %v677_v57 }
 0x209   :  { %v389_v46 = vpop.permute.xlu1 %388 }
 0x20a   :  { %v397_v56 = vmul.f32 %v389_v46, %v647_v36  ;;  %v398_v59 = vmul.f32 %v389_v46, %v653_v40  ;;  %v399_v28 = vmul.f32 %v389_v46, %v662_v45  ;;  %v400_v32 = vmul.f32 %v389_v46, %v667_v49 }
 0x20b   :  { %v401_v36 = vmul.f32 %v389_v46, %v679_v58  ;;  %v402_v40 = vmul.f32 %v389_v46, %v687_v63 }
 0x20d   :  { %v406_v55 = vpop.permute.xlu1 %405 }
 0x20e   :  { %v413_v60 = vadd.f32 %v406_v55, %v391_v47  ;;  %v414_v61 = vadd.f32 %v406_v55, %v392_v48  ;;  %v415_v62 = vadd.f32 %v406_v55, %v393_v50  ;;  %v416_v0 = vadd.f32 %v406_v55, %v394_v52 }
 0x20f   :  { %v417_v27 = vadd.f32 %v406_v55, %v395_v53  ;;  %v418_v1 = vadd.f32 %v406_v55, %v396_v54 }
 0x210   :  { %v425_v37 = vmax.f32 %v413_v60, 0.0  ;;  %v426_v2 = vmax.f32 %v414_v61, 0.0  ;;  %v427_v51 = vmax.f32 %v415_v62, 0.0  ;;  %v428_v3 = vmax.f32 %v416_v0, 0.0 }
 0x211   :  { %v429_v57 = vmax.f32 %v417_v27, 0.0  ;;  %v430_v4 = vmax.f32 %v418_v1, 0.0  ;;  %v411_v5 = vpop.permute.xlu1 %410 }
 0x212   :  { %437 = vst [vmem:[%s762_s4] sm:$0xff] %v425_v37  ;;  %438 = vst [vmem:[%s762_s4 + $0x8] sm:$0xff] %v426_v2  ;;  %v419_v45 = vadd.f32 %v411_v5, %v397_v56  ;;  %v420_v49 = vadd.f32 %v411_v5, %v398_v59  ;;  %v421_v58 = vadd.f32 %v411_v5, %v399_v28 }
 0x213   :  { %439 = vst [vmem:[%s762_s4 + $0x10] sm:$0xff] %v427_v51  ;;  %440 = vst [vmem:[%s762_s4 + $0x18] sm:$0xff] %v428_v3  ;;  %v422_v63 = vadd.f32 %v411_v5, %v400_v32  ;;  %v423_v6 = vadd.f32 %v411_v5, %v401_v36  ;;  %v424_v7 = vadd.f32 %v411_v5, %v402_v40 }
 0x214   :  { %441 = vst [vmem:[%s762_s4 + $0x20] sm:$0xff] %v429_v57  ;;  %442 = vst.msk [vmem:[%s762_s4 + $0x28] sm:$0xff] %vm318_vm2, %v430_v4  ;;  %v431_v8 = vmax.f32 %v419_v45, 0.0  ;;  %v432_v9 = vmax.f32 %v420_v49, 0.0  ;;  %v433_v10 = vmax.f32 %v421_v58, 0.0 }
 0x215   :  { %v434_v11 = vmax.f32 %v422_v63, 0.0  ;;  %v435_v12 = vmax.f32 %v423_v6, 0.0  ;;  %v436_v13 = vmax.f32 %v424_v7, 0.0 }
 0x216   :  { %443 = vst [vmem:[%s762_s4 + $0x30] sm:$0xff] %v431_v8  ;;  %444 = vst [vmem:[%s762_s4 + $0x38] sm:$0xff] %v432_v9 }
 0x217   :  { %445 = vst [vmem:[%s762_s4 + $0x40] sm:$0xff] %v433_v10  ;;  %446 = vst [vmem:[%s762_s4 + $0x48] sm:$0xff] %v434_v11 }
 0x218   :  { %447 = vst [vmem:[%s762_s4 + $0x50] sm:$0xff] %v435_v12  ;;  %448 = vst.msk [vmem:[%s762_s4 + $0x58] sm:$0xff] %vm318_vm2, %v436_v13 }
 0x219   :  { %453 = vsyncpa [#allocation3], 1 }

// kernel: policy_forward.4
= control target key start
LH: loop header
LB: loop body
LE: loop exit
PB: predicated region body
PF: predicated region fallthrough
CT: control target
= control target key end

     0   :  { %v459_v0 = vmov 0.0   ;;  %vm83_vm0 = vcmask 130048   ;;  %vm266_vm1 = vcmask 801792   ;;  %s778_s0 = inlined_call_operand.vmem [shape: f32[400,98], index: 0, kind: input, shape index: {}]   ;;  %s779_s1 = inlined_call_operand.vmem [shape: f32[32,400], index: 1, kind: input, shape index: {}]   ;;  %s780_s2 = inlined_call_operand.vmem [shape: f32[32,1], index: 2, kind: input, shape index: {}]   ;;  %s781_s3 = inlined_call_operand.vmem [shape: f32[32,1], index: 3, kind: input, shape index: {}]   ;;  %s782_s4 = inlined_call_operand.vmem [shape: f32[32,98], index: 4, kind: output, shape index: {}]  }
   0x1   :  { %181 = vmatprep.subr.mxu1 %v459_v0  ;;  %v64_v1 = vld [vmem:[%s778_s0 + $0xf8] sm:$0xff]  ;;  %v63_v4 = vld [vmem:[%s778_s0 + $0xf0] sm:$0xff]  ;;  %v62_v7 = vld [vmem:[%s778_s0 + $0xe8] sm:$0xff] }
   0x2   :  { %v80_v2 = vld [vmem:[%s778_s0 + $0x178] sm:$0xff]  ;;  %403 = vmatprep.subr.mxu0 %v64_v1  ;;  %v79_v5 = vld [vmem:[%s778_s0 + $0x170] sm:$0xff]  ;;  %v78_v8 = vld [vmem:[%s778_s0 + $0x168] sm:$0xff] }
   0x3   :  { %v48_v3 = vld [vmem:[%s778_s0 + $0x78] sm:$0xff]  ;;  %182 = vmatpush1.msra.mxu1 %v80_v2  ;;  %v47_v6 = vld [vmem:[%s778_s0 + $0x70] sm:$0xff]  ;;  %v46_v9 = vld [vmem:[%s778_s0 + $0x68] sm:$0xff] }
   0x4   :  { %404 = vmatpush3.msra.mxu0 %v48_v3  ;;  %183 = vmatprep.subr.mxu1 %v459_v0  ;;  %v61_v10 = vld [vmem:[%s778_s0 + $0xe0] sm:$0xff]  ;;  %v60_v13 = vld [vmem:[%s778_s0 + $0xd8] sm:$0xff]  ;;  %v59_v16 = vld [vmem:[%s778_s0 + $0xd0] sm:$0xff] }
   0x5   :  { %405 = vmatprep.subr.mxu0 %v63_v4  ;;  %184 = vmatpush1.msra.mxu1 %v79_v5  ;;  %v77_v11 = vld [vmem:[%s778_s0 + $0x160] sm:$0xff]  ;;  %v76_v14 = vld [vmem:[%s778_s0 + $0x158] sm:$0xff]  ;;  %v75_v17 = vld [vmem:[%s778_s0 + $0x150] sm:$0xff] }
   0x6   :  { %406 = vmatpush3.msra.mxu0 %v47_v6  ;;  %185 = vmatprep.subr.mxu1 %v459_v0  ;;  %v45_v12 = vld [vmem:[%s778_s0 + $0x60] sm:$0xff]  ;;  %v44_v15 = vld [vmem:[%s778_s0 + $0x58] sm:$0xff]  ;;  %v43_v18 = vld [vmem:[%s778_s0 + $0x50] sm:$0xff] }
   0x7   :  { %407 = vmatprep.subr.mxu0 %v62_v7  ;;  %186 = vmatpush1.msra.mxu1 %v78_v8  ;;  %v58_v19 = vld [vmem:[%s778_s0 + $0xc8] sm:$0xff]  ;;  %v57_v22 = vld [vmem:[%s778_s0 + $0xc0] sm:$0xff]  ;;  %v56_v25 = vld [vmem:[%s778_s0 + $0xb8] sm:$0xff] }
   0x8   :  { %408 = vmatpush3.msra.mxu0 %v46_v9  ;;  %187 = vmatprep.subr.mxu1 %v459_v0  ;;  %v74_v20 = vld [vmem:[%s778_s0 + $0x148] sm:$0xff]  ;;  %v73_v23 = vld [vmem:[%s778_s0 + $0x140] sm:$0xff]  ;;  %v72_v26 = vld [vmem:[%s778_s0 + $0x138] sm:$0xff] }
   0x9   :  { %409 = vmatprep.subr.mxu0 %v61_v10  ;;  %188 = vmatpush1.msra.mxu1 %v77_v11  ;;  %v42_v21 = vld [vmem:[%s778_s0 + $0x48] sm:$0xff]  ;;  %v41_v24 = vld [vmem:[%s778_s0 + $0x40] sm:$0xff]  ;;  %v40_v27 = vld [vmem:[%s778_s0 + $0x38] sm:$0xff] }
   0xa   :  { %410 = vmatpush3.msra.mxu0 %v45_v12  ;;  %189 = vmatprep.subr.mxu1 %v459_v0  ;;  %v55_v28 = vld [vmem:[%s778_s0 + $0xb0] sm:$0xff]  ;;  %v54_v31 = vld [vmem:[%s778_s0 + $0xa8] sm:$0xff]  ;;  %v53_v34 = vld [vmem:[%s778_s0 + $0xa0] sm:$0xff] }
   0xb   :  { %411 = vmatprep.subr.mxu0 %v60_v13  ;;  %190 = vmatpush1.msra.mxu1 %v76_v14  ;;  %v71_v29 = vld [vmem:[%s778_s0 + $0x130] sm:$0xff]  ;;  %v70_v32 = vld [vmem:[%s778_s0 + $0x128] sm:$0xff]  ;;  %v69_v35 = vld [vmem:[%s778_s0 + $0x120] sm:$0xff] }
   0xc   :  { %412 = vmatpush3.msra.mxu0 %v44_v15  ;;  %191 = vmatprep.subr.mxu1 %v459_v0  ;;  %v39_v30 = vld [vmem:[%s778_s0 + $0x30] sm:$0xff]  ;;  %v38_v33 = vld [vmem:[%s778_s0 + $0x28] sm:$0xff]  ;;  %v37_v36 = vld [vmem:[%s778_s0 + $0x20] sm:$0xff] }
   0xd   :  { %413 = vmatprep.subr.mxu0 %v59_v16  ;;  %192 = vmatpush1.msra.mxu1 %v75_v17  ;;  %v52_v37 = vld [vmem:[%s778_s0 + $0x98] sm:$0xff]  ;;  %v51_v40 = vld [vmem:[%s778_s0 + $0x90] sm:$0xff]  ;;  %v50_v43 = vld [vmem:[%s778_s0 + $0x88] sm:$0xff] }
   0xe   :  { %414 = vmatpush3.msra.mxu0 %v43_v18  ;;  %193 = vmatprep.subr.mxu1 %v459_v0  ;;  %v68_v38 = vld [vmem:[%s778_s0 + $0x118] sm:$0xff]  ;;  %v67_v41 = vld [vmem:[%s778_s0 + $0x110] sm:$0xff]  ;;  %v66_v44 = vld [vmem:[%s778_s0 + $0x108] sm:$0xff] }
   0xf   :  { %415 = vmatprep.subr.mxu0 %v58_v19  ;;  %194 = vmatpush1.msra.mxu1 %v74_v20  ;;  %v36_v39 = vld [vmem:[%s778_s0 + $0x18] sm:$0xff]  ;;  %v35_v42 = vld [vmem:[%s778_s0 + $0x10] sm:$0xff]  ;;  %v34_v45 = vld [vmem:[%s778_s0 + $0x8] sm:$0xff] }
  0x10   :  { %416 = vmatpush3.msra.mxu0 %v42_v21  ;;  %195 = vmatprep.subr.mxu1 %v459_v0  ;;  %v49_v46 = vld [vmem:[%s778_s0 + $0x80] sm:$0xff]  ;;  %v18_v49 = vld [vmem:[%s779_s1 + $0x8] sm:$0xff]  ;;  %v20_v52 = vld [vmem:[%s779_s1 + $0x18] sm:$0xff] }
  0x11   :  { %417 = vmatprep.subr.mxu0 %v57_v22  ;;  %196 = vmatpush1.msra.mxu1 %v73_v23  ;;  %v65_v47 = vld [vmem:[%s778_s0 + $0x100] sm:$0xff]  ;;  %v82_v51 = vld [vmem:[%s778_s0 + $0x188] sm:$0xff]  ;;  %v19_v55 = vld [vmem:[%s779_s1 + $0x10] sm:$0xff] }
  0x12   :  { %418 = vmatpush3.msra.mxu0 %v41_v24  ;;  %197 = vmatprep.subr.mxu1 %v459_v0  ;;  %v33_v48 = vld [vmem:[%s778_s0] sm:$0xff]  ;;  %v22_v53 = vld [vmem:[%s779_s1 + $0x28] sm:$0xff]  ;;  %v24_v57 = vld [vmem:[%s779_s1 + $0x38] sm:$0xff] }
  0x13   :  { %419 = vmatprep.subr.mxu0 %v56_v25  ;;  %198 = vmatpush1.msra.mxu1 %v72_v26  ;;  %v17_v50 = vld [vmem:[%s779_s1] sm:$0xff]  ;;  %v26_v58 = vld [vmem:[%s779_s1 + $0x48] sm:$0xff]  ;;  %v23_v59 = vld [vmem:[%s779_s1 + $0x30] sm:$0xff] }
  0x14   :  { %420 = vmatpush3.msra.mxu0 %v40_v27  ;;  %199 = vmatprep.subr.mxu1 %v459_v0  ;;  %v81_v54 = vld [vmem:[%s778_s0 + $0x180] sm:$0xff]  ;;  %v30_v61 = vld [vmem:[%s779_s1 + $0x68] sm:$0xff]  ;;  %v28_v62 = vld [vmem:[%s779_s1 + $0x58] sm:$0xff] }
  0x15   :  { %421 = vmatprep.subr.mxu0 %v55_v28  ;;  %200 = vmatpush1.msra.mxu1 %v71_v29  ;;  %v21_v56 = vld [vmem:[%s779_s1 + $0x20] sm:$0xff]  ;;  %v32_v1 = vld [vmem:[%s779_s1 + $0x78] sm:$0xff]  ;;  %v31_v2 = vld [vmem:[%s779_s1 + $0x70] sm:$0xff] }
  0x16   :  { %422 = vmatpush3.msra.mxu0 %v39_v30  ;;  %201 = vmatprep.subr.mxu1 %v459_v0  ;;  %v25_v60 = vld [vmem:[%s779_s1 + $0x40] sm:$0xff] }
  0x17   :  { %423 = vmatprep.subr.mxu0 %v54_v31  ;;  %202 = vmatpush1.msra.mxu1 %v70_v32  ;;  %v29_v63 = vld [vmem:[%s779_s1 + $0x60] sm:$0xff] }
  0x18   :  { %424 = vmatpush3.msra.mxu0 %v38_v33  ;;  %203 = vmatprep.subr.mxu1 %v459_v0 }
  0x19   :  { %425 = vmatprep.subr.mxu0 %v53_v34  ;;  %204 = vmatpush1.msra.mxu1 %v69_v35 }
  0x1a   :  { %426 = vmatpush3.msra.mxu0 %v37_v36  ;;  %205 = vmatprep.subr.mxu1 %v459_v0 }
  0x1b   :  { %427 = vmatprep.subr.mxu0 %v52_v37  ;;  %206 = vmatpush1.msra.mxu1 %v68_v38 }
  0x1c   :  { %428 = vmatpush3.msra.mxu0 %v36_v39  ;;  %207 = vmatprep.subr.mxu1 %v459_v0  ;;  %v460_v39 = vmov 0  }
  0x1d   :  { %429 = vmatprep.subr.mxu0 %v51_v40  ;;  %208 = vmatpush1.msra.mxu1 %v67_v41 }
  0x1e   :  { %430 = vmatpush3.msra.mxu0 %v35_v42  ;;  %209 = vmatprep.subr.mxu1 %v459_v0 }
  0x1f   :  { %431 = vmatprep.subr.mxu0 %v50_v43  ;;  %210 = vmatpush1.msra.mxu1 %v66_v44 }
  0x20   :  { %432 = vmatpush3.msra.mxu0 %v34_v45  ;;  %211 = vmatprep.subr.mxu1 %v459_v0 }
  0x21   :  { %433 = vmatprep.subr.mxu0 %v49_v46  ;;  %212 = vmatpush1.msra.mxu1 %v65_v47 }
  0x22   :  { %434 = vmatpush3.msra.mxu0 %v33_v48  ;;  %160 = vmatprep.mubr.f32.mxu0 %v18_v49 }
  0x23   :  { %241 = vmatprep.subr.mxu1 %v459_v0  ;;  %161 = vmatmul.mubr.f32.vlgmr.msra.gmra.mxu0 %v17_v50 }
  0x24   :  { %242 = vmatpush2.msra.mxu1 %v82_v51  ;;  %399 = vmatprep.mubr.msk.f32.mxu1 %vm83_vm0, %v20_v52 }
  0x25   :  { %243 = vmatprep.subr.mxu1 %v459_v0  ;;  %165 = vmatprep.mubr.f32.mxu0 %v22_v53  ;;  %v27_v0 = vld [vmem:[%s779_s1 + $0x50] sm:$0xff] }
  0x26   :  { %244 = vmatpush2.msra.mxu1 %v81_v54  ;;  %449 = vset.pattern.permute.xlu0 %v460_v39 }
  0x27   :  { %246 = vmatmul.mubr.f32.vlgmr.msra.gmra.mxu1 %v19_v55  ;;  %166 = vmatmul.mubr.f32.gmra.mxu0 %v21_v56 }
  0x28   :  { %400 = vmatprep.mubr.msk.f32.mxu1 %vm83_vm0, %v24_v57  ;;  %170 = vmatprep.mubr.f32.mxu0 %v26_v58 }
  0x29   :  { %450 = vset.pattern.permute.xlu1 %v460_v39 }
  0x2b   :  { %251 = vmatmul.mubr.f32.gmra.mxu1 %v23_v59  ;;  %171 = vmatmul.mubr.f32.gmra.mxu0 %v25_v60 }
  0x2c   :  { %175 = vmatprep.mubr.f32.mxu0 %v30_v61  ;;  %401 = vmatprep.mubr.msk.f32.mxu1 %vm83_vm0, %v28_v62 }
  0x2f   :  { %176 = vmatmul.mubr.f32.gmra.mxu0 %v29_v63  ;;  %256 = vmatmul.mubr.f32.gmra.mxu1 %v27_v0 }
  0x30   :  { %402 = vmatprep.mubr.msk.f32.mxu1 %vm83_vm0, %v32_v1 }
  0x33   :  { %261 = vmatmul.mubr.f32.gmra.mxu1 %v31_v2  ;;  %v311_v2 = vld [vmem:[%s780_s2] sm:$0xff] }
  0xe3   :  { %v435_v3 = vpop.f32.mrf.mxu0 }
  0xe5   :  { %v436_v4 = vpop.f32.mrf.mxu0 }
  0xe6   :  { %v437_v5 = vadd.f32 %v436_v4, %v435_v3 }
  0xe7   :  { %v247_v6 = vpop.f32.mrf.mxu1  ;;  %v438_v7 = vpop.f32.mrf.mxu0 }
  0xe8   :  { %v706_v8 = vadd.f32 %v437_v5, %v247_v6 }
  0xe9   :  { %v249_v9 = vpop.f32.mrf.mxu1  ;;  %v439_v10 = vpop.f32.mrf.mxu0 }
  0xea   :  { %v440_v11 = vadd.f32 %v439_v10, %v438_v7  ;;  %v267_v12 = vsel %vm266_vm1, %v706_v8, 0.0  ;;  %v283_v13 = vmul.f32 %v706_v8, %v706_v8  ;;  %v312_v7 = vld [vmem:[%s780_s2 + $0x8] sm:$0xff] }
  0xeb   :  { %v252_v14 = vpop.f32.mrf.mxu1  ;;  %268 = vadd.xlane.f32.xlu0 %v267_v12  ;;  %v441_v15 = vpop.f32.mrf.mxu0  ;;  %v327_v12 = vld [vmem:[%s781_s3] sm:$0xff] }
  0xec   :  { %v712_v16 = vadd.f32 %v440_v11, %v252_v14  ;;  %v287_v20 = vsel %vm266_vm1, %v283_v13, 0.0 }
  0xed   :  { %v442_v17 = vpop.f32.mrf.mxu0  ;;  %v254_v18 = vpop.f32.mrf.mxu1 }
  0xee   :  { %v443_v19 = vadd.f32 %v442_v17, %v441_v15  ;;  %v284_v21 = vmul.f32 %v712_v16, %v712_v16  ;;  %v270_v29 = vsel %vm266_vm1, %v712_v16, 0.0  ;;  %v313_v15 = vld [vmem:[%s780_s2 + $0x10] sm:$0xff] }
  0xef   :  { %288 = vadd.xlane.f32.xlu0 %v287_v20  ;;  %v444_v22 = vpop.f32.mrf.mxu0  ;;  %v257_v23 = vpop.f32.mrf.mxu1 }
  0xf0   :  { %v717_v24 = vadd.f32 %v443_v19, %v257_v23  ;;  %v290_v25 = vsel %vm266_vm1, %v284_v21, 0.0  ;;  %v328_v19 = vld [vmem:[%s781_s3 + $0x8] sm:$0xff] }
  0xf1   :  { %291 = vadd.xlane.f32.xlu1 %v290_v25  ;;  %v445_v26 = vpop.f32.mrf.mxu0  ;;  %v259_v27 = vpop.f32.mrf.mxu1 }
  0xf2   :  { %v446_v28 = vadd.f32 %v445_v26, %v444_v22  ;;  %v273_v30 = vsel %vm266_vm1, %v717_v24, 0.0  ;;  %v285_v31 = vmul.f32 %v717_v24, %v717_v24  ;;  %v314_v22 = vld [vmem:[%s780_s2 + $0x18] sm:$0xff]  ;;  %v329_v26 = vld [vmem:[%s781_s3 + $0x10] sm:$0xff] }
  0xf3   :  { %271 = vadd.xlane.f32.xlu0 %v270_v29  ;;  %v262_v32 = vpop.f32.mrf.mxu1  ;;  %v330_v29 = vld [vmem:[%s781_s3 + $0x18] sm:$0xff] }
  0xf4   :  { %v726_v33 = vadd.f32 %v446_v28, %v262_v32  ;;  %v293_v34 = vsel %vm266_vm1, %v285_v31, 0.0 }
  0xf5   :  { %274 = vadd.xlane.f32.xlu1 %v273_v30  ;;  %v264_v35 = vpop.f32.mrf.mxu1 }
  0xf6   :  { %v276_v36 = vsel %vm266_vm1, %v726_v33, 0.0  ;;  %v286_v37 = vmul.f32 %v726_v33, %v726_v33 }
  0xf7   :  { %294 = vadd.xlane.f32.xlu0 %v293_v34 }
  0xf8   :  { %v296_v38 = vsel %vm266_vm1, %v286_v37, 0.0 }
  0xf9   :  { %277 = vadd.xlane.f32.xlu1 %v276_v36 }
  0xfd   :  { %297 = vadd.xlane.f32.xlu1 %v296_v38 }
 0x174   :  { %v269_v40 = vpop.xlane.xlu0 %268 }
 0x175   :  { %v279_v41 = vmul.f32 0.010204081, %v269_v40 }
 0x177   :  { %v303_v43 = vmul.f32 %v279_v41, %v279_v41 }
 0x178   :  { %v289_v42 = vpop.xlane.xlu0 %288 }
 0x179   :  { %v299_v44 = vmul.f32 0.010204081, %v289_v42 }
 0x17a   :  { %v292_v45 = vpop.xlane.xlu1 %291 }
 0x17b   :  { %v307_v46 = vsub.f32 %v299_v44, %v303_v43  ;;  %v300_v51 = vmul.f32 0.010204081, %v292_v45 }
 0x17c   :  { %v272_v47 = vpop.xlane.xlu0 %271 }
 0x17d   :  { %v315_v48 = vadd.f32 1e-05, %v307_v46  ;;  %v280_v49 = vmul.f32 0.010204081, %v272_v47 }
 0x17e   :  { %v275_v50 = vpop.xlane.xlu1 %274 }
 0x17f   :  { %451 = vrsqrt.f32 %v315_v48  ;;  %v304_v52 = vmul.f32 %v280_v49, %v280_v49  ;;  %v281_v53 = vmul.f32 0.010204081, %v275_v50 }
 0x180   :  { %v295_v54 = vpop.xlane.xlu0 %294 }
 0x181   :  { %v308_v55 = vsub.f32 %v300_v51, %v304_v52  ;;  %v305_v56 = vmul.f32 %v281_v53, %v281_v53  ;;  %v301_v57 = vmul.f32 0.010204081, %v295_v54 }
 0x182   :  { %v278_v58 = vpop.xlane.xlu1 %277 }
 0x183   :  { %v316_v59 = vadd.f32 1e-05, %v308_v55  ;;  %v309_v60 = vsub.f32 %v301_v57, %v305_v56  ;;  %v282_v61 = vmul.f32 0.010204081, %v278_v58 }
 0x185   :  { %453 = vrsqrt.f32 %v316_v59  ;;  %v317_v63 = vadd.f32 1e-05, %v309_v60  ;;  %v306_v0 = vmul.f32 %v282_v61, %v282_v61 }
 0x186   :  { %v298_v62 = vpop.xlane.xlu1 %297 }
 0x187   :  { %v302_v1 = vmul.f32 0.010204081, %v298_v62  ;;  %455 = vrsqrt.f32 %v317_v63 }
 0x189   :  { %v310_v3 = vsub.f32 %v302_v1, %v306_v0 }
 0x18b   :  { %v318_v6 = vadd.f32 1e-05, %v310_v3 }
 0x18c   :  { %v452_v4 = vpop.eup %451 }
 0x18d   :  { %v323_v5 = vmul.f32 %v452_v4, %v311_v2  ;;  %457 = vrsqrt.f32 %v318_v6 }
 0x18f   :  { %341 = vperm.xlu0 %449, %v323_v5   ;;  %v331_v11 = vmul.f32 %v323_v5, %v279_v41 }
 0x191   :  { %v335_v13 = vsub.f32 %v327_v12, %v331_v11 }
 0x192   :  { %v454_v9 = vpop.eup %453 }
 0x193   :  { %v324_v10 = vmul.f32 %v454_v9, %v312_v7 }
 0x194   :  { %v456_v14 = vpop.eup %455 }
 0x195   :  { %346 = vperm.xlu1 %450, %v324_v10   ;;  %v332_v17 = vmul.f32 %v324_v10, %v280_v49  ;;  %v325_v18 = vmul.f32 %v456_v14, %v313_v15 }
 0x197   :  { %v336_v20 = vsub.f32 %v328_v19, %v332_v17  ;;  %v333_v25 = vmul.f32 %v325_v18, %v281_v53 }
 0x199   :  { %365 = vperm.xlu1 %450, %v335_v13   ;;  %v337_v27 = vsub.f32 %v329_v26, %v333_v25 }
 0x19a   :  { %v458_v21 = vpop.eup %457 }
 0x19b   :  { %v326_v23 = vmul.f32 %v458_v21, %v314_v22 }
 0x19d   :  { %351 = vperm.xlu1 %450, %v325_v18   ;;  %v334_v28 = vmul.f32 %v326_v23, %v282_v61 }
 0x19f   :  { %v338_v30 = vsub.f32 %v330_v29, %v334_v28 }
 0x1a1   :  { %370 = vperm.xlu1 %450, %v336_v20  }
 0x1a5   :  { %356 = vperm.xlu1 %450, %v326_v23  }
 0x1a9   :  { %375 = vperm.xlu1 %450, %v337_v27  }
 0x1ad   :  { %380 = vperm.xlu1 %450, %v338_v30  }
 0x20a   :  { %v342_v31 = vpop.permute.xlu0 %341 }
 0x20b   :  { %v359_v34 = vmul.f32 %v342_v31, %v706_v8 }
 0x210   :  { %v347_v32 = vpop.permute.xlu1 %346 }
 0x211   :  { %v360_v39 = vmul.f32 %v347_v32, %v712_v16 }
 0x214   :  { %v366_v35 = vpop.permute.xlu1 %365 }
 0x215   :  { %v383_v36 = vadd.f32 %v366_v35, %v359_v34 }
 0x217   :  { %v387_v37 = vmax.f32 %v383_v36, 0.0 }
 0x218   :  { %v352_v38 = vpop.permute.xlu1 %351 }
 0x219   :  { %391 = vst.msk [vmem:[%s782_s4] sm:$0xff] %vm266_vm1, %v387_v37  ;;  %v361_v8 = vmul.f32 %v352_v38, %v717_v24 }
 0x21c   :  { %v371_v40 = vpop.permute.xlu1 %370 }
 0x21d   :  { %v384_v41 = vadd.f32 %v371_v40, %v360_v39 }
 0x21f   :  { %v388_v42 = vmax.f32 %v384_v41, 0.0 }
 0x220   :  { %v357_v43 = vpop.permute.xlu1 %356 }
 0x221   :  { %392 = vst.msk [vmem:[%s782_s4 + $0x8] sm:$0xff] %vm266_vm1, %v388_v42  ;;  %v362_v46 = vmul.f32 %v357_v43, %v726_v33 }
 0x224   :  { %v376_v44 = vpop.permute.xlu1 %375 }
 0x225   :  { %v385_v45 = vadd.f32 %v376_v44, %v361_v8 }
 0x227   :  { %v389_v47 = vmax.f32 %v385_v45, 0.0 }
 0x228   :  { %v381_v48 = vpop.permute.xlu1 %380 }
 0x229   :  { %393 = vst.msk [vmem:[%s782_s4 + $0x10] sm:$0xff] %vm266_vm1, %v389_v47  ;;  %v386_v16 = vadd.f32 %v381_v48, %v362_v46 }
 0x22b   :  { %v390_v49 = vmax.f32 %v386_v16, 0.0 }
 0x22d   :  { %394 = vst.msk [vmem:[%s782_s4 + $0x18] sm:$0xff] %vm266_vm1, %v390_v49 }

// kernel: policy_forward.5
= control target key start
LH: loop header
LB: loop body
LE: loop exit
PB: predicated region body
PF: predicated region fallthrough
CT: control target
= control target key end

     0   :  { %19 = vsyncpa [#allocation3], 0  ;;  %vm3280_vm0 = vmmov 0   ;;  %vm150_vm1 = vcmask 261120   ;;  %s5124_s0 = inlined_call_operand.vmem [shape: f32[8,800], index: 0, kind: input, shape index: {}]   ;;  %s5125_s1 = inlined_call_operand.vmem [shape: f32[2,8], index: 1, kind: input, shape index: {}]   ;;  %s5126_s2 = inlined_call_operand.vmem [shape: f32[2,256], index: 2, kind: input, shape index: {}]   ;;  %s5127_s3 = inlined_call_operand.vmem [shape: f32[2,256], index: 3, kind: input, shape index: {}]   ;;  %s5128_s4 = inlined_call_operand.vmem [shape: f32[800,32], index: 4, kind: input, shape index: {}]   ;;  %s5129_s5 = inlined_call_operand.vmem [shape: f32[1,32], index: 5, kind: input, shape index: {}]   ;;  %s5130_s6 = inlined_call_operand.vmem [shape: f32[1,32], index: 6, kind: input, shape index: {}]   ;;  %s5131_s7 = inlined_call_operand.vmem [shape: f32[392,1024], index: 7, kind: input, shape index: {}]   ;;  %s5132_s8 = inlined_call_operand.vmem [shape: f32[1,1024], index: 8, kind: input, shape index: {}]   ;;  %s5133_s9 = inlined_call_operand.vmem [shape: f32[256,8], index: 9, kind: input, shape index: {}]   ;;  %s5134_s10 = inlined_call_operand.vmem [shape: f32[1,8], index: 10, kind: input, shape index: {}]   ;;  %s5135_s11 = inlined_call_operand.hbm [shape: f32[2,2,8], index: 11, kind: output, shape index: {0}]   ;;  %s5136_s12 = inlined_call_operand.hbm [shape: f32[2,256], index: 12, kind: output, shape index: {1}]   ;;  %s5137_s13 = inlined_call_operand.hbm [shape: f32[2,256], index: 13, kind: output, shape index: {2}]  }
   0x1   :  { %v81_v0 = vld [vmem:[%s5128_s4 + $0xf8] sm:$0xff]  ;;  %v80_v4 = vld [vmem:[%s5128_s4 + $0xf0] sm:$0xff]  ;;  %v79_v8 = vld [vmem:[%s5128_s4 + $0xe8] sm:$0xff] }
   0x2   :  { %v113_v1 = vld [vmem:[%s5128_s4 + $0x1f8] sm:$0xff]  ;;  %3007 = vmatprep.subr.mxu0 %v81_v0  ;;  %v112_v5 = vld [vmem:[%s5128_s4 + $0x1f0] sm:$0xff]  ;;  %v111_v9 = vld [vmem:[%s5128_s4 + $0x1e8] sm:$0xff] }
   0x3   :  { %v65_v2 = vld [vmem:[%s5128_s4 + $0x78] sm:$0xff]  ;;  %3042 = vmatprep.subr.mxu1 %v113_v1  ;;  %v64_v6 = vld [vmem:[%s5128_s4 + $0x70] sm:$0xff]  ;;  %v63_v10 = vld [vmem:[%s5128_s4 + $0x68] sm:$0xff] }
   0x4   :  { %v97_v3 = vld [vmem:[%s5128_s4 + $0x178] sm:$0xff]  ;;  %3008 = vmatpush3.msra.mxu0 %v65_v2  ;;  %v96_v7 = vld [vmem:[%s5128_s4 + $0x170] sm:$0xff]  ;;  %v95_v11 = vld [vmem:[%s5128_s4 + $0x168] sm:$0xff] }
   0x5   :  { %3043 = vmatpush3.msra.mxu1 %v97_v3  ;;  %3009 = vmatprep.subr.mxu0 %v80_v4  ;;  %v78_v12 = vld [vmem:[%s5128_s4 + $0xe0] sm:$0xff]  ;;  %v77_v16 = vld [vmem:[%s5128_s4 + $0xd8] sm:$0xff]  ;;  %v76_v20 = vld [vmem:[%s5128_s4 + $0xd0] sm:$0xff] }
   0x6   :  { %3044 = vmatprep.subr.mxu1 %v112_v5  ;;  %3010 = vmatpush3.msra.mxu0 %v64_v6  ;;  %v110_v13 = vld [vmem:[%s5128_s4 + $0x1e0] sm:$0xff]  ;;  %v109_v17 = vld [vmem:[%s5128_s4 + $0x1d8] sm:$0xff]  ;;  %v108_v21 = vld [vmem:[%s5128_s4 + $0x1d0] sm:$0xff] }
   0x7   :  { %3045 = vmatpush3.msra.mxu1 %v96_v7  ;;  %3011 = vmatprep.subr.mxu0 %v79_v8  ;;  %v62_v14 = vld [vmem:[%s5128_s4 + $0x60] sm:$0xff]  ;;  %v61_v18 = vld [vmem:[%s5128_s4 + $0x58] sm:$0xff]  ;;  %v60_v22 = vld [vmem:[%s5128_s4 + $0x50] sm:$0xff] }
   0x8   :  { %3046 = vmatprep.subr.mxu1 %v111_v9  ;;  %v94_v15 = vld [vmem:[%s5128_s4 + $0x160] sm:$0xff]  ;;  %3012 = vmatpush3.msra.mxu0 %v63_v10  ;;  %v93_v19 = vld [vmem:[%s5128_s4 + $0x158] sm:$0xff]  ;;  %v92_v23 = vld [vmem:[%s5128_s4 + $0x150] sm:$0xff] }
   0x9   :  { %3047 = vmatpush3.msra.mxu1 %v95_v11  ;;  %3013 = vmatprep.subr.mxu0 %v78_v12  ;;  %v75_v24 = vld [vmem:[%s5128_s4 + $0xc8] sm:$0xff]  ;;  %v74_v28 = vld [vmem:[%s5128_s4 + $0xc0] sm:$0xff]  ;;  %v73_v32 = vld [vmem:[%s5128_s4 + $0xb8] sm:$0xff] }
   0xa   :  { %3048 = vmatprep.subr.mxu1 %v110_v13  ;;  %3014 = vmatpush3.msra.mxu0 %v62_v14  ;;  %v107_v25 = vld [vmem:[%s5128_s4 + $0x1c8] sm:$0xff]  ;;  %v106_v29 = vld [vmem:[%s5128_s4 + $0x1c0] sm:$0xff]  ;;  %v105_v33 = vld [vmem:[%s5128_s4 + $0x1b8] sm:$0xff] }
   0xb   :  { %3049 = vmatpush3.msra.mxu1 %v94_v15  ;;  %3015 = vmatprep.subr.mxu0 %v77_v16  ;;  %v59_v26 = vld [vmem:[%s5128_s4 + $0x48] sm:$0xff]  ;;  %v58_v30 = vld [vmem:[%s5128_s4 + $0x40] sm:$0xff]  ;;  %v57_v34 = vld [vmem:[%s5128_s4 + $0x38] sm:$0xff] }
   0xc   :  { %3050 = vmatprep.subr.mxu1 %v109_v17  ;;  %3016 = vmatpush3.msra.mxu0 %v61_v18  ;;  %v91_v27 = vld [vmem:[%s5128_s4 + $0x148] sm:$0xff]  ;;  %v90_v31 = vld [vmem:[%s5128_s4 + $0x140] sm:$0xff]  ;;  %v89_v35 = vld [vmem:[%s5128_s4 + $0x138] sm:$0xff] }
   0xd   :  { %3051 = vmatpush3.msra.mxu1 %v93_v19  ;;  %3017 = vmatprep.subr.mxu0 %v76_v20  ;;  %v72_v36 = vld [vmem:[%s5128_s4 + $0xb0] sm:$0xff]  ;;  %v71_v40 = vld [vmem:[%s5128_s4 + $0xa8] sm:$0xff]  ;;  %v70_v44 = vld [vmem:[%s5128_s4 + $0xa0] sm:$0xff] }
   0xe   :  { %3052 = vmatprep.subr.mxu1 %v108_v21  ;;  %3018 = vmatpush3.msra.mxu0 %v60_v22  ;;  %v104_v37 = vld [vmem:[%s5128_s4 + $0x1b0] sm:$0xff]  ;;  %v103_v41 = vld [vmem:[%s5128_s4 + $0x1a8] sm:$0xff]  ;;  %v102_v45 = vld [vmem:[%s5128_s4 + $0x1a0] sm:$0xff] }
   0xf   :  { %3053 = vmatpush3.msra.mxu1 %v92_v23  ;;  %3019 = vmatprep.subr.mxu0 %v75_v24  ;;  %v56_v38 = vld [vmem:[%s5128_s4 + $0x30] sm:$0xff]  ;;  %v55_v42 = vld [vmem:[%s5128_s4 + $0x28] sm:$0xff]  ;;  %v54_v46 = vld [vmem:[%s5128_s4 + $0x20] sm:$0xff] }
  0x10   :  { %3054 = vmatprep.subr.mxu1 %v107_v25  ;;  %3020 = vmatpush3.msra.mxu0 %v59_v26  ;;  %v88_v39 = vld [vmem:[%s5128_s4 + $0x130] sm:$0xff]  ;;  %v87_v43 = vld [vmem:[%s5128_s4 + $0x128] sm:$0xff]  ;;  %v86_v47 = vld [vmem:[%s5128_s4 + $0x120] sm:$0xff] }
  0x11   :  { %3055 = vmatpush3.msra.mxu1 %v91_v27  ;;  %3021 = vmatprep.subr.mxu0 %v74_v28  ;;  %v69_v48 = vld [vmem:[%s5128_s4 + $0x98] sm:$0xff]  ;;  %v68_v52 = vld [vmem:[%s5128_s4 + $0x90] sm:$0xff]  ;;  %v67_v56 = vld [vmem:[%s5128_s4 + $0x88] sm:$0xff] }
  0x12   :  { %3056 = vmatprep.subr.mxu1 %v106_v29  ;;  %3022 = vmatpush3.msra.mxu0 %v58_v30  ;;  %v101_v49 = vld [vmem:[%s5128_s4 + $0x198] sm:$0xff]  ;;  %v100_v53 = vld [vmem:[%s5128_s4 + $0x190] sm:$0xff]  ;;  %v99_v57 = vld [vmem:[%s5128_s4 + $0x188] sm:$0xff] }
  0x13   :  { %3057 = vmatpush3.msra.mxu1 %v90_v31  ;;  %3023 = vmatprep.subr.mxu0 %v73_v32  ;;  %v53_v50 = vld [vmem:[%s5128_s4 + $0x18] sm:$0xff]  ;;  %v52_v54 = vld [vmem:[%s5128_s4 + $0x10] sm:$0xff]  ;;  %v51_v58 = vld [vmem:[%s5128_s4 + $0x8] sm:$0xff] }
  0x14   :  { %3058 = vmatprep.subr.mxu1 %v105_v33  ;;  %3024 = vmatpush3.msra.mxu0 %v57_v34  ;;  %v85_v51 = vld [vmem:[%s5128_s4 + $0x118] sm:$0xff]  ;;  %v84_v55 = vld [vmem:[%s5128_s4 + $0x110] sm:$0xff]  ;;  %v83_v59 = vld [vmem:[%s5128_s4 + $0x108] sm:$0xff] }
  0x15   :  { %3059 = vmatpush3.msra.mxu1 %v89_v35  ;;  %3025 = vmatprep.subr.mxu0 %v72_v36  ;;  %v66_v60 = vld [vmem:[%s5128_s4 + $0x80] sm:$0xff]  ;;  %v44_v63 = vld [vmem:[%s5124_s0 + $0x8] sm:$0xff]  ;;  %v46_v1 = vld [vmem:[%s5124_s0 + $0x18] sm:$0xff] }
  0x16   :  { %3060 = vmatprep.subr.mxu1 %v104_v37  ;;  %3026 = vmatpush3.msra.mxu0 %v56_v38  ;;  %v98_v61 = vld [vmem:[%s5128_s4 + $0x180] sm:$0xff]  ;;  %v45_v3 = vld [vmem:[%s5124_s0 + $0x10] sm:$0xff]  ;;  %v145_v4 = vld [vmem:[%s5128_s4 + $0x2f8] sm:$0xff] }
  0x17   :  { %3061 = vmatpush3.msra.mxu1 %v88_v39  ;;  %3027 = vmatprep.subr.mxu0 %v71_v40  ;;  %v50_v62 = vld [vmem:[%s5128_s4] sm:$0xff]  ;;  %v129_v5 = vld [vmem:[%s5128_s4 + $0x278] sm:$0xff]  ;;  %v48_v6 = vld [vmem:[%s5124_s0 + $0x28] sm:$0xff] }
  0x18   :  { %3062 = vmatprep.subr.mxu1 %v103_v41  ;;  %3028 = vmatpush3.msra.mxu0 %v55_v42  ;;  %v82_v0 = vld [vmem:[%s5128_s4 + $0x100] sm:$0xff]  ;;  %v144_v7 = vld [vmem:[%s5128_s4 + $0x2f0] sm:$0xff]  ;;  %v143_v9 = vld [vmem:[%s5128_s4 + $0x2e8] sm:$0xff] }
  0x19   :  { %3063 = vmatpush3.msra.mxu1 %v87_v43  ;;  %3029 = vmatprep.subr.mxu0 %v70_v44  ;;  %v43_v2 = vld [vmem:[%s5124_s0] sm:$0xff]  ;;  %v128_v8 = vld [vmem:[%s5128_s4 + $0x270] sm:$0xff]  ;;  %v127_v10 = vld [vmem:[%s5128_s4 + $0x268] sm:$0xff] }
  0x1a   :  { %3064 = vmatprep.subr.mxu1 %v102_v45  ;;  %3030 = vmatpush3.msra.mxu0 %v54_v46  ;;  %v142_v11 = vld [vmem:[%s5128_s4 + $0x2e0] sm:$0xff]  ;;  %v606_v12 = vld [vmem:[%s5131_s7 + $0x808] sm:$0xff]  ;;  %v141_v16 = vld [vmem:[%s5128_s4 + $0x2d8] sm:$0xff] }
  0x1b   :  { %3065 = vmatpush3.msra.mxu1 %v86_v47  ;;  %3031 = vmatprep.subr.mxu0 %v69_v48  ;;  %v126_v13 = vld [vmem:[%s5128_s4 + $0x260] sm:$0xff]  ;;  %v598_v15 = vld [vmem:[%s5131_s7 + $0x7c8] sm:$0xff]  ;;  %v125_v18 = vld [vmem:[%s5128_s4 + $0x258] sm:$0xff] }
  0x1c   :  { %3066 = vmatprep.subr.mxu1 %v101_v49  ;;  %3032 = vmatpush3.msra.mxu0 %v53_v50  ;;  %v605_v14 = vld [vmem:[%s5131_s7 + $0x800] sm:$0xff]  ;;  %v590_v19 = vld [vmem:[%s5131_s7 + $0x788] sm:$0xff]  ;;  %v140_v21 = vld [vmem:[%s5128_s4 + $0x2d0] sm:$0xff] }
  0x1d   :  { %3067 = vmatpush3.msra.mxu1 %v85_v51  ;;  %3033 = vmatprep.subr.mxu0 %v68_v52  ;;  %v597_v17 = vld [vmem:[%s5131_s7 + $0x7c0] sm:$0xff]  ;;  %v582_v22 = vld [vmem:[%s5131_s7 + $0x748] sm:$0xff]  ;;  %v124_v23 = vld [vmem:[%s5128_s4 + $0x250] sm:$0xff] }
  0x1e   :  { %3068 = vmatprep.subr.mxu1 %v100_v53  ;;  %3034 = vmatpush3.msra.mxu0 %v52_v54  ;;  %v589_v20 = vld [vmem:[%s5131_s7 + $0x780] sm:$0xff]  ;;  %v139_v25 = vld [vmem:[%s5128_s4 + $0x2c8] sm:$0xff]  ;;  %v137_v33 = vld [vmem:[%s5128_s4 + $0x2b8] sm:$0xff] }
  0x1f   :  { %3069 = vmatpush3.msra.mxu1 %v84_v55  ;;  %3035 = vmatprep.subr.mxu0 %v67_v56  ;;  %v581_v24 = vld [vmem:[%s5131_s7 + $0x740] sm:$0xff]  ;;  %v574_v26 = vld [vmem:[%s5131_s7 + $0x708] sm:$0xff]  ;;  %v121_v35 = vld [vmem:[%s5128_s4 + $0x238] sm:$0xff] }
  0x20   :  { %3070 = vmatprep.subr.mxu1 %v99_v57  ;;  %3036 = vmatpush3.msra.mxu0 %v51_v58  ;;  %v123_v27 = vld [vmem:[%s5128_s4 + $0x248] sm:$0xff]  ;;  %v573_v28 = vld [vmem:[%s5131_s7 + $0x700] sm:$0xff]  ;;  %v136_v37 = vld [vmem:[%s5128_s4 + $0x2b0] sm:$0xff] }
  0x21   :  { %3071 = vmatpush3.msra.mxu1 %v83_v59  ;;  %3037 = vmatprep.subr.mxu0 %v66_v60  ;;  %v138_v29 = vld [vmem:[%s5128_s4 + $0x2c0] sm:$0xff]  ;;  %v566_v30 = vld [vmem:[%s5131_s7 + $0x6c8] sm:$0xff]  ;;  %v120_v39 = vld [vmem:[%s5128_s4 + $0x230] sm:$0xff] }
  0x22   :  { %3072 = vmatprep.subr.mxu1 %v98_v61  ;;  %3038 = vmatpush3.msra.mxu0 %v50_v62  ;;  %v122_v31 = vld [vmem:[%s5128_s4 + $0x240] sm:$0xff]  ;;  %v558_v34 = vld [vmem:[%s5131_s7 + $0x688] sm:$0xff]  ;;  %v133_v49 = vld [vmem:[%s5128_s4 + $0x298] sm:$0xff] }
  0x23   :  { %218 = vmatprep.mubr.f32.mxu0 %v44_v63  ;;  %3073 = vmatpush3.msra.mxu1 %v82_v0  ;;  %v565_v32 = vld [vmem:[%s5131_s7 + $0x6c0] sm:$0xff]  ;;  %v550_v38 = vld [vmem:[%s5131_s7 + $0x648] sm:$0xff]  ;;  %v117_v51 = vld [vmem:[%s5128_s4 + $0x218] sm:$0xff] }
  0x24   :  { %288 = vmatprep.mubr.f32.mxu1 %v46_v1  ;;  %219 = vmatmul.mubr.f32.vlgmr.msra.gmra.mxu0 %v43_v2  ;;  %v557_v36 = vld [vmem:[%s5131_s7 + $0x680] sm:$0xff]  ;;  %v135_v41 = vld [vmem:[%s5128_s4 + $0x2a8] sm:$0xff]  ;;  %v132_v53 = vld [vmem:[%s5128_s4 + $0x290] sm:$0xff] }
  0x25   :  { %289 = vmatmul.mubr.f32.vlgmr.msra.gmra.mxu1 %v45_v3  ;;  %3077 = vmatprep.subr.mxu0 %v145_v4  ;;  %v549_v40 = vld [vmem:[%s5131_s7 + $0x640] sm:$0xff]  ;;  %v542_v42 = vld [vmem:[%s5131_s7 + $0x608] sm:$0xff]  ;;  %v116_v55 = vld [vmem:[%s5128_s4 + $0x210] sm:$0xff]  ;;  %v3279_v4 = vmov 0.0  }
  0x26   :  { %358 = vmatprep.mubr.f32.mxu0 %v48_v6  ;;  %3078 = vmatpush3.msra.mxu0 %v129_v5  ;;  %v119_v43 = vld [vmem:[%s5128_s4 + $0x228] sm:$0xff]  ;;  %v541_v44 = vld [vmem:[%s5131_s7 + $0x600] sm:$0xff]  ;;  %v149_v2 = vld [vmem:[%s5128_s4 + $0x318] sm:$0xff] }
  0x27   :  { %3079 = vmatprep.subr.mxu0 %v144_v7  ;;  %752 = vmatprep.subr.mxu1 %v606_v12  ;;  %v134_v45 = vld [vmem:[%s5128_s4 + $0x2a0] sm:$0xff]  ;;  %v534_v46 = vld [vmem:[%s5131_s7 + $0x5c8] sm:$0xff]  ;;  %v148_v5 = vld [vmem:[%s5128_s4 + $0x310] sm:$0xff] }
  0x28   :  { %3080 = vmatpush3.msra.mxu0 %v128_v8  ;;  %753 = vmatpush1.msra.mxu1 %v605_v14  ;;  %v118_v47 = vld [vmem:[%s5128_s4 + $0x220] sm:$0xff]  ;;  %v526_v50 = vld [vmem:[%s5131_s7 + $0x588] sm:$0xff]  ;;  %v608_v14 = vld [vmem:[%s5131_s7 + $0x818] sm:$0xff] }
  0x29   :  { %3081 = vmatprep.subr.mxu0 %v143_v9  ;;  %754 = vmatprep.subr.mxu1 %v598_v15  ;;  %v533_v48 = vld [vmem:[%s5131_s7 + $0x5c0] sm:$0xff]  ;;  %v518_v54 = vld [vmem:[%s5131_s7 + $0x548] sm:$0xff]  ;;  %v607_v15 = vld [vmem:[%s5131_s7 + $0x810] sm:$0xff] }
  0x2a   :  { %3082 = vmatpush3.msra.mxu0 %v127_v10  ;;  %755 = vmatpush1.msra.mxu1 %v597_v17  ;;  %v525_v52 = vld [vmem:[%s5131_s7 + $0x580] sm:$0xff]  ;;  %v131_v57 = vld [vmem:[%s5128_s4 + $0x288] sm:$0xff]  ;;  %v600_v17 = vld [vmem:[%s5131_s7 + $0x7d8] sm:$0xff] }
  0x2b   :  { %3083 = vmatprep.subr.mxu0 %v142_v11  ;;  %756 = vmatprep.subr.mxu1 %v590_v19  ;;  %v517_v56 = vld [vmem:[%s5131_s7 + $0x540] sm:$0xff]  ;;  %v510_v58 = vld [vmem:[%s5131_s7 + $0x508] sm:$0xff]  ;;  %v599_v19 = vld [vmem:[%s5131_s7 + $0x7d0] sm:$0xff] }
  0x2c   :  { %3084 = vmatpush3.msra.mxu0 %v126_v13  ;;  %757 = vmatpush1.msra.mxu1 %v589_v20  ;;  %v115_v59 = vld [vmem:[%s5128_s4 + $0x208] sm:$0xff]  ;;  %v509_v60 = vld [vmem:[%s5131_s7 + $0x500] sm:$0xff]  ;;  %v49_v13 = vld [vmem:[%s5124_s0 + $0x30] sm:$0xff] }
  0x2d   :  { %3085 = vmatprep.subr.mxu0 %v141_v16  ;;  %758 = vmatprep.subr.mxu1 %v582_v22  ;;  %v130_v61 = vld [vmem:[%s5128_s4 + $0x280] sm:$0xff]  ;;  %v502_v62 = vld [vmem:[%s5131_s7 + $0x4c8] sm:$0xff] }
  0x2e   :  { %3086 = vmatpush3.msra.mxu0 %v125_v18  ;;  %759 = vmatpush1.msra.mxu1 %v581_v24  ;;  %v114_v63 = vld [vmem:[%s5128_s4 + $0x200] sm:$0xff]  ;;  %v494_v3 = vld [vmem:[%s5131_s7 + $0x488] sm:$0xff] }
  0x2f   :  { %3087 = vmatprep.subr.mxu0 %v140_v21  ;;  %760 = vmatprep.subr.mxu1 %v574_v26  ;;  %v501_v0 = vld [vmem:[%s5131_s7 + $0x4c0] sm:$0xff]  ;;  %v486_v7 = vld [vmem:[%s5131_s7 + $0x448] sm:$0xff]  ;;  %v592_v21 = vld [vmem:[%s5131_s7 + $0x798] sm:$0xff] }
  0x30   :  { %3088 = vmatpush3.msra.mxu0 %v124_v23  ;;  %761 = vmatpush1.msra.mxu1 %v573_v28  ;;  %v47_v1 = vld [vmem:[%s5124_s0 + $0x20] sm:$0xff]  ;;  %v147_v8 = vld [vmem:[%s5128_s4 + $0x308] sm:$0xff]  ;;  %v591_v23 = vld [vmem:[%s5131_s7 + $0x790] sm:$0xff] }
  0x31   :  { %3089 = vmatprep.subr.mxu0 %v139_v25  ;;  %762 = vmatprep.subr.mxu1 %v566_v30  ;;  %v493_v6 = vld [vmem:[%s5131_s7 + $0x480] sm:$0xff]  ;;  %v734_v10 = vld [vmem:[%s5131_s7 + $0xc08] sm:$0xff]  ;;  %v584_v25 = vld [vmem:[%s5131_s7 + $0x758] sm:$0xff] }
  0x32   :  { %3090 = vmatpush3.msra.mxu0 %v123_v27  ;;  %763 = vmatpush1.msra.mxu1 %v565_v32  ;;  %v485_v9 = vld [vmem:[%s5131_s7 + $0x440] sm:$0xff]  ;;  %v726_v16 = vld [vmem:[%s5131_s7 + $0xbc8] sm:$0xff]  ;;  %v583_v27 = vld [vmem:[%s5131_s7 + $0x750] sm:$0xff] }
  0x33   :  { %3091 = vmatprep.subr.mxu0 %v138_v29  ;;  %764 = vmatprep.subr.mxu1 %v558_v34  ;;  %v146_v11 = vld [vmem:[%s5128_s4 + $0x300] sm:$0xff]  ;;  %v718_v20 = vld [vmem:[%s5131_s7 + $0xb88] sm:$0xff]  ;;  %v576_v29 = vld [vmem:[%s5131_s7 + $0x718] sm:$0xff] }
  0x34   :  { %3092 = vmatpush3.msra.mxu0 %v122_v31  ;;  %765 = vmatpush1.msra.mxu1 %v557_v36  ;;  %v733_v12 = vld [vmem:[%s5131_s7 + $0xc00] sm:$0xff]  ;;  %v710_v24 = vld [vmem:[%s5131_s7 + $0xb48] sm:$0xff]  ;;  %v575_v31 = vld [vmem:[%s5131_s7 + $0x710] sm:$0xff] }
  0x35   :  { %3093 = vmatprep.subr.mxu0 %v137_v33  ;;  %766 = vmatprep.subr.mxu1 %v550_v38  ;;  %v725_v18 = vld [vmem:[%s5131_s7 + $0xbc0] sm:$0xff]  ;;  %v702_v28 = vld [vmem:[%s5131_s7 + $0xb08] sm:$0xff]  ;;  %v568_v33 = vld [vmem:[%s5131_s7 + $0x6d8] sm:$0xff] }
  0x36   :  { %3094 = vmatpush3.msra.mxu0 %v121_v35  ;;  %767 = vmatpush1.msra.mxu1 %v549_v40  ;;  %v717_v22 = vld [vmem:[%s5131_s7 + $0xb80] sm:$0xff]  ;;  %v694_v32 = vld [vmem:[%s5131_s7 + $0xac8] sm:$0xff]  ;;  %v567_v35 = vld [vmem:[%s5131_s7 + $0x6d0] sm:$0xff] }
  0x37   :  { %3095 = vmatprep.subr.mxu0 %v136_v37  ;;  %768 = vmatprep.subr.mxu1 %v542_v42  ;;  %v709_v26 = vld [vmem:[%s5131_s7 + $0xb40] sm:$0xff]  ;;  %v686_v36 = vld [vmem:[%s5131_s7 + $0xa88] sm:$0xff]  ;;  %v560_v37 = vld [vmem:[%s5131_s7 + $0x698] sm:$0xff] }
  0x38   :  { %3096 = vmatpush3.msra.mxu0 %v120_v39  ;;  %769 = vmatpush1.msra.mxu1 %v541_v44  ;;  %v701_v30 = vld [vmem:[%s5131_s7 + $0xb00] sm:$0xff]  ;;  %v559_v39 = vld [vmem:[%s5131_s7 + $0x690] sm:$0xff]  ;;  %v678_v40 = vld [vmem:[%s5131_s7 + $0xa48] sm:$0xff] }
  0x39   :  { %3097 = vmatprep.subr.mxu0 %v135_v41  ;;  %770 = vmatprep.subr.mxu1 %v534_v46  ;;  %v693_v34 = vld [vmem:[%s5131_s7 + $0xac0] sm:$0xff]  ;;  %v552_v41 = vld [vmem:[%s5131_s7 + $0x658] sm:$0xff]  ;;  %v670_v44 = vld [vmem:[%s5131_s7 + $0xa08] sm:$0xff] }
  0x3a   :  { %3098 = vmatpush3.msra.mxu0 %v119_v43  ;;  %771 = vmatpush1.msra.mxu1 %v533_v48  ;;  %v685_v38 = vld [vmem:[%s5131_s7 + $0xa80] sm:$0xff]  ;;  %v551_v43 = vld [vmem:[%s5131_s7 + $0x650] sm:$0xff]  ;;  %v662_v48 = vld [vmem:[%s5131_s7 + $0x9c8] sm:$0xff] }
  0x3b   :  { %3099 = vmatprep.subr.mxu0 %v134_v45  ;;  %772 = vmatprep.subr.mxu1 %v526_v50  ;;  %v677_v42 = vld [vmem:[%s5131_s7 + $0xa40] sm:$0xff]  ;;  %v544_v45 = vld [vmem:[%s5131_s7 + $0x618] sm:$0xff] }
  0x3c   :  { %3100 = vmatpush3.msra.mxu0 %v118_v47  ;;  %773 = vmatpush1.msra.mxu1 %v525_v52  ;;  %v669_v46 = vld [vmem:[%s5131_s7 + $0xa00] sm:$0xff]  ;;  %v543_v47 = vld [vmem:[%s5131_s7 + $0x610] sm:$0xff]  ;;  %v654_v52 = vld [vmem:[%s5131_s7 + $0x988] sm:$0xff] }
  0x3d   :  { %3101 = vmatprep.subr.mxu0 %v133_v49  ;;  %774 = vmatprep.subr.mxu1 %v518_v54  ;;  %v536_v49 = vld [vmem:[%s5131_s7 + $0x5d8] sm:$0xff]  ;;  %v661_v50 = vld [vmem:[%s5131_s7 + $0x9c0] sm:$0xff] }
  0x3e   :  { %3102 = vmatpush3.msra.mxu0 %v117_v51  ;;  %775 = vmatpush1.msra.mxu1 %v517_v56  ;;  %v535_v51 = vld [vmem:[%s5131_s7 + $0x5d0] sm:$0xff]  ;;  %v653_v54 = vld [vmem:[%s5131_s7 + $0x980] sm:$0xff] }
  0x3f   :  { %3103 = vmatprep.subr.mxu0 %v132_v53  ;;  %776 = vmatprep.subr.mxu1 %v510_v58  ;;  %v528_v53 = vld [vmem:[%s5131_s7 + $0x598] sm:$0xff]  ;;  %v527_v56 = vld [vmem:[%s5131_s7 + $0x590] sm:$0xff] }
  0x40   :  { %3104 = vmatpush3.msra.mxu0 %v116_v55  ;;  %777 = vmatpush1.msra.mxu1 %v509_v60  ;;  %v3911_v55 = vld.sshfl [vmem:[%s5126_s2] sm:$0x33 pattern:$0x76325410]  ;;  %v520_v58 = vld [vmem:[%s5131_s7 + $0x558] sm:$0xff]  ;;  %v519_v60 = vld [vmem:[%s5131_s7 + $0x550] sm:$0xff] }
  0x41   :  { %3105 = vmatprep.subr.mxu0 %v131_v57  ;;  %778 = vmatprep.subr.mxu1 %v502_v62  ;;  %v646_v57 = vld [vmem:[%s5131_s7 + $0x948] sm:$0xff]  ;;  %v3933_v62 = vcombine.high %v3911_v55, %v3911_v55 }
  0x42   :  { %3106 = vmatpush3.msra.mxu0 %v115_v59  ;;  %779 = vmatpush1.msra.mxu1 %v501_v0  ;;  %v645_v59 = vld [vmem:[%s5131_s7 + $0x940] sm:$0xff]  ;;  %v511_v0 = vld [vmem:[%s5131_s7 + $0x510] sm:$0xff] }
  0x43   :  { %3107 = vmatprep.subr.mxu0 %v130_v61  ;;  %780 = vmatprep.subr.mxu1 %v494_v3  ;;  %v638_v61 = vld [vmem:[%s5131_s7 + $0x908] sm:$0xff] }
  0x44   :  { %3108 = vmatpush3.msra.mxu0 %v114_v63  ;;  %781 = vmatpush1.msra.mxu1 %v493_v6  ;;  %v512_v63 = vld [vmem:[%s5131_s7 + $0x518] sm:$0xff]  ;;  %v630_v3 = vld [vmem:[%s5131_s7 + $0x8c8] sm:$0xff]  ;;  %v629_v6 = vld [vmem:[%s5131_s7 + $0x8c0] sm:$0xff] }
  0x45   :  { %359 = vmatmul.mubr.f32.vlgmr.msra.gmra.mxu0 %v47_v1  ;;  %3152 = vmatprep.subr.mxu0 %v3279_v4  ;;  %v637_v1 = vld [vmem:[%s5131_s7 + $0x900] sm:$0xff] }
  0x46   :  { %3153 = vmatpush3.msra.mxu0 %v149_v2  ;;  %3160 = vmatprep.mubr.msk.f32.mxu0 %vm3280_vm0, %v3279_v4  ;;  %v504_v2 = vld [vmem:[%s5131_s7 + $0x4d8] sm:$0xff] }
  0x47   :  { %3154 = vmatprep.subr.mxu0 %v3279_v4  ;;  %782 = vmatprep.subr.mxu1 %v486_v7  ;;  %v496_v7 = vld [vmem:[%s5131_s7 + $0x498] sm:$0xff] }
  0x48   :  { %3155 = vmatpush3.msra.mxu0 %v148_v5  ;;  %783 = vmatpush1.msra.mxu1 %v485_v9  ;;  %v503_v5 = vld [vmem:[%s5131_s7 + $0x4d0] sm:$0xff] }
  0x49   :  { %3156 = vmatprep.subr.mxu0 %v3279_v4  ;;  %784 = vmatprep.subr.mxu1 %v734_v10  ;;  %v495_v9 = vld [vmem:[%s5131_s7 + $0x490] sm:$0xff]  ;;  %v621_v10 = vld [vmem:[%s5131_s7 + $0x880] sm:$0xff] }
  0x4a   :  { %3157 = vmatpush3.msra.mxu0 %v147_v8  ;;  %785 = vmatpush2.msra.mxu1 %v733_v12  ;;  %v622_v8 = vld [vmem:[%s5131_s7 + $0x888] sm:$0xff] }
  0x4b   :  { %3158 = vmatprep.subr.mxu0 %v3279_v4  ;;  %786 = vmatprep.subr.mxu1 %v726_v16  ;;  %v614_v12 = vld [vmem:[%s5131_s7 + $0x848] sm:$0xff]  ;;  %v735_v16 = vld [vmem:[%s5131_s7 + $0xc10] sm:$0xff] }
  0x4c   :  { %3159 = vmatpush3.msra.mxu0 %v146_v11  ;;  %787 = vmatpush2.msra.mxu1 %v725_v18  ;;  %v488_v11 = vld [vmem:[%s5131_s7 + $0x458] sm:$0xff] }
  0x4d   :  { %3161 = vmatmul.mubr.msk.f32.vlgmr.msra.gmra.mxu0 %vm150_vm1, %v49_v13  ;;  %823 = vmatprep.subr.mxu0 %v608_v14  ;;  %v487_v13 = vld [vmem:[%s5131_s7 + $0x450] sm:$0xff]  ;;  %v613_v14 = vld [vmem:[%s5131_s7 + $0x840] sm:$0xff]  ;;  %v728_v18 = vld [vmem:[%s5131_s7 + $0xbd8] sm:$0xff] }
  0x4e   :  { %824 = vmatpush1.msra.mxu0 %v607_v15  ;;  %788 = vmatprep.subr.mxu1 %v718_v20  ;;  %v736_v15 = vld [vmem:[%s5131_s7 + $0xc18] sm:$0xff]  ;;  %v609_v20 = vld [vmem:[%s5131_s7 + $0x820] sm:$0xff] }
  0x4f   :  { %825 = vmatprep.subr.mxu0 %v600_v17  ;;  %789 = vmatpush2.msra.mxu1 %v717_v22  ;;  %v610_v17 = vld [vmem:[%s5131_s7 + $0x828] sm:$0xff] }
  0x50   :  { %826 = vmatpush1.msra.mxu0 %v599_v19  ;;  %790 = vmatprep.subr.mxu1 %v710_v24  ;;  %v727_v19 = vld [vmem:[%s5131_s7 + $0xbd0] sm:$0xff]  ;;  %v602_v22 = vld [vmem:[%s5131_s7 + $0x7e8] sm:$0xff]  ;;  %v601_v24 = vld [vmem:[%s5131_s7 + $0x7e0] sm:$0xff] }
  0x51   :  { %827 = vmatprep.subr.mxu0 %v592_v21  ;;  %791 = vmatpush2.msra.mxu1 %v709_v26  ;;  %v720_v21 = vld [vmem:[%s5131_s7 + $0xb98] sm:$0xff]  ;;  %v594_v26 = vld [vmem:[%s5131_s7 + $0x7a8] sm:$0xff] }
  0x52   :  { %828 = vmatpush1.msra.mxu0 %v591_v23  ;;  %792 = vmatprep.subr.mxu1 %v702_v28  ;;  %v719_v23 = vld [vmem:[%s5131_s7 + $0xb90] sm:$0xff]  ;;  %v593_v28 = vld [vmem:[%s5131_s7 + $0x7a0] sm:$0xff] }
  0x53   :  { %829 = vmatprep.subr.mxu0 %v584_v25  ;;  %793 = vmatpush2.msra.mxu1 %v701_v30  ;;  %v712_v25 = vld [vmem:[%s5131_s7 + $0xb58] sm:$0xff]  ;;  %v586_v30 = vld [vmem:[%s5131_s7 + $0x768] sm:$0xff] }
  0x54   :  { %830 = vmatpush1.msra.mxu0 %v583_v27  ;;  %794 = vmatprep.subr.mxu1 %v694_v32  ;;  %v711_v27 = vld [vmem:[%s5131_s7 + $0xb50] sm:$0xff]  ;;  %v585_v32 = vld [vmem:[%s5131_s7 + $0x760] sm:$0xff] }
  0x55   :  { %831 = vmatprep.subr.mxu0 %v576_v29  ;;  %795 = vmatpush2.msra.mxu1 %v693_v34  ;;  %v704_v29 = vld [vmem:[%s5131_s7 + $0xb18] sm:$0xff]  ;;  %v578_v34 = vld [vmem:[%s5131_s7 + $0x728] sm:$0xff] }
  0x56   :  { %832 = vmatpush1.msra.mxu0 %v575_v31  ;;  %796 = vmatprep.subr.mxu1 %v686_v36  ;;  %v703_v31 = vld [vmem:[%s5131_s7 + $0xb10] sm:$0xff]  ;;  %v577_v36 = vld [vmem:[%s5131_s7 + $0x720] sm:$0xff] }
  0x57   :  { %833 = vmatprep.subr.mxu0 %v568_v33  ;;  %797 = vmatpush2.msra.mxu1 %v685_v38  ;;  %v696_v33 = vld [vmem:[%s5131_s7 + $0xad8] sm:$0xff]  ;;  %v570_v38 = vld [vmem:[%s5131_s7 + $0x6e8] sm:$0xff] }
  0x58   :  { %834 = vmatpush1.msra.mxu0 %v567_v35  ;;  %798 = vmatprep.subr.mxu1 %v678_v40  ;;  %v695_v35 = vld [vmem:[%s5131_s7 + $0xad0] sm:$0xff]  ;;  %v569_v40 = vld [vmem:[%s5131_s7 + $0x6e0] sm:$0xff] }
  0x59   :  { %835 = vmatprep.subr.mxu0 %v560_v37  ;;  %799 = vmatpush2.msra.mxu1 %v677_v42  ;;  %v688_v37 = vld [vmem:[%s5131_s7 + $0xa98] sm:$0xff]  ;;  %v562_v42 = vld [vmem:[%s5131_s7 + $0x6a8] sm:$0xff] }
  0x5a   :  { %836 = vmatpush1.msra.mxu0 %v559_v39  ;;  %800 = vmatprep.subr.mxu1 %v670_v44  ;;  %v687_v39 = vld [vmem:[%s5131_s7 + $0xa90] sm:$0xff]  ;;  %v561_v44 = vld [vmem:[%s5131_s7 + $0x6a0] sm:$0xff] }
  0x5b   :  { %837 = vmatprep.subr.mxu0 %v552_v41  ;;  %801 = vmatpush2.msra.mxu1 %v669_v46  ;;  %v680_v41 = vld [vmem:[%s5131_s7 + $0xa58] sm:$0xff]  ;;  %v554_v46 = vld [vmem:[%s5131_s7 + $0x668] sm:$0xff] }
  0x5c   :  { %838 = vmatpush1.msra.mxu0 %v551_v43  ;;  %802 = vmatprep.subr.mxu1 %v662_v48  ;;  %v679_v43 = vld [vmem:[%s5131_s7 + $0xa50] sm:$0xff]  ;;  %v553_v48 = vld [vmem:[%s5131_s7 + $0x660] sm:$0xff] }
  0x5d   :  { %839 = vmatprep.subr.mxu0 %v544_v45  ;;  %803 = vmatpush2.msra.mxu1 %v661_v50  ;;  %v672_v45 = vld [vmem:[%s5131_s7 + $0xa18] sm:$0xff]  ;;  %v546_v50 = vld [vmem:[%s5131_s7 + $0x628] sm:$0xff] }
  0x5e   :  { %840 = vmatpush1.msra.mxu0 %v543_v47  ;;  %804 = vmatprep.subr.mxu1 %v654_v52  ;;  %v671_v47 = vld [vmem:[%s5131_s7 + $0xa10] sm:$0xff]  ;;  %v545_v52 = vld [vmem:[%s5131_s7 + $0x620] sm:$0xff] }
  0x5f   :  { %841 = vmatprep.subr.mxu0 %v536_v49  ;;  %805 = vmatpush2.msra.mxu1 %v653_v54  ;;  %v664_v49 = vld [vmem:[%s5131_s7 + $0x9d8] sm:$0xff] }
  0x60   :  { %842 = vmatpush1.msra.mxu0 %v535_v51  ;;  %806 = vmatprep.subr.mxu1 %v646_v57  ;;  %v663_v51 = vld [vmem:[%s5131_s7 + $0x9d0] sm:$0xff] }
  0x61   :  { %843 = vmatprep.subr.mxu0 %v528_v53  ;;  %807 = vmatpush2.msra.mxu1 %v645_v59 }
  0x62   :  { %844 = vmatpush1.msra.mxu0 %v527_v56  ;;  %808 = vmatprep.subr.mxu1 %v638_v61 }
  0x63   :  { %845 = vmatprep.subr.mxu0 %v520_v58  ;;  %887 = vmatprep.mubr.f32.mxu0 %v3933_v62 }
  0x64   :  { %846 = vmatpush1.msra.mxu0 %v519_v60  ;;  %809 = vmatpush2.msra.mxu1 %v637_v1 }
  0x65   :  { %847 = vmatprep.subr.mxu0 %v512_v63  ;;  %810 = vmatprep.subr.mxu1 %v630_v3 }
  0x66   :  { %848 = vmatpush1.msra.mxu0 %v511_v0  ;;  %811 = vmatpush2.msra.mxu1 %v629_v6 }
  0x67   :  { %849 = vmatprep.subr.mxu0 %v504_v2  ;;  %812 = vmatprep.subr.mxu1 %v622_v8 }
  0x68   :  { %850 = vmatpush1.msra.mxu0 %v503_v5  ;;  %813 = vmatpush2.msra.mxu1 %v621_v10 }
  0x69   :  { %851 = vmatprep.subr.mxu0 %v496_v7  ;;  %814 = vmatprep.subr.mxu1 %v614_v12 }
  0x6a   :  { %852 = vmatpush1.msra.mxu0 %v495_v9  ;;  %815 = vmatpush2.msra.mxu1 %v613_v14 }
  0x6b   :  { %853 = vmatprep.subr.mxu0 %v488_v11  ;;  %816 = vmatprep.mubr.f32.mxu1 %v3933_v62 }
  0x6c   :  { %854 = vmatpush1.msra.mxu0 %v487_v13  ;;  %894 = vmatprep.subr.mxu1 %v610_v17 }
  0x6d   :  { %855 = vmatprep.subr.mxu0 %v736_v15  ;;  %817 = vmatmul.mubr.f32.vlgmr.msra.gmra.mxu1 %v3911_v55 }
  0x6e   :  { %856 = vmatpush2.msra.mxu0 %v735_v16  ;;  %895 = vmatpush1.msra.mxu1 %v609_v20 }
  0x6f   :  { %857 = vmatprep.subr.mxu0 %v728_v18  ;;  %896 = vmatprep.subr.mxu1 %v602_v22 }
  0x70   :  { %858 = vmatpush2.msra.mxu0 %v727_v19  ;;  %897 = vmatpush1.msra.mxu1 %v601_v24 }
  0x71   :  { %859 = vmatprep.subr.mxu0 %v720_v21  ;;  %898 = vmatprep.subr.mxu1 %v594_v26 }
  0x72   :  { %860 = vmatpush2.msra.mxu0 %v719_v23  ;;  %899 = vmatpush1.msra.mxu1 %v593_v28 }
  0x73   :  { %861 = vmatprep.subr.mxu0 %v712_v25  ;;  %900 = vmatprep.subr.mxu1 %v586_v30 }
  0x74   :  { %862 = vmatpush2.msra.mxu0 %v711_v27  ;;  %901 = vmatpush1.msra.mxu1 %v585_v32 }
  0x75   :  { %863 = vmatprep.subr.mxu0 %v704_v29  ;;  %902 = vmatprep.subr.mxu1 %v578_v34 }
  0x76   :  { %864 = vmatpush2.msra.mxu0 %v703_v31  ;;  %903 = vmatpush1.msra.mxu1 %v577_v36 }
  0x77   :  { %865 = vmatprep.subr.mxu0 %v696_v33  ;;  %904 = vmatprep.subr.mxu1 %v570_v38 }
  0x78   :  { %866 = vmatpush2.msra.mxu0 %v695_v35  ;;  %905 = vmatpush1.msra.mxu1 %v569_v40 }
  0x79   :  { %867 = vmatprep.subr.mxu0 %v688_v37  ;;  %906 = vmatprep.subr.mxu1 %v562_v42 }
  0x7a   :  { %868 = vmatpush2.msra.mxu0 %v687_v39  ;;  %907 = vmatpush1.msra.mxu1 %v561_v44 }
  0x7b   :  { %869 = vmatprep.subr.mxu0 %v680_v41  ;;  %908 = vmatprep.subr.mxu1 %v554_v46 }
  0x7c   :  { %870 = vmatpush2.msra.mxu0 %v679_v43 }
  0x7d   :  { %871 = vmatprep.subr.mxu0 %v672_v45 }
  0x7e   :  { %20 = vsyncpa [#allocation5], 0  ;;  %872 = vmatpush2.msra.mxu0 %v671_v47  ;;  %v656_v53 = vld [vmem:[%s5131_s7 + $0x998] sm:$0xff]  ;;  %909 = vmatpush1.msra.mxu1 %v553_v48  ;;  %v538_v54 = vld [vmem:[%s5131_s7 + $0x5e8] sm:$0xff]  ;;  %vm1036_vm2 = vcmask 64512   ;;  %vm2851_vm3 = vcmask 58368  }
  0x7f   :  { %873 = vmatprep.subr.mxu0 %v664_v49  ;;  %v655_v56 = vld [vmem:[%s5131_s7 + $0x990] sm:$0xff]  ;;  %910 = vmatprep.subr.mxu1 %v546_v50  ;;  %v537_v57 = vld [vmem:[%s5131_s7 + $0x5e0] sm:$0xff]  ;;  %v648_v58 = vld [vmem:[%s5131_s7 + $0x958] sm:$0xff]  ;;  %vm2878_vm4 = vcmask 57344  }
  0x80   :  { %874 = vmatpush2.msra.mxu0 %v663_v51  ;;  %911 = vmatpush1.msra.mxu1 %v545_v52  ;;  %v530_v59 = vld [vmem:[%s5131_s7 + $0x5a8] sm:$0xff]  ;;  %v647_v60 = vld [vmem:[%s5131_s7 + $0x950] sm:$0xff]  ;;  %v529_v61 = vld [vmem:[%s5131_s7 + $0x5a0] sm:$0xff] }
  0x81   :  { %875 = vmatprep.subr.mxu0 %v656_v53  ;;  %912 = vmatprep.subr.mxu1 %v538_v54  ;;  %v640_v63 = vld [vmem:[%s5131_s7 + $0x918] sm:$0xff]  ;;  %v522_v0 = vld [vmem:[%s5131_s7 + $0x568] sm:$0xff]  ;;  %v639_v1 = vld [vmem:[%s5131_s7 + $0x910] sm:$0xff] }
  0x82   :  { %876 = vmatpush2.msra.mxu0 %v655_v56  ;;  %913 = vmatpush1.msra.mxu1 %v537_v57  ;;  %v521_v2 = vld [vmem:[%s5131_s7 + $0x560] sm:$0xff]  ;;  %v632_v3 = vld [vmem:[%s5131_s7 + $0x8d8] sm:$0xff]  ;;  %v514_v5 = vld [vmem:[%s5131_s7 + $0x528] sm:$0xff] }
  0x83   :  { %877 = vmatprep.subr.mxu0 %v648_v58  ;;  %914 = vmatprep.subr.mxu1 %v530_v59  ;;  %v631_v6 = vld [vmem:[%s5131_s7 + $0x8d0] sm:$0xff]  ;;  %v513_v7 = vld [vmem:[%s5131_s7 + $0x520] sm:$0xff]  ;;  %v624_v8 = vld [vmem:[%s5131_s7 + $0x898] sm:$0xff] }
  0x84   :  { %878 = vmatpush2.msra.mxu0 %v647_v60  ;;  %915 = vmatpush1.msra.mxu1 %v529_v61  ;;  %v506_v9 = vld [vmem:[%s5131_s7 + $0x4e8] sm:$0xff]  ;;  %v623_v10 = vld [vmem:[%s5131_s7 + $0x890] sm:$0xff]  ;;  %v505_v11 = vld [vmem:[%s5131_s7 + $0x4e0] sm:$0xff] }
  0x85   :  { %879 = vmatprep.subr.mxu0 %v640_v63  ;;  %916 = vmatprep.subr.mxu1 %v522_v0  ;;  %v616_v12 = vld [vmem:[%s5131_s7 + $0x858] sm:$0xff]  ;;  %v498_v13 = vld [vmem:[%s5131_s7 + $0x4a8] sm:$0xff]  ;;  %v615_v14 = vld [vmem:[%s5131_s7 + $0x850] sm:$0xff] }
  0x86   :  { %880 = vmatpush2.msra.mxu0 %v639_v1  ;;  %917 = vmatpush1.msra.mxu1 %v521_v2  ;;  %v497_v15 = vld [vmem:[%s5131_s7 + $0x4a0] sm:$0xff]  ;;  %v612_v16 = vld [vmem:[%s5131_s7 + $0x838] sm:$0xff]  ;;  %v611_v17 = vld [vmem:[%s5131_s7 + $0x830] sm:$0xff] }
  0x87   :  { %881 = vmatprep.subr.mxu0 %v632_v3  ;;  %918 = vmatprep.subr.mxu1 %v514_v5  ;;  %v490_v18 = vld [vmem:[%s5131_s7 + $0x468] sm:$0xff]  ;;  %v604_v19 = vld [vmem:[%s5131_s7 + $0x7f8] sm:$0xff]  ;;  %v489_v20 = vld [vmem:[%s5131_s7 + $0x460] sm:$0xff] }
  0x88   :  { %882 = vmatpush2.msra.mxu0 %v631_v6  ;;  %919 = vmatpush1.msra.mxu1 %v513_v7  ;;  %v603_v21 = vld [vmem:[%s5131_s7 + $0x7f0] sm:$0xff]  ;;  %v738_v22 = vld [vmem:[%s5131_s7 + $0xc28] sm:$0xff]  ;;  %v596_v23 = vld [vmem:[%s5131_s7 + $0x7b8] sm:$0xff] }
  0x89   :  { %883 = vmatprep.subr.mxu0 %v624_v8  ;;  %920 = vmatprep.subr.mxu1 %v506_v9  ;;  %v737_v24 = vld [vmem:[%s5131_s7 + $0xc20] sm:$0xff]  ;;  %v595_v25 = vld [vmem:[%s5131_s7 + $0x7b0] sm:$0xff]  ;;  %v730_v26 = vld [vmem:[%s5131_s7 + $0xbe8] sm:$0xff] }
  0x8a   :  { %884 = vmatpush2.msra.mxu0 %v623_v10  ;;  %921 = vmatpush1.msra.mxu1 %v505_v11  ;;  %v588_v27 = vld [vmem:[%s5131_s7 + $0x778] sm:$0xff]  ;;  %v729_v28 = vld [vmem:[%s5131_s7 + $0xbe0] sm:$0xff]  ;;  %v587_v29 = vld [vmem:[%s5131_s7 + $0x770] sm:$0xff] }
  0x8b   :  { %885 = vmatprep.subr.mxu0 %v616_v12  ;;  %922 = vmatprep.subr.mxu1 %v498_v13  ;;  %v722_v30 = vld [vmem:[%s5131_s7 + $0xba8] sm:$0xff]  ;;  %v580_v31 = vld [vmem:[%s5131_s7 + $0x738] sm:$0xff]  ;;  %v721_v32 = vld [vmem:[%s5131_s7 + $0xba0] sm:$0xff] }
  0x8c   :  { %886 = vmatpush2.msra.mxu0 %v615_v14  ;;  %923 = vmatpush1.msra.mxu1 %v497_v15  ;;  %v579_v33 = vld [vmem:[%s5131_s7 + $0x730] sm:$0xff]  ;;  %v714_v34 = vld [vmem:[%s5131_s7 + $0xb68] sm:$0xff]  ;;  %v572_v35 = vld [vmem:[%s5131_s7 + $0x6f8] sm:$0xff] }
  0x8d   :  { %965 = vmatprep.subr.mxu0 %v612_v16  ;;  %888 = vmatmul.mubr.f32.vlgmr.msra.gmra.mxu0 %v3911_v55  ;;  %v713_v36 = vld [vmem:[%s5131_s7 + $0xb60] sm:$0xff]  ;;  %v571_v37 = vld [vmem:[%s5131_s7 + $0x6f0] sm:$0xff]  ;;  %v706_v38 = vld [vmem:[%s5131_s7 + $0xb28] sm:$0xff] }
  0x8e   :  { %966 = vmatpush1.msra.mxu0 %v611_v17  ;;  %924 = vmatprep.subr.mxu1 %v490_v18  ;;  %v564_v39 = vld [vmem:[%s5131_s7 + $0x6b8] sm:$0xff]  ;;  %v705_v40 = vld [vmem:[%s5131_s7 + $0xb20] sm:$0xff]  ;;  %v563_v41 = vld [vmem:[%s5131_s7 + $0x6b0] sm:$0xff] }
  0x8f   :  { %967 = vmatprep.subr.mxu0 %v604_v19  ;;  %925 = vmatpush1.msra.mxu1 %v489_v20  ;;  %v698_v42 = vld [vmem:[%s5131_s7 + $0xae8] sm:$0xff]  ;;  %v556_v43 = vld [vmem:[%s5131_s7 + $0x678] sm:$0xff]  ;;  %v697_v44 = vld [vmem:[%s5131_s7 + $0xae0] sm:$0xff] }
  0x90   :  { %968 = vmatpush1.msra.mxu0 %v603_v21  ;;  %926 = vmatprep.subr.mxu1 %v738_v22  ;;  %v555_v45 = vld [vmem:[%s5131_s7 + $0x670] sm:$0xff]  ;;  %v690_v46 = vld [vmem:[%s5131_s7 + $0xaa8] sm:$0xff]  ;;  %v548_v47 = vld [vmem:[%s5131_s7 + $0x638] sm:$0xff] }
  0x91   :  { %969 = vmatprep.subr.mxu0 %v596_v23  ;;  %927 = vmatpush2.msra.mxu1 %v737_v24  ;;  %v689_v48 = vld [vmem:[%s5131_s7 + $0xaa0] sm:$0xff]  ;;  %v547_v49 = vld [vmem:[%s5131_s7 + $0x630] sm:$0xff]  ;;  %v682_v50 = vld [vmem:[%s5131_s7 + $0xa68] sm:$0xff] }
  0x92   :  { %970 = vmatpush1.msra.mxu0 %v595_v25  ;;  %928 = vmatprep.subr.mxu1 %v730_v26  ;;  %v540_v51 = vld [vmem:[%s5131_s7 + $0x5f8] sm:$0xff]  ;;  %v681_v52 = vld [vmem:[%s5131_s7 + $0xa60] sm:$0xff]  ;;  %v539_v53 = vld [vmem:[%s5131_s7 + $0x5f0] sm:$0xff] }
  0x93   :  { %971 = vmatprep.subr.mxu0 %v588_v27  ;;  %929 = vmatpush2.msra.mxu1 %v729_v28  ;;  %v674_v54 = vld [vmem:[%s5131_s7 + $0xa28] sm:$0xff]  ;;  %v532_v56 = vld [vmem:[%s5131_s7 + $0x5b8] sm:$0xff]  ;;  %v673_v57 = vld [vmem:[%s5131_s7 + $0xa20] sm:$0xff] }
  0x94   :  { %972 = vmatpush1.msra.mxu0 %v587_v29  ;;  %930 = vmatprep.subr.mxu1 %v722_v30  ;;  %v531_v58 = vld [vmem:[%s5131_s7 + $0x5b0] sm:$0xff]  ;;  %v666_v59 = vld [vmem:[%s5131_s7 + $0x9e8] sm:$0xff]  ;;  %v524_v60 = vld [vmem:[%s5131_s7 + $0x578] sm:$0xff] }
  0x95   :  { %973 = vmatprep.subr.mxu0 %v580_v31  ;;  %931 = vmatpush2.msra.mxu1 %v721_v32  ;;  %v665_v61 = vld [vmem:[%s5131_s7 + $0x9e0] sm:$0xff]  ;;  %v523_v63 = vld [vmem:[%s5131_s7 + $0x570] sm:$0xff]  ;;  %v658_v0 = vld [vmem:[%s5131_s7 + $0x9a8] sm:$0xff] }
  0x96   :  { %974 = vmatpush1.msra.mxu0 %v579_v33  ;;  %932 = vmatprep.subr.mxu1 %v714_v34  ;;  %v516_v1 = vld [vmem:[%s5131_s7 + $0x538] sm:$0xff]  ;;  %v657_v2 = vld [vmem:[%s5131_s7 + $0x9a0] sm:$0xff]  ;;  %v515_v3 = vld [vmem:[%s5131_s7 + $0x530] sm:$0xff] }
  0x97   :  { %975 = vmatprep.subr.mxu0 %v572_v35  ;;  %933 = vmatpush2.msra.mxu1 %v713_v36  ;;  %v650_v5 = vld [vmem:[%s5131_s7 + $0x968] sm:$0xff]  ;;  %v508_v6 = vld [vmem:[%s5131_s7 + $0x4f8] sm:$0xff]  ;;  %v649_v7 = vld [vmem:[%s5131_s7 + $0x960] sm:$0xff] }
  0x98   :  { %976 = vmatpush1.msra.mxu0 %v571_v37  ;;  %934 = vmatprep.subr.mxu1 %v706_v38  ;;  %v507_v8 = vld [vmem:[%s5131_s7 + $0x4f0] sm:$0xff]  ;;  %v500_v9 = vld [vmem:[%s5131_s7 + $0x4b8] sm:$0xff]  ;;  %v642_v10 = vld [vmem:[%s5131_s7 + $0x928] sm:$0xff] }
  0x99   :  { %977 = vmatprep.subr.mxu0 %v564_v39  ;;  %935 = vmatpush2.msra.mxu1 %v705_v40  ;;  %v499_v11 = vld [vmem:[%s5131_s7 + $0x4b0] sm:$0xff]  ;;  %v641_v12 = vld [vmem:[%s5131_s7 + $0x920] sm:$0xff]  ;;  %v492_v13 = vld [vmem:[%s5131_s7 + $0x478] sm:$0xff] }
  0x9a   :  { %978 = vmatpush1.msra.mxu0 %v563_v41  ;;  %936 = vmatprep.subr.mxu1 %v698_v42  ;;  %v634_v14 = vld [vmem:[%s5131_s7 + $0x8e8] sm:$0xff]  ;;  %v491_v15 = vld [vmem:[%s5131_s7 + $0x470] sm:$0xff]  ;;  %v633_v16 = vld [vmem:[%s5131_s7 + $0x8e0] sm:$0xff] }
  0x9b   :  { %979 = vmatprep.subr.mxu0 %v556_v43  ;;  %937 = vmatpush2.msra.mxu1 %v697_v44  ;;  %v740_v17 = vld [vmem:[%s5131_s7 + $0xc38] sm:$0xff]  ;;  %v626_v18 = vld [vmem:[%s5131_s7 + $0x8a8] sm:$0xff]  ;;  %v739_v19 = vld [vmem:[%s5131_s7 + $0xc30] sm:$0xff] }
  0x9c   :  { %980 = vmatpush1.msra.mxu0 %v555_v45  ;;  %938 = vmatprep.subr.mxu1 %v690_v46  ;;  %v625_v20 = vld [vmem:[%s5131_s7 + $0x8a0] sm:$0xff]  ;;  %v732_v21 = vld [vmem:[%s5131_s7 + $0xbf8] sm:$0xff]  ;;  %v618_v22 = vld [vmem:[%s5131_s7 + $0x868] sm:$0xff] }
  0x9d   :  { %981 = vmatprep.subr.mxu0 %v548_v47  ;;  %939 = vmatpush2.msra.mxu1 %v689_v48  ;;  %v731_v23 = vld [vmem:[%s5131_s7 + $0xbf0] sm:$0xff]  ;;  %v617_v24 = vld [vmem:[%s5131_s7 + $0x860] sm:$0xff]  ;;  %v724_v25 = vld [vmem:[%s5131_s7 + $0xbb8] sm:$0xff] }
  0x9e   :  { %982 = vmatpush1.msra.mxu0 %v547_v49  ;;  %940 = vmatprep.subr.mxu1 %v682_v50  ;;  %v723_v26 = vld [vmem:[%s5131_s7 + $0xbb0] sm:$0xff]  ;;  %v716_v27 = vld [vmem:[%s5131_s7 + $0xb78] sm:$0xff]  ;;  %v481_v33 = vld [vmem:[%s5131_s7 + $0x428] sm:$0xff] }
  0x9f   :  { %983 = vmatprep.subr.mxu0 %v540_v51  ;;  %941 = vmatpush2.msra.mxu1 %v681_v52  ;;  %v479_v28 = vld [vmem:[%s5131_s7 + $0x418] sm:$0xff]  ;;  %v715_v29 = vld [vmem:[%s5131_s7 + $0xb70] sm:$0xff]  ;;  %v4419_v35 = vld [vmem:[%s5125_s1] sm:$0x3] }
  0xa0   :  { %984 = vmatpush1.msra.mxu0 %v539_v53  ;;  %942 = vmatprep.subr.mxu1 %v674_v54  ;;  %v478_v30 = vld [vmem:[%s5131_s7 + $0x410] sm:$0xff]  ;;  %v708_v31 = vld [vmem:[%s5131_s7 + $0xb38] sm:$0xff]  ;;  %v480_v36 = vld [vmem:[%s5131_s7 + $0x420] sm:$0xff] }
  0xa1   :  { %985 = vmatprep.subr.mxu0 %v532_v56  ;;  %943 = vmatpush2.msra.mxu1 %v673_v57  ;;  %v707_v32 = vld [vmem:[%s5131_s7 + $0xb30] sm:$0xff]  ;;  %v692_v37 = vld [vmem:[%s5131_s7 + $0xab8] sm:$0xff]  ;;  %v1399_v46 = vld [vmem:[%s5131_s7 + $0xc8] sm:$0xff] }
  0xa2   :  { %986 = vmatpush1.msra.mxu0 %v531_v58  ;;  %944 = vmatprep.subr.mxu1 %v666_v59  ;;  %v699_v34 = vld [vmem:[%s5131_s7 + $0xaf0] sm:$0xff]  ;;  %v684_v39 = vld [vmem:[%s5131_s7 + $0xa78] sm:$0xff]  ;;  %v1398_v48 = vld [vmem:[%s5131_s7 + $0xc0] sm:$0xff] }
  0xa3   :  { %987 = vmatprep.subr.mxu0 %v524_v60  ;;  %945 = vmatpush2.msra.mxu1 %v665_v61  ;;  %v691_v38 = vld [vmem:[%s5131_s7 + $0xab0] sm:$0xff]  ;;  %v483_v40 = vld [vmem:[%s5131_s7 + $0x438] sm:$0xff]  ;;  %v1391_v50 = vld [vmem:[%s5131_s7 + $0x88] sm:$0xff] }
  0xa4   :  { %988 = vmatpush1.msra.mxu0 %v523_v63  ;;  %946 = vmatprep.subr.mxu1 %v658_v0  ;;  %v683_v41 = vld [vmem:[%s5131_s7 + $0xa70] sm:$0xff]  ;;  %v676_v43 = vld [vmem:[%s5131_s7 + $0xa38] sm:$0xff]  ;;  %v1390_v52 = vld [vmem:[%s5131_s7 + $0x80] sm:$0xff] }
  0xa5   :  { %989 = vmatprep.subr.mxu0 %v516_v1  ;;  %947 = vmatpush2.msra.mxu1 %v657_v2  ;;  %v482_v42 = vld [vmem:[%s5131_s7 + $0x430] sm:$0xff]  ;;  %v668_v45 = vld [vmem:[%s5131_s7 + $0x9f8] sm:$0xff]  ;;  %v1383_v54 = vld [vmem:[%s5131_s7 + $0x48] sm:$0xff] }
  0xa6   :  { %990 = vmatpush1.msra.mxu0 %v515_v3  ;;  %948 = vmatprep.subr.mxu1 %v650_v5  ;;  %v675_v44 = vld [vmem:[%s5131_s7 + $0xa30] sm:$0xff]  ;;  %v660_v49 = vld [vmem:[%s5131_s7 + $0x9b8] sm:$0xff]  ;;  %v1382_v57 = vld [vmem:[%s5131_s7 + $0x40] sm:$0xff] }
  0xa7   :  { %991 = vmatprep.subr.mxu0 %v508_v6  ;;  %949 = vmatpush2.msra.mxu1 %v649_v7  ;;  %v667_v47 = vld [vmem:[%s5131_s7 + $0x9f0] sm:$0xff]  ;;  %v652_v53 = vld [vmem:[%s5131_s7 + $0x978] sm:$0xff]  ;;  %v1375_v59 = vld [vmem:[%s5131_s7 + $0x8] sm:$0xff] }
  0xa8   :  { %992 = vmatpush1.msra.mxu0 %v507_v8  ;;  %1029 = vmatprep.mubr.f32.mxu0 %v3933_v62  ;;  %v659_v51 = vld [vmem:[%s5131_s7 + $0x9b0] sm:$0xff]  ;;  %v644_v58 = vld [vmem:[%s5131_s7 + $0x938] sm:$0xff]  ;;  %v1374_v61 = vld [vmem:[%s5131_s7] sm:$0xff] }
  0xa9   :  { %993 = vmatprep.subr.mxu0 %v500_v9  ;;  %950 = vmatprep.subr.mxu1 %v642_v10  ;;  %v651_v56 = vld [vmem:[%s5131_s7 + $0x970] sm:$0xff]  ;;  %v636_v63 = vld [vmem:[%s5131_s7 + $0x8f8] sm:$0xff]  ;;  %v1403_v1 = vld [vmem:[%s5131_s7 + $0xe8] sm:$0xff] }
  0xaa   :  { %994 = vmatpush1.msra.mxu0 %v499_v11  ;;  %951 = vmatpush2.msra.mxu1 %v641_v12  ;;  %v643_v60 = vld [vmem:[%s5131_s7 + $0x930] sm:$0xff]  ;;  %v628_v2 = vld [vmem:[%s5131_s7 + $0x8b8] sm:$0xff]  ;;  %v477_v7 = vld [vmem:[%s5131_s7 + $0x408] sm:$0xff] }
  0xab   :  { %995 = vmatprep.subr.mxu0 %v492_v13  ;;  %952 = vmatprep.subr.mxu1 %v634_v14  ;;  %v635_v0 = vld [vmem:[%s5131_s7 + $0x8f0] sm:$0xff]  ;;  %v620_v5 = vld [vmem:[%s5131_s7 + $0x878] sm:$0xff]  ;;  %v476_v8 = vld [vmem:[%s5131_s7 + $0x400] sm:$0xff] }
  0xac   :  { %996 = vmatpush1.msra.mxu0 %v491_v15  ;;  %953 = vmatpush2.msra.mxu1 %v633_v16  ;;  %v627_v3 = vld [vmem:[%s5131_s7 + $0x8b0] sm:$0xff]  ;;  %v1401_v9 = vld [vmem:[%s5131_s7 + $0xd8] sm:$0xff] }
  0xad   :  { %997 = vmatprep.subr.mxu0 %v740_v17  ;;  %954 = vmatprep.subr.mxu1 %v626_v18  ;;  %v619_v6 = vld [vmem:[%s5131_s7 + $0x870] sm:$0xff]  ;;  %v1393_v11 = vld [vmem:[%s5131_s7 + $0x98] sm:$0xff] }
  0xae   :  { %998 = vmatpush2.msra.mxu0 %v739_v19  ;;  %955 = vmatpush2.msra.mxu1 %v625_v20  ;;  %v1400_v10 = vld [vmem:[%s5131_s7 + $0xd0] sm:$0xff]  ;;  %v1385_v12 = vld [vmem:[%s5131_s7 + $0x58] sm:$0xff] }
  0xaf   :  { %999 = vmatprep.subr.mxu0 %v732_v21  ;;  %956 = vmatprep.subr.mxu1 %v618_v22  ;;  %v1384_v13 = vld [vmem:[%s5131_s7 + $0x50] sm:$0xff]  ;;  %v1377_v14 = vld [vmem:[%s5131_s7 + $0x18] sm:$0xff] }
  0xb0   :  { %1000 = vmatpush2.msra.mxu0 %v731_v23  ;;  %957 = vmatpush2.msra.mxu1 %v617_v24  ;;  %v1376_v15 = vld [vmem:[%s5131_s7 + $0x10] sm:$0xff]  ;;  %v1405_v16 = vld [vmem:[%s5131_s7 + $0xf8] sm:$0xff] }
  0xb1   :  { %1001 = vmatprep.subr.mxu0 %v724_v25  ;;  %958 = vmatprep.mubr.f32.mxu1 %v3933_v62  ;;  %v700_v62 = vld [vmem:[%s5131_s7 + $0xaf8] sm:$0xff] }
  0xb2   :  { %1002 = vmatpush2.msra.mxu0 %v723_v26  ;;  %959 = vmatmul.mubr.f32.vlgmr.msra.gmra.mxu1 %v3911_v55 }
  0xb3   :  { %1003 = vmatprep.subr.mxu0 %v716_v27  ;;  %1141 = vmatprep.subr.mxu1 %v479_v28 }
  0xb4   :  { %1004 = vmatpush2.msra.mxu0 %v715_v29  ;;  %1142 = vmatpush1.msra.mxu1 %v478_v30 }
  0xb5   :  { %1005 = vmatprep.subr.mxu0 %v708_v31  ;;  %1175 = vmatprep.mubr.f32.mxu1 %v3279_v4 }
  0xb6   :  { %1006 = vmatpush2.msra.mxu0 %v707_v32  ;;  %2978 = vmatmul.mubr.msk.f32.vlgmr.msra.gmra.mxu1 %vm1036_vm2, %v4419_v35 }
  0xb7   :  { %1007 = vmatprep.subr.mxu0 %v700_v62  ;;  %1212 = vmatprep.subr.mxu1 %v481_v33 }
  0xb8   :  { %1008 = vmatpush2.msra.mxu0 %v699_v34  ;;  %1213 = vmatpush1.msra.mxu1 %v480_v36 }
  0xb9   :  { %1009 = vmatprep.subr.mxu0 %v692_v37  ;;  %1246 = vmatprep.mubr.f32.mxu1 %v3279_v4 }
  0xba   :  { %1010 = vmatpush2.msra.mxu0 %v691_v38  ;;  %2979 = vmatmul.mubr.msk.f32.vlgmr.msra.gmra.mxu1 %vm1036_vm2, %v4419_v35 }
  0xbb   :  { %1011 = vmatprep.subr.mxu0 %v684_v39  ;;  %1283 = vmatprep.subr.mxu1 %v483_v40 }
  0xbc   :  { %1012 = vmatpush2.msra.mxu0 %v683_v41  ;;  %1284 = vmatpush1.msra.mxu1 %v482_v42 }
  0xbd   :  { %1013 = vmatprep.subr.mxu0 %v676_v43  ;;  %1317 = vmatprep.mubr.f32.mxu1 %v3279_v4 }
  0xbe   :  { %1014 = vmatpush2.msra.mxu0 %v675_v44  ;;  %2980 = vmatmul.mubr.msk.f32.vlgmr.msra.gmra.mxu1 %vm1036_vm2, %v4419_v35 }
  0xbf   :  { %1015 = vmatprep.subr.mxu0 %v668_v45  ;;  %1433 = vmatprep.subr.mxu1 %v1399_v46 }
  0xc0   :  { %1016 = vmatpush2.msra.mxu0 %v667_v47  ;;  %1434 = vmatpush1.msra.mxu1 %v1398_v48 }
  0xc1   :  { %1017 = vmatprep.subr.mxu0 %v660_v49  ;;  %1435 = vmatprep.subr.mxu1 %v1391_v50  ;;  %v461_v50 = vlaneseq }
  0xc2   :  { %1018 = vmatpush2.msra.mxu0 %v659_v51  ;;  %1436 = vmatpush1.msra.mxu1 %v1390_v52  ;;  %v453_v52 = vld [vmem:[%s5129_s5] sm:$0x1] }
  0xc3   :  { %1019 = vmatprep.subr.mxu0 %v652_v53  ;;  %1437 = vmatprep.subr.mxu1 %v1383_v54  ;;  %v4567_v51 = vshrl.u32 %v461_v50, 7  ;;  %v2052_v50 = vld [vmem:[%s5131_s7 + $0x2c0] sm:$0xff] }
  0xc4   :  { %1020 = vmatpush2.msra.mxu0 %v651_v56  ;;  %1438 = vmatpush1.msra.mxu1 %v1382_v57  ;;  %v457_v57 = vld [vmem:[%s5130_s6] sm:$0x1] }
  0xc5   :  { %1021 = vmatprep.subr.mxu0 %v644_v58  ;;  %1439 = vmatprep.subr.mxu1 %v1375_v59  ;;  %v4573_v53 = vsub.s32 0, %v4567_v51 }
  0xc6   :  { %1022 = vmatpush2.msra.mxu0 %v643_v60  ;;  %1440 = vmatpush1.msra.mxu1 %v1374_v61 }
  0xc7   :  { %1023 = vmatprep.subr.mxu0 %v636_v63  ;;  %1473 = vmatprep.mubr.f32.mxu1 %v3279_v4 }
  0xc8   :  { %1024 = vmatpush2.msra.mxu0 %v635_v0  ;;  %1575 = vmatprep.subr.mxu1 %v1403_v1 }
  0xc9   :  { %1025 = vmatprep.subr.mxu0 %v628_v2  ;;  %v1402_v2 = vld [vmem:[%s5131_s7 + $0xe0] sm:$0xff] }
  0xca   :  { %1026 = vmatpush2.msra.mxu0 %v627_v3  ;;  %v1404_v3 = vld [vmem:[%s5131_s7 + $0xf0] sm:$0xff] }
  0xcb   :  { %1027 = vmatprep.subr.mxu0 %v620_v5  ;;  %v1395_v5 = vld [vmem:[%s5131_s7 + $0xa8] sm:$0xff] }
  0xcc   :  { %1028 = vmatpush2.msra.mxu0 %v619_v6  ;;  %v1397_v6 = vld [vmem:[%s5131_s7 + $0xb8] sm:$0xff] }
  0xcd   :  { %1030 = vmatmul.mubr.f32.vlgmr.msra.gmra.mxu0 %v3911_v55  ;;  %1070 = vmatprep.subr.mxu0 %v477_v7  ;;  %v1392_v55 = vld [vmem:[%s5131_s7 + $0x90] sm:$0xff]  ;;  %v1394_v7 = vld [vmem:[%s5131_s7 + $0xa0] sm:$0xff] }
  0xce   :  { %1071 = vmatpush1.msra.mxu0 %v476_v8  ;;  %1104 = vmatprep.mubr.f32.mxu0 %v3279_v4  ;;  %v1396_v8 = vld [vmem:[%s5131_s7 + $0xb0] sm:$0xff] }
  0xcf   :  { %1504 = vmatprep.subr.mxu0 %v1401_v9  ;;  %v1387_v9 = vld [vmem:[%s5131_s7 + $0x68] sm:$0xff] }
  0xd1   :  { %2977 = vmatmul.mubr.msk.f32.vlgmr.msra.gmra.mxu0 %vm1036_vm2, %v4419_v35 }
  0xd2   :  { %1505 = vmatpush1.msra.mxu0 %v1400_v10  ;;  %1544 = vmatprep.mubr.f32.mxu0 %v3279_v4  ;;  %v1389_v10 = vld [vmem:[%s5131_s7 + $0x78] sm:$0xff] }
  0xd3   :  { %1506 = vmatprep.subr.mxu0 %v1393_v11  ;;  %v1386_v11 = vld [vmem:[%s5131_s7 + $0x60] sm:$0xff] }
  0xd4   :  { %1507 = vmatpush1.msra.mxu0 %v1392_v55  ;;  %v1388_v55 = vld [vmem:[%s5131_s7 + $0x70] sm:$0xff] }
  0xd5   :  { %1508 = vmatprep.subr.mxu0 %v1385_v12  ;;  %v1379_v12 = vld [vmem:[%s5131_s7 + $0x28] sm:$0xff] }
  0xd6   :  { %1509 = vmatpush1.msra.mxu0 %v1384_v13  ;;  %v1381_v13 = vld [vmem:[%s5131_s7 + $0x38] sm:$0xff] }
  0xd7   :  { %1510 = vmatprep.subr.mxu0 %v1377_v14  ;;  %v1378_v14 = vld [vmem:[%s5131_s7 + $0x20] sm:$0xff] }
  0xd8   :  { %1511 = vmatpush1.msra.mxu0 %v1376_v15  ;;  %v1380_v15 = vld [vmem:[%s5131_s7 + $0x30] sm:$0xff] }
  0xd9   :  { %1646 = vmatprep.subr.mxu0 %v1405_v16  ;;  %v1726_v16 = vld [vmem:[%s5131_s7 + $0x1c8] sm:$0xff] }
  0xe4   :  { %v3039_v17 = vpop.f32.mrf.mxu0 }
  0xe5   :  { %v3074_v18 = vpop.f32.mrf.mxu1 }
  0xe6   :  { %v3040_v19 = vpop.f32.mrf.mxu0 }
  0xe7   :  { %v3075_v20 = vpop.f32.mrf.mxu1  ;;  %v3041_v22 = vadd.f32 %v3040_v19, %v3039_v17  ;;  %v1728_v17 = vld [vmem:[%s5131_s7 + $0x1d8] sm:$0xff]  ;;  %v1727_v19 = vld [vmem:[%s5131_s7 + $0x1d0] sm:$0xff] }
  0xe8   :  { %v3076_v23 = vadd.f32 %v3075_v20, %v3074_v18  ;;  %v1725_v18 = vld [vmem:[%s5131_s7 + $0x1c0] sm:$0xff]  ;;  %v1718_v20 = vld [vmem:[%s5131_s7 + $0x188] sm:$0xff] }
  0xea   :  { %v291_v26 = vadd.f32 %v3076_v23, %v3041_v22  ;;  %v1717_v22 = vld [vmem:[%s5131_s7 + $0x180] sm:$0xff]  ;;  %v1719_v23 = vld [vmem:[%s5131_s7 + $0x190] sm:$0xff] }
 0x105   :  { %v3109_v21 = vpop.f32.mrf.mxu0 }
 0x107   :  { %v3110_v24 = vpop.f32.mrf.mxu0 }
 0x108   :  { %v3111_v25 = vadd.f32 %v3110_v24, %v3109_v21  ;;  %v1720_v21 = vld [vmem:[%s5131_s7 + $0x198] sm:$0xff]  ;;  %v1710_v24 = vld [vmem:[%s5131_s7 + $0x148] sm:$0xff] }
 0x10a   :  { %v361_v27 = vadd.f32 %v3111_v25, %v291_v26  ;;  %v1712_v25 = vld [vmem:[%s5131_s7 + $0x158] sm:$0xff]  ;;  %v1709_v26 = vld [vmem:[%s5131_s7 + $0x140] sm:$0xff] }
 0x10d   :  { %v430_v28 = vpop.f32.mrf.mxu0 }
 0x10e   :  { %v431_v29 = vadd.f32 %v430_v28, %v361_v27  ;;  %v1711_v27 = vld [vmem:[%s5131_s7 + $0x150] sm:$0xff]  ;;  %v1702_v28 = vld [vmem:[%s5131_s7 + $0x108] sm:$0xff] }
 0x10f   :  { %v3162_v30 = vpop.f32.mrf.mxu0 }
 0x110   :  { %v434_v31 = vsel %vm150_vm1, %v431_v29, 0.0  ;;  %v442_v32 = vmul.f32 %v431_v29, %v431_v29  ;;  %v1701_v30 = vld [vmem:[%s5131_s7 + $0x100] sm:$0xff] }
 0x111   :  { %v435_v62 = vrot.slane %v434_v31, 4 }
 0x112   :  { %v443_v33 = vsel %vm150_vm1, %v442_v32, 0.0 }
 0x113   :  { %v436_v34 = vadd.f32 %v435_v62, %v434_v31  ;;  %v444_v35 = vrot.slane %v443_v33, 4  ;;  %v1703_v31 = vld [vmem:[%s5131_s7 + $0x110] sm:$0xff]  ;;  %v1730_v62 = vld [vmem:[%s5131_s7 + $0x1e8] sm:$0xff] }
 0x115   :  { %v437_v36 = vrot.slane %v436_v34, 2  ;;  %v445_v37 = vadd.f32 %v444_v35, %v443_v33  ;;  %v1732_v33 = vld [vmem:[%s5131_s7 + $0x1f8] sm:$0xff]  ;;  %v1731_v35 = vld [vmem:[%s5131_s7 + $0x1f0] sm:$0xff] }
 0x117   :  { %v438_v38 = vadd.f32 %v437_v36, %v436_v34  ;;  %v446_v39 = vrot.slane %v445_v37, 2  ;;  %v1729_v34 = vld [vmem:[%s5131_s7 + $0x1e0] sm:$0xff]  ;;  %v1722_v36 = vld [vmem:[%s5131_s7 + $0x1a8] sm:$0xff] }
 0x119   :  { %v439_v40 = vrot.slane %v438_v38, 1  ;;  %v447_v41 = vadd.f32 %v446_v39, %v445_v37  ;;  %v1724_v37 = vld [vmem:[%s5131_s7 + $0x1b8] sm:$0xff]  ;;  %v1723_v39 = vld [vmem:[%s5131_s7 + $0x1b0] sm:$0xff] }
 0x11b   :  { %v440_v42 = vadd.f32 %v439_v40, %v438_v38  ;;  %v448_v43 = vrot.slane %v447_v41, 1  ;;  %v1721_v38 = vld [vmem:[%s5131_s7 + $0x1a0] sm:$0xff]  ;;  %v1714_v40 = vld [vmem:[%s5131_s7 + $0x168] sm:$0xff] }
 0x11d   :  { %v441_v44 = vmul.f32 0.125, %v440_v42  ;;  %v449_v45 = vadd.f32 %v448_v43, %v447_v41  ;;  %v1716_v41 = vld [vmem:[%s5131_s7 + $0x178] sm:$0xff]  ;;  %v1713_v42 = vld [vmem:[%s5131_s7 + $0x160] sm:$0xff]  ;;  %v1715_v43 = vld [vmem:[%s5131_s7 + $0x170] sm:$0xff] }
 0x11f   :  { %v450_v46 = vmul.f32 0.125, %v449_v45  ;;  %v451_v47 = vmul.f32 %v441_v44, %v441_v44  ;;  %v1708_v45 = vld [vmem:[%s5131_s7 + $0x138] sm:$0xff] }
 0x121   :  { %v452_v48 = vsub.f32 %v450_v46, %v451_v47  ;;  %v1705_v46 = vld [vmem:[%s5131_s7 + $0x120] sm:$0xff]  ;;  %v1707_v47 = vld [vmem:[%s5131_s7 + $0x130] sm:$0xff] }
 0x123   :  { %v454_v49 = vadd.f32 1e-05, %v452_v48  ;;  %v2053_v48 = vld [vmem:[%s5131_s7 + $0x2c8] sm:$0xff] }
 0x125   :  { %3174 = vrsqrt.f32 %v454_v49  ;;  %v2055_v49 = vld [vmem:[%s5131_s7 + $0x2d8] sm:$0xff] }
 0x132   :  { %v3175_v54 = vpop.eup %3174 }
 0x133   :  { %v456_v56 = vmul.f32 %v3175_v54, %v453_v52  ;;  %v2054_v52 = vld [vmem:[%s5131_s7 + $0x2d0] sm:$0xff]  ;;  %v2045_v54 = vld [vmem:[%s5131_s7 + $0x288] sm:$0xff] }
 0x135   :  { %v458_v58 = vmul.f32 %v456_v56, %v441_v44  ;;  %v464_v59 = vrot.slane %v456_v56, %v4573_v53  ;;  %v1706_v44 = vld [vmem:[%s5131_s7 + $0x128] sm:$0xff]  ;;  %v2047_v56 = vld [vmem:[%s5131_s7 + $0x298] sm:$0xff] }
 0x137   :  { %v459_v60 = vsub.f32 %v457_v57, %v458_v58  ;;  %v466_v61 = vmul.f32 %v464_v59, %v431_v29  ;;  %v1704_v29 = vld [vmem:[%s5131_s7 + $0x118] sm:$0xff]  ;;  %v2044_v57 = vld [vmem:[%s5131_s7 + $0x280] sm:$0xff]  ;;  %v2046_v58 = vld [vmem:[%s5131_s7 + $0x290] sm:$0xff] }
 0x138   :  { %v2037_v59 = vld [vmem:[%s5131_s7 + $0x248] sm:$0xff] }
 0x139   :  { %v471_v63 = vrot.slane %v459_v60, %v4573_v53  ;;  %v2039_v60 = vld [vmem:[%s5131_s7 + $0x258] sm:$0xff] }
 0x13b   :  { %v473_v0 = vadd.f32 %v471_v63, %v466_v61  ;;  %v2036_v61 = vld [vmem:[%s5131_s7 + $0x240] sm:$0xff]  ;;  %v2038_v63 = vld [vmem:[%s5131_s7 + $0x250] sm:$0xff] }
 0x13d   :  { %v4580_v1 = vmax.f32 %v473_v0, 0.0  ;;  %v2029_v0 = vld [vmem:[%s5131_s7 + $0x208] sm:$0xff] }
 0x13f   :  { %2981 = vmatmul.mubr.msk.f32.vlgmr.msra.gmra.mxu1 %vm150_vm1, %v4580_v1  ;;  %2982 = vmatmul.mubr.msk.f32.vlgmr.msra.gmra.mxu0 %vm150_vm1, %v4580_v1  ;;  %v1733_v32 = vrot.slane %v4580_v1, 2 }
 0x140   :  { %1576 = vmatpush1.msra.mxu1 %v1402_v2  ;;  %1647 = vmatpush1.msra.mxu0 %v1404_v3  ;;  %v2031_v2 = vld [vmem:[%s5131_s7 + $0x218] sm:$0xff]  ;;  %v2028_v3 = vld [vmem:[%s5131_s7 + $0x200] sm:$0xff] }
 0x141   :  { %1577 = vmatprep.subr.mxu1 %v1395_v5  ;;  %1648 = vmatprep.subr.mxu0 %v1397_v6  ;;  %v2030_v5 = vld [vmem:[%s5131_s7 + $0x210] sm:$0xff]  ;;  %v2060_v6 = vrot.slane %v4580_v1, 4 }
 0x142   :  { %1578 = vmatpush1.msra.mxu1 %v1394_v7  ;;  %1649 = vmatpush1.msra.mxu0 %v1396_v8  ;;  %v2057_v7 = vld [vmem:[%s5131_s7 + $0x2e8] sm:$0xff]  ;;  %v2059_v8 = vld [vmem:[%s5131_s7 + $0x2f8] sm:$0xff] }
 0x143   :  { %1579 = vmatprep.subr.mxu1 %v1387_v9  ;;  %1650 = vmatprep.subr.mxu0 %v1389_v10  ;;  %v2056_v9 = vld [vmem:[%s5131_s7 + $0x2e0] sm:$0xff]  ;;  %v2058_v10 = vld [vmem:[%s5131_s7 + $0x2f0] sm:$0xff] }
 0x144   :  { %1580 = vmatpush1.msra.mxu1 %v1386_v11  ;;  %1651 = vmatpush1.msra.mxu0 %v1388_v55  ;;  %v2049_v11 = vld [vmem:[%s5131_s7 + $0x2a8] sm:$0xff]  ;;  %v2051_v55 = vld [vmem:[%s5131_s7 + $0x2b8] sm:$0xff] }
 0x145   :  { %1581 = vmatprep.subr.mxu1 %v1379_v12  ;;  %1652 = vmatprep.subr.mxu0 %v1381_v13  ;;  %v2048_v12 = vld [vmem:[%s5131_s7 + $0x2a0] sm:$0xff]  ;;  %v2050_v13 = vld [vmem:[%s5131_s7 + $0x2b0] sm:$0xff] }
 0x146   :  { %1582 = vmatpush1.msra.mxu1 %v1378_v14  ;;  %1615 = vmatprep.mubr.f32.mxu1 %v3279_v4  ;;  %v2041_v14 = vld [vmem:[%s5131_s7 + $0x268] sm:$0xff] }
 0x147   :  { %1653 = vmatpush1.msra.mxu0 %v1380_v15  ;;  %1686 = vmatprep.mubr.f32.mxu0 %v3279_v4  ;;  %v2043_v15 = vld [vmem:[%s5131_s7 + $0x278] sm:$0xff] }
 0x148   :  { %2983 = vmatmul.mubr.msk.f32.vlgmr.msra.gmra.mxu1 %vm150_vm1, %v4580_v1  ;;  %2984 = vmatmul.mubr.msk.f32.vlgmr.msra.gmra.mxu0 %vm150_vm1, %v4580_v1 }
 0x149   :  { %1760 = vmatprep.subr.mxu1 %v1726_v16  ;;  %1831 = vmatprep.subr.mxu0 %v1728_v17  ;;  %v2040_v16 = vld [vmem:[%s5131_s7 + $0x260] sm:$0xff]  ;;  %v2042_v17 = vld [vmem:[%s5131_s7 + $0x270] sm:$0xff] }
 0x14a   :  { %1761 = vmatpush1.msra.mxu1 %v1725_v18  ;;  %1832 = vmatpush1.msra.mxu0 %v1727_v19  ;;  %v2033_v18 = vld [vmem:[%s5131_s7 + $0x228] sm:$0xff]  ;;  %v2035_v19 = vld [vmem:[%s5131_s7 + $0x238] sm:$0xff] }
 0x14b   :  { %1762 = vmatprep.subr.mxu1 %v1718_v20  ;;  %1833 = vmatprep.subr.mxu0 %v1720_v21  ;;  %v2032_v20 = vld [vmem:[%s5131_s7 + $0x220] sm:$0xff]  ;;  %v2034_v21 = vld [vmem:[%s5131_s7 + $0x230] sm:$0xff] }
 0x14c   :  { %1763 = vmatpush1.msra.mxu1 %v1717_v22  ;;  %1834 = vmatpush1.msra.mxu0 %v1719_v23  ;;  %v2380_v22 = vld [vmem:[%s5131_s7 + $0x3c8] sm:$0xff]  ;;  %v2382_v23 = vld [vmem:[%s5131_s7 + $0x3d8] sm:$0xff] }
 0x14d   :  { %1764 = vmatprep.subr.mxu1 %v1710_v24  ;;  %1835 = vmatprep.subr.mxu0 %v1712_v25  ;;  %v2379_v24 = vld [vmem:[%s5131_s7 + $0x3c0] sm:$0xff]  ;;  %v2381_v25 = vld [vmem:[%s5131_s7 + $0x3d0] sm:$0xff] }
 0x14e   :  { %1765 = vmatpush1.msra.mxu1 %v1709_v26  ;;  %1836 = vmatpush1.msra.mxu0 %v1711_v27  ;;  %v2372_v26 = vld [vmem:[%s5131_s7 + $0x388] sm:$0xff]  ;;  %v2374_v27 = vld [vmem:[%s5131_s7 + $0x398] sm:$0xff] }
 0x14f   :  { %1766 = vmatprep.subr.mxu1 %v1702_v28  ;;  %1837 = vmatprep.subr.mxu0 %v1704_v29  ;;  %v2371_v28 = vld [vmem:[%s5131_s7 + $0x380] sm:$0xff]  ;;  %v2373_v29 = vld [vmem:[%s5131_s7 + $0x390] sm:$0xff] }
 0x150   :  { %1767 = vmatpush1.msra.mxu1 %v1701_v30  ;;  %1800 = vmatprep.mubr.f32.mxu1 %v3279_v4  ;;  %v2364_v30 = vld [vmem:[%s5131_s7 + $0x348] sm:$0xff] }
 0x151   :  { %1838 = vmatpush1.msra.mxu0 %v1703_v31  ;;  %1871 = vmatprep.mubr.f32.mxu0 %v3279_v4  ;;  %v2366_v31 = vld [vmem:[%s5131_s7 + $0x358] sm:$0xff] }
 0x152   :  { %2985 = vmatmul.mubr.msk.f32.vlgmr.msra.gmra.mxu1 %vm150_vm1, %v1733_v32  ;;  %2986 = vmatmul.mubr.msk.f32.vlgmr.msra.gmra.mxu0 %vm150_vm1, %v1733_v32 }
 0x153   :  { %1902 = vmatprep.subr.mxu1 %v1730_v62  ;;  %1973 = vmatprep.subr.mxu0 %v1732_v33  ;;  %v2365_v62 = vld [vmem:[%s5131_s7 + $0x350] sm:$0xff]  ;;  %v2356_v33 = vld [vmem:[%s5131_s7 + $0x308] sm:$0xff] }
 0x154   :  { %1903 = vmatpush1.msra.mxu1 %v1729_v34  ;;  %1974 = vmatpush1.msra.mxu0 %v1731_v35  ;;  %v2358_v34 = vld [vmem:[%s5131_s7 + $0x318] sm:$0xff]  ;;  %v2355_v35 = vld [vmem:[%s5131_s7 + $0x300] sm:$0xff] }
 0x155   :  { %1904 = vmatprep.subr.mxu1 %v1722_v36  ;;  %1975 = vmatprep.subr.mxu0 %v1724_v37  ;;  %v2357_v36 = vld [vmem:[%s5131_s7 + $0x310] sm:$0xff]  ;;  %v2387_v37 = vrot.slane %v4580_v1, 6  ;;  %v2376_v1 = vld [vmem:[%s5131_s7 + $0x3a8] sm:$0xff] }
 0x156   :  { %1905 = vmatpush1.msra.mxu1 %v1721_v38  ;;  %1976 = vmatpush1.msra.mxu0 %v1723_v39  ;;  %v2384_v38 = vld [vmem:[%s5131_s7 + $0x3e8] sm:$0xff]  ;;  %v2386_v39 = vld [vmem:[%s5131_s7 + $0x3f8] sm:$0xff] }
 0x157   :  { %1906 = vmatprep.subr.mxu1 %v1714_v40  ;;  %1977 = vmatprep.subr.mxu0 %v1716_v41  ;;  %v2383_v40 = vld [vmem:[%s5131_s7 + $0x3e0] sm:$0xff]  ;;  %v2385_v41 = vld [vmem:[%s5131_s7 + $0x3f0] sm:$0xff] }
 0x158   :  { %1907 = vmatpush1.msra.mxu1 %v1713_v42  ;;  %1978 = vmatpush1.msra.mxu0 %v1715_v43  ;;  %v2378_v42 = vld [vmem:[%s5131_s7 + $0x3b8] sm:$0xff]  ;;  %v2375_v43 = vld [vmem:[%s5131_s7 + $0x3a0] sm:$0xff] }
 0x159   :  { %1908 = vmatprep.subr.mxu1 %v1706_v44  ;;  %1979 = vmatprep.subr.mxu0 %v1708_v45  ;;  %v2377_v44 = vld [vmem:[%s5131_s7 + $0x3b0] sm:$0xff]  ;;  %v2368_v45 = vld [vmem:[%s5131_s7 + $0x368] sm:$0xff] }
 0x15a   :  { %1909 = vmatpush1.msra.mxu1 %v1705_v46  ;;  %1942 = vmatprep.mubr.f32.mxu1 %v3279_v4  ;;  %v2370_v46 = vld [vmem:[%s5131_s7 + $0x378] sm:$0xff] }
 0x15b   :  { %1980 = vmatpush1.msra.mxu0 %v1707_v47  ;;  %2013 = vmatprep.mubr.f32.mxu0 %v3279_v4  ;;  %v2367_v47 = vld [vmem:[%s5131_s7 + $0x360] sm:$0xff] }
 0x15c   :  { %2987 = vmatmul.mubr.msk.f32.vlgmr.msra.gmra.mxu1 %vm150_vm1, %v1733_v32  ;;  %2988 = vmatmul.mubr.msk.f32.vlgmr.msra.gmra.mxu0 %vm150_vm1, %v1733_v32  ;;  %v2363_v32 = vld [vmem:[%s5131_s7 + $0x340] sm:$0xff] }
 0x15d   :  { %2087 = vmatprep.subr.mxu1 %v2053_v48  ;;  %2158 = vmatprep.subr.mxu0 %v2055_v49  ;;  %v2369_v48 = vld [vmem:[%s5131_s7 + $0x370] sm:$0xff]  ;;  %v2360_v49 = vld [vmem:[%s5131_s7 + $0x328] sm:$0xff] }
 0x15e   :  { %2088 = vmatpush1.msra.mxu1 %v2052_v50  ;;  %2159 = vmatpush1.msra.mxu0 %v2054_v52  ;;  %v2362_v50 = vld [vmem:[%s5131_s7 + $0x338] sm:$0xff]  ;;  %v2359_v52 = vld [vmem:[%s5131_s7 + $0x320] sm:$0xff] }
 0x15f   :  { %2089 = vmatprep.subr.mxu1 %v2045_v54  ;;  %2160 = vmatprep.subr.mxu0 %v2047_v56  ;;  %v2361_v54 = vld [vmem:[%s5131_s7 + $0x330] sm:$0xff]  ;;  %v2773_v56 = vld [vmem:[%s5133_s9 + $0xf8] sm:$0xff] }
 0x160   :  { %2090 = vmatpush1.msra.mxu1 %v2044_v57  ;;  %2161 = vmatpush1.msra.mxu0 %v2046_v58  ;;  %v2757_v57 = vld [vmem:[%s5133_s9 + $0x78] sm:$0xff]  ;;  %v2772_v58 = vld [vmem:[%s5133_s9 + $0xf0] sm:$0xff] }
 0x161   :  { %2091 = vmatprep.subr.mxu1 %v2037_v59  ;;  %2162 = vmatprep.subr.mxu0 %v2039_v60  ;;  %v2771_v59 = vld [vmem:[%s5133_s9 + $0xe8] sm:$0xff] }
 0x162   :  { %2092 = vmatpush1.msra.mxu1 %v2036_v61  ;;  %2163 = vmatpush1.msra.mxu0 %v2038_v63  ;;  %v2755_v60 = vld [vmem:[%s5133_s9 + $0x68] sm:$0xff]  ;;  %v2770_v61 = vld [vmem:[%s5133_s9 + $0xe0] sm:$0xff] }
 0x163   :  { %2093 = vmatprep.subr.mxu1 %v2029_v0  ;;  %2164 = vmatprep.subr.mxu0 %v2031_v2  ;;  %v2754_v63 = vld [vmem:[%s5133_s9 + $0x60] sm:$0xff]  ;;  %v2769_v0 = vld [vmem:[%s5133_s9 + $0xd8] sm:$0xff] }
 0x164   :  { %2094 = vmatpush1.msra.mxu1 %v2028_v3  ;;  %2127 = vmatprep.mubr.f32.mxu1 %v3279_v4  ;;  %v2753_v2 = vld [vmem:[%s5133_s9 + $0x58] sm:$0xff]  ;;  %v2768_v3 = vld [vmem:[%s5133_s9 + $0xd0] sm:$0xff] }
 0x165   :  { %2165 = vmatpush1.msra.mxu0 %v2030_v5  ;;  %2198 = vmatprep.mubr.f32.mxu0 %v3279_v4  ;;  %v2752_v5 = vld [vmem:[%s5133_s9 + $0x50] sm:$0xff] }
 0x166   :  { %2989 = vmatmul.mubr.msk.f32.vlgmr.msra.gmra.mxu1 %vm150_vm1, %v2060_v6  ;;  %2990 = vmatmul.mubr.msk.f32.vlgmr.msra.gmra.mxu0 %vm150_vm1, %v2060_v6 }
 0x167   :  { %2229 = vmatprep.subr.mxu1 %v2057_v7  ;;  %2300 = vmatprep.subr.mxu0 %v2059_v8  ;;  %v2751_v7 = vld [vmem:[%s5133_s9 + $0x48] sm:$0xff]  ;;  %v2766_v8 = vld [vmem:[%s5133_s9 + $0xc0] sm:$0xff] }
 0x168   :  { %2230 = vmatpush1.msra.mxu1 %v2056_v9  ;;  %2301 = vmatpush1.msra.mxu0 %v2058_v10  ;;  %v2750_v9 = vld [vmem:[%s5133_s9 + $0x40] sm:$0xff]  ;;  %v2765_v10 = vld [vmem:[%s5133_s9 + $0xb8] sm:$0xff] }
 0x169   :  { %2231 = vmatprep.subr.mxu1 %v2049_v11  ;;  %2302 = vmatprep.subr.mxu0 %v2051_v55  ;;  %v2749_v11 = vld [vmem:[%s5133_s9 + $0x38] sm:$0xff]  ;;  %v2764_v55 = vld [vmem:[%s5133_s9 + $0xb0] sm:$0xff] }
 0x16a   :  { %2232 = vmatpush1.msra.mxu1 %v2048_v12  ;;  %2303 = vmatpush1.msra.mxu0 %v2050_v13  ;;  %v2748_v12 = vld [vmem:[%s5133_s9 + $0x30] sm:$0xff]  ;;  %v2763_v13 = vld [vmem:[%s5133_s9 + $0xa8] sm:$0xff] }
 0x16b   :  { %2233 = vmatprep.subr.mxu1 %v2041_v14  ;;  %2304 = vmatprep.subr.mxu0 %v2043_v15  ;;  %v2747_v14 = vld [vmem:[%s5133_s9 + $0x28] sm:$0xff]  ;;  %v2762_v15 = vld [vmem:[%s5133_s9 + $0xa0] sm:$0xff] }
 0x16c   :  { %2234 = vmatpush1.msra.mxu1 %v2040_v16  ;;  %2305 = vmatpush1.msra.mxu0 %v2042_v17  ;;  %v2746_v16 = vld [vmem:[%s5133_s9 + $0x20] sm:$0xff]  ;;  %v2761_v17 = vld [vmem:[%s5133_s9 + $0x98] sm:$0xff] }
 0x16d   :  { %2235 = vmatprep.subr.mxu1 %v2033_v18  ;;  %2306 = vmatprep.subr.mxu0 %v2035_v19  ;;  %v2745_v18 = vld [vmem:[%s5133_s9 + $0x18] sm:$0xff]  ;;  %v2760_v19 = vld [vmem:[%s5133_s9 + $0x90] sm:$0xff] }
 0x16e   :  { %2236 = vmatpush1.msra.mxu1 %v2032_v20  ;;  %2269 = vmatprep.mubr.f32.mxu1 %v3279_v4  ;;  %v2744_v20 = vld [vmem:[%s5133_s9 + $0x10] sm:$0xff] }
 0x16f   :  { %2307 = vmatpush1.msra.mxu0 %v2034_v21  ;;  %2340 = vmatprep.mubr.f32.mxu0 %v3279_v4  ;;  %v2759_v21 = vld [vmem:[%s5133_s9 + $0x88] sm:$0xff] }
 0x170   :  { %2991 = vmatmul.mubr.msk.f32.vlgmr.msra.gmra.mxu1 %vm150_vm1, %v2060_v6  ;;  %2992 = vmatmul.mubr.msk.f32.vlgmr.msra.gmra.mxu0 %vm150_vm1, %v2060_v6  ;;  %v2767_v6 = vld [vmem:[%s5133_s9 + $0xc8] sm:$0xff] }
 0x171   :  { %2414 = vmatprep.subr.mxu1 %v2380_v22  ;;  %2485 = vmatprep.subr.mxu0 %v2382_v23  ;;  %v2743_v22 = vld [vmem:[%s5133_s9 + $0x8] sm:$0xff]  ;;  %v2758_v23 = vld [vmem:[%s5133_s9 + $0x80] sm:$0xff] }
 0x172   :  { %2415 = vmatpush1.msra.mxu1 %v2379_v24  ;;  %2486 = vmatpush1.msra.mxu0 %v2381_v25  ;;  %v2742_v24 = vld [vmem:[%s5133_s9] sm:$0xff]  ;;  %v818_v25 = vpop.f32.mrf.mxu1 }
 0x173   :  { %2416 = vmatprep.subr.mxu1 %v2372_v26  ;;  %2487 = vmatprep.subr.mxu0 %v2374_v27 }
 0x174   :  { %2417 = vmatpush1.msra.mxu1 %v2371_v28  ;;  %2488 = vmatpush1.msra.mxu0 %v2373_v29  ;;  %v820_v26 = vpop.f32.mrf.mxu1  ;;  %v889_v28 = vpop.f32.mrf.mxu0 }
 0x175   :  { %2418 = vmatprep.subr.mxu1 %v2364_v30  ;;  %2489 = vmatprep.subr.mxu0 %v2366_v31 }
 0x176   :  { %2419 = vmatpush1.msra.mxu1 %v2363_v32  ;;  %2490 = vmatpush1.msra.mxu0 %v2365_v62  ;;  %v5045_v27 = vpop.f32.mrf.mxu1  ;;  %v891_v30 = vpop.f32.mrf.mxu0 }
 0x177   :  { %2420 = vmatprep.subr.mxu1 %v2356_v33  ;;  %2491 = vmatprep.subr.mxu0 %v2358_v34 }
 0x178   :  { %2421 = vmatpush1.msra.mxu1 %v2355_v35  ;;  %2454 = vmatprep.mubr.f32.mxu1 %v3279_v4  ;;  %v5047_v29 = vpop.f32.mrf.mxu1 }
 0x179   :  { %2492 = vmatpush1.msra.mxu0 %v2357_v36  ;;  %2525 = vmatprep.mubr.f32.mxu0 %v3279_v4 }
 0x17a   :  { %2993 = vmatmul.mubr.msk.f32.vlgmr.msra.gmra.mxu1 %vm150_vm1, %v2387_v37  ;;  %2994 = vmatmul.mubr.msk.f32.vlgmr.msra.gmra.mxu0 %vm150_vm1, %v2387_v37  ;;  %v1177_v31 = vpop.f32.mrf.mxu1 }
 0x17b   :  { %2556 = vmatprep.subr.mxu1 %v2384_v38  ;;  %2627 = vmatprep.subr.mxu0 %v2386_v39 }
 0x17c   :  { %2557 = vmatpush1.msra.mxu1 %v2383_v40  ;;  %2628 = vmatpush1.msra.mxu0 %v2385_v41  ;;  %v1179_v62 = vpop.f32.mrf.mxu1 }
 0x17d   :  { %2558 = vmatprep.subr.mxu1 %v2376_v1  ;;  %2629 = vmatprep.subr.mxu0 %v2378_v42 }
 0x17e   :  { %2559 = vmatpush1.msra.mxu1 %v2375_v43  ;;  %2630 = vmatpush1.msra.mxu0 %v2377_v44  ;;  %v5049_v33 = vpop.f32.mrf.mxu1 }
 0x17f   :  { %2560 = vmatprep.subr.mxu1 %v2368_v45  ;;  %2631 = vmatprep.subr.mxu0 %v2370_v46 }
 0x180   :  { %2561 = vmatpush1.msra.mxu1 %v2367_v47  ;;  %2632 = vmatpush1.msra.mxu0 %v2369_v48  ;;  %v5053_v35 = vpop.f32.mrf.mxu1 }
 0x181   :  { %2562 = vmatprep.subr.mxu1 %v2360_v49  ;;  %2633 = vmatprep.subr.mxu0 %v2362_v50 }
 0x182   :  { %2563 = vmatpush1.msra.mxu1 %v2359_v52  ;;  %2596 = vmatprep.mubr.f32.mxu1 %v3279_v4 }
 0x183   :  { %2634 = vmatpush1.msra.mxu0 %v2361_v54  ;;  %2667 = vmatprep.mubr.f32.mxu0 %v3279_v4  ;;  %v2756_v4 = vld [vmem:[%s5133_s9 + $0x70] sm:$0xff] }
 0x184   :  { %2995 = vmatmul.mubr.msk.f32.vlgmr.msra.gmra.mxu1 %vm150_vm1, %v2387_v37  ;;  %2996 = vmatmul.mubr.msk.f32.vlgmr.msra.gmra.mxu0 %vm150_vm1, %v2387_v37  ;;  %v1319_v37 = vpop.f32.mrf.mxu1 }
 0x185   :  { %3117 = vmatprep.subr.mxu1 %v2773_v56  ;;  %v1336_v56 = vsub.s32 2, %v4567_v51 }
 0x186   :  { %3118 = vmatpush3.msra.mxu1 %v2757_v57  ;;  %v1321_v39 = vpop.f32.mrf.mxu1  ;;  %v1324_v57 = vld [vmem:[%s5132_s8] sm:$0xff] }
 0x187   :  { %3119 = vmatprep.subr.mxu1 %v2772_v58 }
 0x188   :  { %3120 = vmatpush3.msra.mxu1 %v2756_v4 }
 0x189   :  { %3121 = vmatprep.subr.mxu1 %v2771_v59  ;;  %v1332_v59 = vsub.s32 1, %v4567_v51 }
 0x18a   :  { %3122 = vmatpush3.msra.mxu1 %v2755_v60  ;;  %v1340_v60 = vsub.s32 3, %v4567_v51 }
 0x18b   :  { %3123 = vmatprep.subr.mxu1 %v2770_v61 }
 0x18c   :  { %3124 = vmatpush3.msra.mxu1 %v2754_v63 }
 0x18d   :  { %3125 = vmatprep.subr.mxu1 %v2769_v0  ;;  %v1031_v32 = vpop.f32.mrf.mxu0 }
 0x18e   :  { %3126 = vmatpush3.msra.mxu1 %v2753_v2  ;;  %v1178_v2 = vadd.f32 %v1177_v31, %v889_v28 }
 0x18f   :  { %3127 = vmatprep.subr.mxu1 %v2768_v3  ;;  %v5051_v34 = vpop.f32.mrf.mxu0  ;;  %v1329_v3 = vrot.slane %v1324_v57, %v4573_v53 }
 0x190   :  { %3128 = vmatpush3.msra.mxu1 %v2752_v5  ;;  %v1337_v5 = vrot.slane %v1324_v57, %v1336_v56  ;;  %v1249_v56 = vadd.f32 %v5049_v33, %v5045_v27 }
 0x191   :  { %3129 = vmatprep.subr.mxu1 %v2767_v6  ;;  %v1106_v36 = vpop.f32.mrf.mxu0 }
 0x192   :  { %3130 = vmatpush3.msra.mxu1 %v2751_v7  ;;  %v1107_v0 = vadd.f32 %v1106_v36, %v818_v25  ;;  %v1180_v7 = vadd.f32 %v1179_v62, %v891_v30  ;;  %v1348_v30 = vsub.s32 5, %v4567_v51 }
 0x193   :  { %3131 = vmatprep.subr.mxu1 %v2766_v8  ;;  %v1108_v38 = vpop.f32.mrf.mxu0  ;;  %v1333_v8 = vrot.slane %v1324_v57, %v1332_v59 }
 0x194   :  { %3132 = vmatpush3.msra.mxu1 %v2750_v9  ;;  %v1109_v6 = vadd.f32 %v1108_v38, %v820_v26  ;;  %v1341_v9 = vrot.slane %v1324_v57, %v1340_v60  ;;  %v1320_v26 = vadd.f32 %v1319_v37, %v1031_v32  ;;  %v1322_v60 = vadd.f32 %v1321_v39, %v5051_v34 }
 0x195   :  { %3133 = vmatprep.subr.mxu1 %v2765_v10 }
 0x196   :  { %3134 = vmatpush3.msra.mxu1 %v2749_v11 }
 0x197   :  { %3135 = vmatprep.subr.mxu1 %v2764_v55  ;;  %v1366_v55 = vadd.f32 %v1329_v3, %v1107_v0  ;;  %v1251_v3 = vadd.f32 %v5053_v35, %v5047_v29 }
 0x198   :  { %3136 = vmatpush3.msra.mxu1 %v2748_v12  ;;  %v1368_v12 = vadd.f32 %v1337_v5, %v1178_v2 }
 0x199   :  { %3137 = vmatprep.subr.mxu1 %v2763_v13  ;;  %v1352_v13 = vsub.s32 6, %v4567_v51 }
 0x19a   :  { %3138 = vmatpush3.msra.mxu1 %v2747_v14 }
 0x19b   :  { %3139 = vmatprep.subr.mxu1 %v2762_v15  ;;  %v1353_v28 = vrot.slane %v1324_v57, %v1352_v13 }
 0x19c   :  { %3140 = vmatpush3.msra.mxu1 %v2746_v16 }
 0x19d   :  { %3141 = vmatprep.subr.mxu1 %v2761_v17 }
 0x19e   :  { %3142 = vmatpush3.msra.mxu1 %v2745_v18  ;;  %v1367_v18 = vadd.f32 %v1333_v8, %v1109_v6 }
 0x19f   :  { %3143 = vmatprep.subr.mxu1 %v2760_v19  ;;  %v1369_v19 = vadd.f32 %v1341_v9, %v1180_v7 }
 0x1a0   :  { %3144 = vmatpush3.msra.mxu1 %v2744_v20  ;;  %v1344_v20 = vsub.s32 4, %v4567_v51 }
 0x1a1   :  { %3145 = vmatprep.subr.mxu1 %v2759_v21  ;;  %v1356_v21 = vsub.s32 7, %v4567_v51 }
 0x1a2   :  { %3146 = vmatpush3.msra.mxu1 %v2743_v22  ;;  %v1345_v0 = vrot.slane %v1324_v57, %v1344_v20 }
 0x1a3   :  { %3147 = vmatprep.subr.mxu1 %v2758_v23 }
 0x1a4   :  { %3148 = vmatpush3.msra.mxu1 %v2742_v24  ;;  %v1370_v34 = vadd.f32 %v1345_v0, %v1249_v56 }
 0x1ff   :  { %v1475_v40 = vpop.f32.mrf.mxu1  ;;  %v1546_v41 = vpop.f32.mrf.mxu0 }
 0x200   :  { %v1693_v16 = vadd.f32 %v1475_v40, %v1366_v55  ;;  %v1695_v17 = vadd.f32 %v1546_v41, %v1368_v12 }
 0x201   :  { %v1477_v1 = vpop.f32.mrf.mxu1  ;;  %v1548_v42 = vpop.f32.mrf.mxu0 }
 0x202   :  { %v1694_v22 = vadd.f32 %v1477_v1, %v1367_v18  ;;  %v1696_v23 = vadd.f32 %v1548_v42, %v1369_v19  ;;  %v1357_v1 = vrot.slane %v1324_v57, %v1356_v21 }
 0x204   :  { %v1373_v39 = vadd.f32 %v1357_v1, %v1322_v60 }
 0x208   :  { %v5055_v43 = vpop.f32.mrf.mxu1  ;;  %v5057_v44 = vpop.f32.mrf.mxu0 }
 0x20a   :  { %v5059_v45 = vpop.f32.mrf.mxu1  ;;  %v5061_v46 = vpop.f32.mrf.mxu0 }
 0x20b   :  { %v1700_v29 = vadd.f32 %v5061_v46, %v1373_v39 }
 0x212   :  { %v1802_v47 = vpop.f32.mrf.mxu1  ;;  %v1873_v48 = vpop.f32.mrf.mxu0 }
 0x213   :  { %v2020_v24 = vadd.f32 %v1802_v47, %v1693_v16  ;;  %v2022_v25 = vadd.f32 %v1873_v48, %v1695_v17 }
 0x214   :  { %v1804_v49 = vpop.f32.mrf.mxu1  ;;  %v1875_v50 = vpop.f32.mrf.mxu0 }
 0x215   :  { %v2021_v36 = vadd.f32 %v1804_v49, %v1694_v22  ;;  %v2023_v38 = vadd.f32 %v1875_v50, %v1696_v23  ;;  %v1372_v49 = vadd.f32 %v1353_v28, %v1320_v26  ;;  %v1349_v50 = vrot.slane %v1324_v57, %v1348_v30 }
 0x217   :  { %v1699_v7 = vadd.f32 %v5057_v44, %v1372_v49 }
 0x21c   :  { %v5063_v52 = vpop.f32.mrf.mxu1  ;;  %v5065_v54 = vpop.f32.mrf.mxu0 }
 0x21d   :  { %v2026_v35 = vadd.f32 %v5065_v54, %v1699_v7  ;;  %v3004_v7 = vld [vmem:[%s5134_s10] ss:$0 sm:$0xff] }
 0x21e   :  { %v5071_v58 = vpop.f32.mrf.mxu1  ;;  %v5073_v4 = vpop.f32.mrf.mxu0 }
 0x21f   :  { %v2027_v12 = vadd.f32 %v5073_v4, %v1700_v29 }
 0x226   :  { %v2129_v61 = vpop.f32.mrf.mxu1  ;;  %v2200_v63 = vpop.f32.mrf.mxu0 }
 0x227   :  { %v2347_v40 = vadd.f32 %v2129_v61, %v2020_v24  ;;  %v2349_v41 = vadd.f32 %v2200_v63, %v2022_v25 }
 0x228   :  { %v2131_v10 = vpop.f32.mrf.mxu1  ;;  %v2202_v11 = vpop.f32.mrf.mxu0 }
 0x229   :  { %v2348_v48 = vadd.f32 %v2131_v10, %v2021_v36  ;;  %v2350_v32 = vadd.f32 %v2202_v11, %v2023_v38  ;;  %v1371_v10 = vadd.f32 %v1349_v50, %v1251_v3  ;;  %v1697_v11 = vadd.f32 %v5055_v43, %v1370_v34 }
 0x22b   :  { %v1698_v57 = vadd.f32 %v5059_v45, %v1371_v10  ;;  %v2024_v55 = vadd.f32 %v5063_v52, %v1697_v11 }
 0x22d   :  { %v2025_v17 = vadd.f32 %v5071_v58, %v1698_v57 }
 0x230   :  { %v2271_v14 = vpop.f32.mrf.mxu1  ;;  %v2342_v15 = vpop.f32.mrf.mxu0 }
 0x231   :  { %v2353_v44 = vadd.f32 %v2342_v15, %v2026_v35  ;;  %v2351_v18 = vadd.f32 %v2271_v14, %v2024_v55 }
 0x232   :  { %v2273_v31 = vpop.f32.mrf.mxu1  ;;  %v2344_v62 = vpop.f32.mrf.mxu0 }
 0x233   :  { %v2354_v19 = vadd.f32 %v2344_v62, %v2027_v12  ;;  %v2352_v21 = vadd.f32 %v2273_v31, %v2025_v17  ;;  %v3003_v62 = vld.sshfl [vmem:[%s5127_s3] sm:$0x33 pattern:$0x76325410] }
 0x23a   :  { %v2456_v42 = vpop.f32.mrf.mxu1  ;;  %v2527_v47 = vpop.f32.mrf.mxu0 }
 0x23b   :  { %v2674_v37 = vadd.f32 %v2456_v42, %v2347_v40  ;;  %v2676_v2 = vadd.f32 %v2527_v47, %v2349_v41  ;;  %v2729_v41 = vcombine.high %v3003_v62, %v3003_v62 }
 0x23c   :  { %v2458_v61 = vpop.f32.mrf.mxu1  ;;  %v2529_v63 = vpop.f32.mrf.mxu0 }
 0x23d   :  { %v2997_v5 = vmul.f32 -1.442695, %v2674_v37  ;;  %v2999_v6 = vmul.f32 -1.442695, %v2676_v2  ;;  %v2675_v27 = vadd.f32 %v2458_v61, %v2348_v48  ;;  %v2677_v33 = vadd.f32 %v2529_v63, %v2350_v32 }
 0x23f   :  { %3176 = vpow2.f32 %v2997_v5  ;;  %v2998_v8 = vmul.f32 -1.442695, %v2675_v27  ;;  %v3000_v9 = vmul.f32 -1.442695, %v2677_v33 }
 0x240   :  { %3178 = vpow2.f32 %v2999_v6 }
 0x241   :  { %3180 = vpow2.f32 %v2998_v8 }
 0x242   :  { %3182 = vpow2.f32 %v3000_v9 }
 0x244   :  { %v2598_v13 = vpop.f32.mrf.mxu1  ;;  %v2669_v16 = vpop.f32.mrf.mxu0 }
 0x245   :  { %v2680_v43 = vadd.f32 %v2669_v16, %v2353_v44  ;;  %v2678_v54 = vadd.f32 %v2598_v13, %v2351_v18  ;;  %v3214_v44 = vld [vmem:[%s5125_s1] sm:$0x3]  ;;  %s3281_s1 = smov [#allocation4]  }
 0x246   :  { %v2600_v20 = vpop.f32.mrf.mxu1  ;;  %v2671_v46 = vpop.f32.mrf.mxu0  ;;  %v2870_v13 = vsel %vm2851_vm3, %v3214_v44, 0.0  ;;  %s2950_s10 = sshll.u32 %s3281_s1, 4  ;;  %s2951_s10 = int_to_ptr.vmem [resolvable:$true] %s2950_s10 }
 0x247   :  { %v2681_v22 = vadd.f32 %v2671_v46, %v2354_v19  ;;  %v3001_v23 = vmul.f32 -1.442695, %v2680_v43  ;;  %v2679_v24 = vadd.f32 %v2600_v20, %v2352_v21  ;;  %3184 = vtanh.f32 %v2678_v54  ;;  %s3215_s5 = scalar_lea.vmem %s2951_s10, 64  ;;  %p3220_p1 = scmp.lt.s32.totalorder %s2951_s10, %s2951_s10 }
 0x248   :  { %v2871_v16 = vrot.slane %v2870_v13, 4  ;;  %p3216_p0 = scmp.ne.s32.totalorder %s2951_s10, %s3215_s5  ;;  %p3221_p2 = scmp.lt.s32.totalorder %s3215_s5, %s3215_s5 }
 0x249   :  { %v3002_v45 = vmul.f32 -1.442695, %v2681_v22  ;;  %3186 = vpow2.f32 %v3001_v23 }
 0x24a   :  { %3188 = vtanh.f32 %v2679_v24  ;;  %v2872_v17 = vadd.f32 %v2871_v16, %v2870_v13  ;;  %p3222_p3 = por %p3221_p2, %p3220_p1 }
 0x24b   :  { %3190 = vpow2.f32 %v3002_v45 }
 0x24c   :  { %v3177_v52 = vpop.eup %3176  ;;  %v2873_v19 = vrot.slane %v2872_v17, 2  ;;  %p3223_p4 = pnand %p3222_p3, %p3216_p0 }
 0x24d   :  { %v3179_v4 = vpop.eup %3178  ;;  %v2688_v15 = vadd.f32 1.0, %v3177_v52 }
 0x24e   :  { %v3181_v25 = vpop.eup %3180  ;;  %v2700_v26 = vadd.f32 1.0, %v3179_v4  ;;  %v2874_v21 = vadd.f32 %v2873_v19, %v2872_v17 }
 0x24f   :  { %v3183_v58 = vpop.eup %3182  ;;  %3192 = vrcp.f32 %v2688_v15  ;;  %v2689_v14 = vadd.f32 1.0, %v3181_v25 }
 0x250   :  { %3194 = vrcp.f32 %v2700_v26  ;;  %v2701_v28 = vadd.f32 1.0, %v3183_v58  ;;  %v2875_v23 = vrot.slane %v2874_v21, 1 }
 0x251   :  { %3196 = vrcp.f32 %v2689_v14 }
 0x252   :  { %3198 = vrcp.f32 %v2701_v28  ;;  %v2876_v52 = vadd.f32 %v2875_v23, %v2874_v21 }
 0x254   :  { %v3185_v30 = vpop.eup %3184 }
 0x256   :  { %v3187_v31 = vpop.eup %3186 }
 0x257   :  { %v3189_v36 = vpop.eup %3188  ;;  %v2714_v0 = vadd.f32 1.0, %v3187_v31 }
 0x258   :  { %v3191_v38 = vpop.eup %3190 }
 0x259   :  { %v2715_v32 = vadd.f32 1.0, %v3191_v38  ;;  %3200 = vrcp.f32 %v2714_v0 }
 0x25c   :  { %v3193_v40 = vpop.eup %3192 }
 0x25d   :  { %v3195_v56 = vpop.eup %3194  ;;  %v2734_v60 = vmul.f32 %v3193_v40, %v3185_v30 }
 0x25e   :  { %v3197_v1 = vpop.eup %3196  ;;  %v2732_v42 = vmul.f32 %v3195_v56, %v3003_v62 }
 0x25f   :  { %v3199_v47 = vpop.eup %3198  ;;  %v2735_v48 = vmul.f32 %v3197_v1, %v3189_v36 }
 0x260   :  { %v2736_v37 = vadd.f32 %v2734_v60, %v2732_v42  ;;  %v2733_v2 = vmul.f32 %v3199_v47, %v2729_v41 }
 0x262   :  { %3202 = vtanh.f32 %v2736_v37  ;;  %v2737_v3 = vadd.f32 %v2735_v48, %v2733_v2 }
 0x263   :  { %3204 = vrcp.f32 %v2715_v32 }
 0x264   :  { %3206 = vtanh.f32 %v2737_v3  ;;  %v2922_v49 = vcombine.low %v2736_v37, %v2737_v3 }
 0x266   :  { %3006 = vst.sshfl [vmem:[#allocation6] sm:$0x33 pattern:$0x76325410] %v2922_v49  ;;  %v3201_v50 = vpop.eup %3200 }
 0x26f   :  { %v3203_v61 = vpop.eup %3202 }
 0x270   :  { %v3205_v63 = vpop.eup %3204  ;;  %v2740_v27 = vmul.f32 %v3203_v61, %v3201_v50 }
 0x271   :  { %v3207_v5 = vpop.eup %3206 }
 0x272   :  { %v2741_v6 = vmul.f32 %v3207_v5, %v3205_v63 }
 0x274   :  { %2845 = vmatprep.mubr.f32.mxu1 %v2741_v6  ;;  %v2910_v33 = vcombine.low %v2740_v27, %v2741_v6 }
 0x275   :  { %2846 = vmatmul.mubr.f32.vlgmr.msra.gmra.mxu1 %v2740_v27 }
 0x276   :  { %3005 = vst.sshfl [vmem:[#allocation4] sm:$0x33 pattern:$0x76325410] %v2910_v33 }
 0x335   :  { %v3149_v34 = vpop.f32.mrf.mxu1 }
 0x337   :  { %v3150_v39 = vpop.f32.mrf.mxu1 }
 0x338   :  { %v3151_v8 = vadd.f32 %v3150_v39, %v3149_v34 }
 0x33a   :  { %v2848_v9 = vadd.f32 %v3151_v8, %v3004_v7 }
 0x33c   :  { %v2852_v10 = vsel %vm2851_vm3, %v2848_v9, -inf }
 0x33d   :  { %2853 = vmax.xlane.f32.xlu0 %v2852_v10 }
 0x3c6   :  { %v2854_v11 = vpop.xlane.xlu0 %2853 }
 0x3c7   :  { %v2855_v29 = vsub.f32 %v2848_v9, %v2854_v11 }
 0x3c9   :  { %v2856_v35 = vmul.f32 1.442695, %v2855_v29 }
 0x3cb   :  { %3208 = vpow2.f32 %v2856_v35 }
 0x3d8   :  { %v3209_v57 = vpop.eup %3208 }
 0x3d9   :  { %v2858_v55 = vsel %vm2851_vm3, %v3209_v57, 0.0 }
 0x3da   :  { %2859 = vadd.xlane.f32.xlu0 %v2858_v55 }
 0x463   :  { %v2860_v12 = vpop.xlane.xlu0 %2859 }
 0x464   :  { %3210 = vrcp.f32 %v2860_v12 }
 0x471   :  { %v3211_v18 = vpop.eup %3210 }
 0x472   :  { %v2862_v43 = vmul.f32 %v3211_v18, %v3209_v57 }
 0x474   :  { %v2863_v20 = vsel %vm2851_vm3, %v2862_v43, 0.0 }
 0x475   :  { %v2864_v46 = vrot.slane %v2863_v20, 4 }
 0x477   :  { %v2865_v54 = vadd.f32 %v2864_v46, %v2863_v20 }
 0x479   :  { %v2866_v22 = vrot.slane %v2865_v54, 2 }
 0x47b   :  { %v2867_v24 = vadd.f32 %v2866_v22, %v2865_v54 }
 0x47d   :  { %v2868_v45 = vrot.slane %v2867_v24, 1 }
 0x47f   :  { %v2869_v4 = vadd.f32 %v2868_v45, %v2867_v24 }
 0x481   :  { %v2877_v15 = vmul.f32 %v2876_v52, %v2869_v4 }
 0x483   :  { %v2879_v25 = vsel %vm2878_vm4, %v2877_v15, 0.0 }
 0x484   :  { %2880 = vadd.xlane.f32.xlu1 %v2879_v25 }
 0x50d   :  { %v2881_v26 = vpop.xlane.xlu1 %2880 }
 0x50e   :  { %v2882_v58 = vrot.slane %v2881_v26, 4 }
 0x510   :  { %v2883_v14 = vadd.f32 %v2882_v58, %v2881_v26 }
 0x512   :  { %v2884_v28 = vrot.slane %v2883_v14, 2 }
 0x513   :  { %3226 = shalt.err (!%p3223_p4)
}
 0x514   :  { %2953 = dma.vmem_to_hbm [thread:$0]  %s2951_s10, 64, %s5136_s12, [#allocation5]   ;;  %v2885_v30 = vadd.f32 %v2884_v28, %v2883_v14 }
 0x515   :  { %s3282_s26 = smov [#allocation6]  }
 0x516   :  { %s2960_s7 = sshll.u32 %s3282_s26, 4  ;;  %v2886_v31 = vrot.slane %v2885_v30, 1  ;;  %s2961_s7 = int_to_ptr.vmem [resolvable:$true] %s2960_s7 }
 0x517   :  { %s3235_s27 = scalar_lea.vmem %s2961_s7, 64  ;;  %p3240_p6 = scmp.lt.s32.totalorder %s2961_s7, %s2961_s7 }
 0x518   :  { %p3236_p5 = scmp.ne.s32.totalorder %s2961_s7, %s3235_s27  ;;  %p3241_p7 = scmp.lt.s32.totalorder %s3235_s27, %s3235_s27 }
 0x51a   :  { %p3242_p8 = por %p3241_p7, %p3240_p6 }
 0x51c   :  { %p3243_p9 = pnand %p3242_p8, %p3236_p5 }
 0x51e   :  { %3246 = shalt.err (!%p3243_p9)
}
 0x51f   :  { %2963 = dma.vmem_to_hbm [thread:$0]  %s2961_s7, 64, %s5137_s13, [#allocation5]   ;;  %v2887_v62 = vadd.f32 %v2886_v31, %v2885_v30  ;;  %v2895_v40 = vrot.slane %v2862_v43, %v4573_v53  ;;  %v2903_v41 = vrot.slane %v2862_v43, %v1332_v59 }
 0x520   :  { %s3283_s12 = smov [#allocation2]  }
 0x521   :  { %3163 = vpush %v2887_v62  ;;  %s2937_s30 = sshll.u32 %s3283_s12, 4  ;;  %v2896_v56 = vmul.f32 %v3214_v44, %v2895_v40  ;;  %v2904_v60 = vmul.f32 %v3214_v44, %v2903_v41  ;;  %s2938_s30 = int_to_ptr.vmem [resolvable:$true] %s2937_s30 }
 0x522   :  { %s3255_s13 = scalar_lea.vmem %s2938_s30, 64  ;;  %p3260_p11 = scmp.lt.s32.totalorder %s2938_s30, %s2938_s30 }
 0x523   :  { %p3256_p10 = scmp.ne.s32.totalorder %s2938_s30, %s3255_s13  ;;  %p3261_p12 = scmp.lt.s32.totalorder %s3255_s13, %s3255_s13 }
 0x525   :  { %p3262_p13 = por %p3261_p12, %p3260_p11 }
 0x527   :  { %p3263_p0 = pnand %p3262_p13, %p3256_p10 }
 0x552   :  { %s3164_s29 = spop %3163 }
 0x553   :  { %v2889_v36 = vstv %s3164_s29 }
 0x554   :  { %3212 = vrcp.f32 %v2889_v36 }
 0x561   :  { %v3213_v38 = vpop.eup %3212 }
 0x562   :  { %3165 = vpush %v3213_v38 }
 0x593   :  { %s3166_s14 = spop %3165 }
 0x594   :  { %v2897_v0 = vstv %s3166_s14 }
 0x595   :  { %v2898_v1 = vmul.f32 %v2897_v0, %v2896_v56  ;;  %v2905_v42 = vmul.f32 %v2904_v60, %v2897_v0 }
 0x597   :  { %2899 = vst.msk [vmem:[#allocation2] sm:$0x3] %vm2851_vm3, %v2898_v1  ;;  %2907 = vst.msk [vmem:[#allocation2 + $0x2] sm:$0x3] %vm2851_vm3, %v2905_v42 }
 0x598   :  { %3266 = shalt.err (!%p3263_p0)
}
 0x599   :  { %s3284_s2 = smov 32   ;;  %s3285_s15 = smov 2  }
 0x59a   :  { %2943 = dma.vmem_to_hbm [thread:$0]  %s2938_s30, 64, %s5135_s11, [#allocation3], %s3284_s2, %s3284_s2, %s3285_s15  }
 0x59b   :  { %3275 = dma.done.wait [#allocation3], 64  }
 0x59c   :  { %3276 = vsyncadd [#allocation3], 4294967232 }
 0x59d   :  { %3277 = dma.done.wait [#allocation5], 128  }
 0x59e   :  { %3278 = vsyncadd [#allocation5], 4294967168 }
 0x59f   :  { %2973 = vsyncpa [#allocation3], 1 }
 0x5a0   :  { %2974 = vsyncpa [#allocation5], 1 }

</bundles_post_ra>
